<compile_context>
chip_gen: v7x
topology: tpu7x:2x2x1
jax: 0.10.0
libtpu: 0.0.40
codegen_flags: <defaults>
</compile_context>

<pallas_src>
from functools import partial

import jax
import jax.numpy as jnp
from jax import lax
from jax.experimental import pallas as pl
from jax.experimental.pallas import tpu as pltpu
from jax.scipy.special import logsumexp

BN_EPS = 1e-5            # torch.nn.BatchNorm1d default eps
NORM_EPS = 1e-12         # F.normalize default eps
MAX_RED_TILE = 1792      # w1 reduction tile cap (VMEM-safe on v7x's 64 MiB)
VMEM_LIMIT_BYTES = 48 * 1024 * 1024


def compress_kernel(x_ref, w1_ref, gamma_ref, beta_ref, w2_ref, b2_ref,
                    queue_ref, simq_ref, simk_ref, kout_ref, acc_ref,
                    *, nb, inv_t_q, inv_t_k):
    """Gridded over the feat_dim reduction of the first Linear."""
    step = pl.program_id(0)

    @pl.when(step == 0)
    def _init():
        acc_ref[...] = jnp.zeros_like(acc_ref)

    # Streamed first Linear: f32 activations x bf16 w1 tile (upcast to f32 for
    # the MXU).  The kernel is HBM-bound on the w1 stream, so the extra MXU
    # passes of an f32 matmul are hidden under the DMA.
    acc_ref[...] += jnp.dot(x_ref[...], w1_ref[...].astype(jnp.float32),
                            preferred_element_type=jnp.float32)

    @pl.when(step == pl.num_programs(0) - 1)
    def _finalize():
        h = acc_ref[...]                          # (2*nb, hidden) f32
        hq, hk = h[:nb], h[nb:]

        # BatchNorm1d in training mode: biased batch statistics, per branch
        # (query rows and key rows keep their own statistics, matching two
        # separate predict() calls).
        mean_q = jnp.mean(hq, axis=0, keepdims=True)
        mean_k = jnp.mean(hk, axis=0, keepdims=True)
        var_q = jnp.mean((hq - mean_q) ** 2, axis=0, keepdims=True)
        var_k = jnp.mean((hk - mean_k) ** 2, axis=0, keepdims=True)
        rows = lax.broadcasted_iota(jnp.int32, (2 * nb, 1), 0)
        is_q = rows < nb
        mean = jnp.where(is_q, mean_q, mean_k)
        inv_std = jnp.where(is_q,
                            lax.rsqrt(var_q + BN_EPS),
                            lax.rsqrt(var_k + BN_EPS))
        hn = (h - mean) * inv_std * gamma_ref[...] + beta_ref[...]
        hn = jnp.maximum(hn, 0.0)                 # ReLU

        # Second Linear (bias), f32 on the resident w2 tile.
        y = jnp.dot(hn, w2_ref[...],
                    preferred_element_type=jnp.float32) + b2_ref[...]

        # F.normalize(dim=1): y / max(||y||, eps) == y * rsqrt(max(||y||^2, eps^2))
        sumsq = jnp.sum(y * y, axis=1, keepdims=True)
        yn = y * lax.rsqrt(jnp.maximum(sumsq, NORM_EPS * NORM_EPS))

        # Similarity vs the (K, hidden) queue: contract the last dims (MXU
        # trans_b form) so no (hidden, K) transpose of the queue is
        # materialized in VMEM.  (If a Mosaic dump ever shows an XLU transpose
        # here, pass the queue pre-transposed instead.)
        logits = lax.dot_general(
            yn, queue_ref[...],
            dimension_numbers=(((1,), (1,)), ((), ())),
            preferred_element_type=jnp.float32)
        logits = logits * jnp.where(is_q, inv_t_q, inv_t_k)
        lq, lk = logits[:nb], logits[nb:]

        # sim_q = log_softmax(logits_q)
        mq = jnp.max(lq, axis=1, keepdims=True)
        lse = mq + jnp.log(jnp.sum(jnp.exp(lq - mq), axis=1, keepdims=True))
        simq_ref[...] = lq - lse

        # sim_k = softmax(logits_k) — exact divide (the finalize step runs
        # once and is off the steady-state critical path).
        mk = jnp.max(lk, axis=1, keepdims=True)
        ek = jnp.exp(lk - mk)
        simk_ref[...] = ek / jnp.sum(ek, axis=1, keepdims=True)

        # normalized keys (still in shuffled order) for the queue enqueue
        kout_ref[...] = yn[nb:]


def _reduction_tiling(feat_dim, max_tile=MAX_RED_TILE):
    """Pick the reduction tile (multiple of 128, <= max_tile) and padded dim."""
    n_steps = max(1, -(-feat_dim // max_tile))
    per_step = -(-feat_dim // n_steps)
    tk = -(-per_step // 128) * 128
    return tk, n_steps * tk


def compress_forward(aligned_q, aligned_k, params, queue, queue_ptr,
                     shuffle_key, T_q=0.1, T_k=0.01, resident_buffers=1):
    """Forward pass of Compress from the roi-aligned features onward.

    Returns (sim_q, sim_k, new_queue, new_queue_ptr).
    """
    nb, feat_dim = aligned_q.shape
    K, hidden = queue.shape
    assert K % nb == 0
    # Sublane tiling of the f32 blocks needs nb to be a multiple of 8.
    # TODO(synk): for other nb, pad rows and mask the BatchNorm statistics.
    assert nb % 8 == 0, "nb must be a multiple of 8 (pad + masked BN stats otherwise)"
    assert hidden % 128 == 0 and K % 128 == 0

    # get_shuffle_ids: random permutation + its inverse (ShuffleBN).
    shuffle_ids = jax.random.permutation(shuffle_key, nb)
    reverse_ids = jnp.zeros((nb,), jnp.int32).at[shuffle_ids].set(
        jnp.arange(nb, dtype=jnp.int32))
    ak_shuf = aligned_k[shuffle_ids]

    w1, gamma, beta, w2, b2 = params

    # Stack query / key branches -> single MXU pass through w1 / w2 / queue.
    # Activations stay f32 (tiny HBM fraction); only w1 is streamed as bf16
    # (the dominant HBM stream), accumulation is f32.
    x = jnp.concatenate([aligned_q, ak_shuf], axis=0)
    w1_bf = w1.astype(jnp.bfloat16)

    tk, feat_pad = _reduction_tiling(feat_dim)
    if feat_pad != feat_dim:
        # Zero padding of the contraction dim contributes nothing to the dot.
        x = jnp.pad(x, ((0, 0), (0, feat_pad - feat_dim)))
        w1_bf = jnp.pad(w1_bf, ((0, feat_pad - feat_dim), (0, 0)))
    grid = (feat_pad // tk,)

    kernel = partial(compress_kernel, nb=nb,
                     inv_t_q=1.0 / T_q, inv_t_k=1.0 / T_k)

    def resident(shape):
        # Resident operands / once-written outputs: constant block index, so
        # single-buffer them (saves ~8 MB of VMEM at real shapes).
        idx = lambda k, _s=shape: (0,) * len(_s)
        if resident_buffers is None:
            return pl.BlockSpec(shape, idx)
        return pl.BlockSpec(shape, idx,
                            pipeline_mode=pl.Buffered(resident_buffers))

    sim_q, sim_k_shuf, k_shuf = pl.pallas_call(
        kernel,
        out_shape=(
            jax.ShapeDtypeStruct((nb, K), jnp.float32),       # log_softmax(q.queue/T_q)
            jax.ShapeDtypeStruct((nb, K), jnp.float32),       # softmax(k.queue/T_k)
            jax.ShapeDtypeStruct((nb, hidden), jnp.float32),  # normalized keys
        ),
        grid_spec=pltpu.PrefetchScalarGridSpec(
            num_scalar_prefetch=0,
            grid=grid,
            in_specs=[
                pl.BlockSpec((2 * nb, tk), lambda k: (0, k)),   # activations (streamed, 2-buf)
                pl.BlockSpec((tk, hidden), lambda k: (k, 0)),   # w1 tiles (streamed, 2-buf)
                resident((1, hidden)),                          # gamma
                resident((1, hidden)),                          # beta
                resident((hidden, hidden)),                     # w2
                resident((1, hidden)),                          # b2
                resident((K, hidden)),                          # queue
            ],
            out_specs=(
                resident((nb, K)),
                resident((nb, K)),
                resident((nb, hidden)),
            ),
            scratch_shapes=[pltpu.VMEM((2 * nb, hidden), jnp.float32)],
        ),
        compiler_params=pltpu.CompilerParams(
            dimension_semantics=("arbitrary",),
            vmem_limit_bytes=VMEM_LIMIT_BYTES),
    )(x, w1_bf, gamma, beta, w2, b2, queue)

    # Undo the ShuffleBN permutation on the key branch (row-wise ops commute
    # with the row permutation).
    k = k_shuf[reverse_ids]
    sim_k = sim_k_shuf[reverse_ids]

    # _dequeue_and_enqueue. In-place when `queue` is donated to the jit.
    ptr = queue_ptr[0]
    new_queue = lax.dynamic_update_slice(queue, k, (ptr, 0))
    new_ptr = queue_ptr.at[0].set((ptr + nb) % K)

    return sim_q, sim_k, new_queue, new_ptr


def init_params(key, feat_dim, hidden_dim, K):
    k1, k2, k3, k4 = jax.random.split(key, 4)
    w1 = jax.random.normal(k1, (feat_dim, hidden_dim), jnp.float32) * 0.02
    gamma = jnp.ones((1, hidden_dim), jnp.float32)   # BatchNorm1d weight
    beta = jnp.zeros((1, hidden_dim), jnp.float32)   # BatchNorm1d bias
    w2 = jax.random.normal(k2, (hidden_dim, hidden_dim), jnp.float32) * 0.02
    b2 = jax.random.normal(k3, (1, hidden_dim), jnp.float32) * 0.02
    # queue buffer: randn then F.normalize(dim=1)
    queue = jax.random.normal(k4, (K, hidden_dim), jnp.float32)
    queue = queue / jnp.maximum(
        jnp.sqrt(jnp.sum(queue * queue, axis=1, keepdims=True)), NORM_EPS)
    queue_ptr = jnp.zeros((1,), jnp.int32)
    return (w1, gamma, beta, w2, b2), queue, queue_ptr


def reference_forward(aligned_q, aligned_k, params, queue, queue_ptr,
                      shuffle_key, T_q=0.1, T_k=0.01):
    """Plain-JAX reference mirroring the kernel's bf16-w1 / f32-activation path."""
    nb = aligned_q.shape[0]
    K = queue.shape[0]
    shuffle_ids = jax.random.permutation(shuffle_key, nb)
    reverse_ids = jnp.zeros((nb,), jnp.int32).at[shuffle_ids].set(
        jnp.arange(nb, dtype=jnp.int32))
    ak_shuf = aligned_k[shuffle_ids]
    w1, gamma, beta, w2, b2 = params
    hi = jax.lax.Precision.HIGHEST
    w1_q = w1.astype(jnp.bfloat16).astype(jnp.float32)   # same bf16 weight stream

    def predict_norm(xb):
        h = jnp.dot(xb, w1_q, precision=hi)
        mean = jnp.mean(h, axis=0, keepdims=True)
        var = jnp.mean((h - mean) ** 2, axis=0, keepdims=True)
        hn = (h - mean) * lax.rsqrt(var + BN_EPS) * gamma + beta
        hn = jnp.maximum(hn, 0.0)
        y = jnp.dot(hn, w2, precision=hi) + b2
        n = jnp.sqrt(jnp.sum(y * y, axis=1, keepdims=True))
        return y / jnp.maximum(n, NORM_EPS)

    q = predict_norm(aligned_q)
    k = predict_norm(ak_shuf)[reverse_ids]
    sim_q = jax.nn.log_softmax(jnp.dot(q, queue.T, precision=hi) / T_q, axis=1)
    sim_k = jax.nn.softmax(jnp.dot(k, queue.T, precision=hi) / T_k, axis=1)
    ptr = queue_ptr[0]
    new_queue = lax.dynamic_update_slice(queue, k, (ptr, 0))
    new_ptr = queue_ptr.at[0].set((ptr + nb) % K)
    return sim_q, sim_k, new_queue, new_ptr


if __name__ == "__main__":
    # Small, hardware-friendly shapes consistent with the module
    # (real module: feat_dim=12544, hidden_dim=1024, K=1024).
    # feat_dim=3584 = 2*1792 exercises the multi-step streamed reduction.
    nb = 8
    feat_dim = 3584
    hidden_dim = 128
    K = 256
    T_q, T_k = 0.1, 0.01

    root = jax.random.PRNGKey(0)
    kp, kq, kk, ks = jax.random.split(root, 4)

    params, queue, queue_ptr = init_params(kp, feat_dim, hidden_dim, K)

    # Stand-ins for roi_align(backbone(img)).view(nb, -1) for query / key paths.
    aligned_q = jax.random.normal(kq, (nb, feat_dim), jnp.float32)
    aligned_k = jax.random.normal(kk, (nb, feat_dim), jnp.float32)

    # Reference first (queue is donated to the kernel call below).
    ref_sim_q, ref_sim_k, ref_queue, ref_ptr = reference_forward(
        aligned_q, aligned_k, params, queue, queue_ptr, ks, T_q=T_q, T_k=T_k)
    jax.block_until_ready((ref_sim_q, ref_sim_k, ref_queue, ref_ptr))

    def run(resident_buffers, queue_buf):
        fwd = jax.jit(partial(compress_forward, T_q=T_q, T_k=T_k,
                              resident_buffers=resident_buffers),
                      donate_argnums=(3,))          # queue updated in place
        return fwd(aligned_q, aligned_k, params, queue_buf, queue_ptr, ks)

    try:
        outs = run(1, queue)                        # single-buffered residents
        jax.block_until_ready(outs)
    except Exception:
        # Fallback if this jax build rejects pipeline_mode=pl.Buffered(1):
        # re-materialize the (possibly donated) queue, use default buffering.
        _, queue_retry, _ = init_params(kp, feat_dim, hidden_dim, K)
        outs = run(None, queue_retry)
        jax.block_until_ready(outs)

    sim_q, sim_k, new_queue, new_ptr = outs

    assert sim_q.shape == (nb, K) and sim_k.shape == (nb, K)
    assert new_queue.shape == (K, hidden_dim)
    # sanity: softmax rows sum to ~1 (exact divide), log_softmax rows
    # logsumexp to ~0.
    assert jnp.allclose(jnp.sum(sim_k, axis=1), 1.0, atol=1e-4)
    assert jnp.allclose(logsumexp(sim_q, axis=1), 0.0, atol=1e-4)
    # Against the plain-JAX reference (same bf16 w1, f32 activations); the
    # remaining differences are matmul-implementation precision (MXU passes vs
    # XLA HIGHEST), amplified by T_k=0.01 on the softmax outputs.
    assert jnp.allclose(new_queue, ref_queue, atol=5e-3)
    assert jnp.allclose(sim_q, ref_sim_q, atol=5e-2)
    assert jnp.allclose(sim_k, ref_sim_k, atol=5e-2)
    assert int(new_ptr[0]) == int(ref_ptr[0]) == nb

    print("KERNEL_OK")
</pallas_src>

<mosaic_0001>
module attributes {stable_mosaic.version = 11 : i64} {
  func.func @compress_kernel(%arg0: i32, %arg1: memref<16x1792xf32, #tpu.memory_space<vmem>>, %arg2: memref<1792x128xbf16, #tpu.memory_space<vmem>>, %arg3: memref<1x128xf32, #tpu.memory_space<vmem>>, %arg4: memref<1x128xf32, #tpu.memory_space<vmem>>, %arg5: memref<128x128xf32, #tpu.memory_space<vmem>>, %arg6: memref<1x128xf32, #tpu.memory_space<vmem>>, %arg7: memref<256x128xf32, #tpu.memory_space<vmem>>, %arg8: memref<8x256xf32, #tpu.memory_space<vmem>>, %arg9: memref<8x256xf32, #tpu.memory_space<vmem>>, %arg10: memref<8x128xf32, #tpu.memory_space<vmem>>, %arg11: memref<16x128xf32, #tpu.memory_space<vmem>>) attributes {dimension_semantics = [#tpu.dimension_semantics<arbitrary>], iteration_bounds = array<i64: 2>, scalar_prefetch = 0 : i64, scratch_operands = 1 : i64, tpu.core_type = #tpu.core_type<tc>, window_params = [{transform_indices = @transform_0, window_bounds = array<i64: 16, 1792>}, {transform_indices = @transform_1, window_bounds = array<i64: 1792, 128>}, {pipeline_mode = #tpu.pipeline_mode<synchronous>, transform_indices = @transform_2, window_bounds = array<i64: 1, 128>}, {pipeline_mode = #tpu.pipeline_mode<synchronous>, transform_indices = @transform_3, window_bounds = array<i64: 1, 128>}, {pipeline_mode = #tpu.pipeline_mode<synchronous>, transform_indices = @transform_4, window_bounds = array<i64: 128, 128>}, {pipeline_mode = #tpu.pipeline_mode<synchronous>, transform_indices = @transform_5, window_bounds = array<i64: 1, 128>}, {pipeline_mode = #tpu.pipeline_mode<synchronous>, transform_indices = @transform_6, window_bounds = array<i64: 256, 128>}, {pipeline_mode = #tpu.pipeline_mode<synchronous>, transform_indices = @transform_7, window_bounds = array<i64: 8, 256>}, {pipeline_mode = #tpu.pipeline_mode<synchronous>, transform_indices = @transform_8, window_bounds = array<i64: 8, 256>}, {pipeline_mode = #tpu.pipeline_mode<synchronous>, transform_indices = @transform_9, window_bounds = array<i64: 8, 128>}]} {
    %c0_i32 = arith.constant 0 : i32
    %0 = arith.cmpi eq, %arg0, %c0_i32 : i32
    %1 = arith.extui %0 : i1 to i32
    %c0_i32_0 = arith.constant 0 : i32
    %2 = arith.cmpi ne, %1, %c0_i32_0 : i32
    scf.if %2 {
      %cst_9 = arith.constant 0.000000e+00 : f32
      %13 = vector.broadcast %cst_9 : f32 to vector<16x128xf32>
      %c0_10 = arith.constant 0 : index
      %c0_11 = arith.constant 0 : index
      %14 = vector.load %arg11[%c0_10, %c0_11] : memref<16x128xf32, #tpu.memory_space<vmem>>, vector<16x128xf32>
      tpu.vector_store %arg11[%c0_10, %c0_11], %13 {strides = array<i32>} : memref<16x128xf32, #tpu.memory_space<vmem>>, vector<16x128xf32>,
    } else {
    }
    %c0 = arith.constant 0 : index
    %c0_1 = arith.constant 0 : index
    %3 = vector.load %arg11[%c0, %c0_1] : memref<16x128xf32, #tpu.memory_space<vmem>>, vector<16x128xf32>
    %c0_2 = arith.constant 0 : index
    %c0_3 = arith.constant 0 : index
    %4 = vector.load %arg1[%c0_2, %c0_3] : memref<16x1792xf32, #tpu.memory_space<vmem>>, vector<16x1792xf32>
    %c0_4 = arith.constant 0 : index
    %c0_5 = arith.constant 0 : index
    %5 = vector.load %arg2[%c0_4, %c0_5] : memref<1792x128xbf16, #tpu.memory_space<vmem>>, vector<1792x128xbf16>
    %6 = arith.extf %5 : vector<1792x128xbf16> to vector<1792x128xf32>
    %cst = arith.constant dense<0.000000e+00> : vector<16x128xf32>
    %7 = tpu.matmul %4, %6, %cst {dimension_numbers = #tpu.dot_dimension_numbers<[1], [0], [0], [1], [0, 0, 1, 1], [], []>} : vector<16x1792xf32>, vector<1792x128xf32>, vector<16x128xf32> -> vector<16x128xf32>
    %8 = arith.addf %3, %7 : vector<16x128xf32>
    %c0_6 = arith.constant 0 : index
    %c0_7 = arith.constant 0 : index
    %9 = vector.load %arg11[%c0_6, %c0_7] : memref<16x128xf32, #tpu.memory_space<vmem>>, vector<16x128xf32>
    tpu.vector_store %arg11[%c0_6, %c0_7], %8 {strides = array<i32>} : memref<16x128xf32, #tpu.memory_space<vmem>>, vector<16x128xf32>,
    %c1_i32 = arith.constant 1 : i32
    %10 = arith.cmpi eq, %arg0, %c1_i32 : i32
    %11 = arith.extui %10 : i1 to i32
    %c0_i32_8 = arith.constant 0 : i32
    %12 = arith.cmpi ne, %11, %c0_i32_8 : i32
    scf.if %12 {
      %c0_9 = arith.constant 0 : index
      %c0_10 = arith.constant 0 : index
      %13 = vector.load %arg11[%c0_9, %c0_10] : memref<16x128xf32, #tpu.memory_space<vmem>>, vector<16x128xf32>
      %14 = vector.extract_strided_slice %13 {offsets = [0, 0], sizes = [8, 128], strides = [1, 1]} : vector<16x128xf32> to vector<8x128xf32>
      %15 = vector.extract_strided_slice %13 {offsets = [8, 0], sizes = [8, 128], strides = [1, 1]} : vector<16x128xf32> to vector<8x128xf32>
      %cst_11 = arith.constant dense<0.000000e+00> : vector<128xf32>
      %16 = vector.multi_reduction <add>, %14, %cst_11 [0] : vector<8x128xf32> to vector<128xf32>
      %17 = vector.shape_cast %16 : vector<128xf32> to vector<1x128xf32>
      %cst_12 = arith.constant 8.000000e+00 : f32
      %18 = vector.broadcast %cst_12 : f32 to vector<1x128xf32>
      %19 = arith.divf %17, %18 : vector<1x128xf32>
      %cst_13 = arith.constant dense<0.000000e+00> : vector<128xf32>
      %20 = vector.multi_reduction <add>, %15, %cst_13 [0] : vector<8x128xf32> to vector<128xf32>
      %21 = vector.shape_cast %20 : vector<128xf32> to vector<1x128xf32>
      %cst_14 = arith.constant 8.000000e+00 : f32
      %22 = vector.broadcast %cst_14 : f32 to vector<1x128xf32>
      %23 = arith.divf %21, %22 : vector<1x128xf32>
      %24 = vector.broadcast %19 : vector<1x128xf32> to vector<8x128xf32>
      %25 = arith.subf %14, %24 : vector<8x128xf32>
      %26 = arith.mulf %25, %25 : vector<8x128xf32>
      %cst_15 = arith.constant dense<0.000000e+00> : vector<128xf32>
      %27 = vector.multi_reduction <add>, %26, %cst_15 [0] : vector<8x128xf32> to vector<128xf32>
      %28 = vector.shape_cast %27 : vector<128xf32> to vector<1x128xf32>
      %cst_16 = arith.constant 8.000000e+00 : f32
      %29 = vector.broadcast %cst_16 : f32 to vector<1x128xf32>
      %30 = arith.divf %28, %29 : vector<1x128xf32>
      %31 = vector.broadcast %23 : vector<1x128xf32> to vector<8x128xf32>
      %32 = arith.subf %15, %31 : vector<8x128xf32>
      %33 = arith.mulf %32, %32 : vector<8x128xf32>
      %cst_17 = arith.constant dense<0.000000e+00> : vector<128xf32>
      %34 = vector.multi_reduction <add>, %33, %cst_17 [0] : vector<8x128xf32> to vector<128xf32>
      %35 = vector.shape_cast %34 : vector<128xf32> to vector<1x128xf32>
      %cst_18 = arith.constant 8.000000e+00 : f32
      %36 = vector.broadcast %cst_18 : f32 to vector<1x128xf32>
      %37 = arith.divf %35, %36 : vector<1x128xf32>
      %38 = tpu.iota {dimensions = array<i32: 0>} : vector<16x1xi32>
      %c8_i32 = arith.constant 8 : i32
      %39 = vector.broadcast %c8_i32 : i32 to vector<16x1xi32>
      %40 = arith.cmpi slt, %38, %39 : vector<16x1xi32>
      %41 = vector.shape_cast %40 : vector<16x1xi1> to vector<16x1xi1>
      %42 = vector.broadcast %41 : vector<16x1xi1> to vector<16x128xi1>
      %43 = vector.shape_cast %19 : vector<1x128xf32> to vector<1x128xf32>
      %44 = vector.broadcast %43 : vector<1x128xf32> to vector<16x128xf32>
      %45 = vector.shape_cast %23 : vector<1x128xf32> to vector<1x128xf32>
      %46 = vector.broadcast %45 : vector<1x128xf32> to vector<16x128xf32>
      %47 = arith.select %42, %44, %46 : vector<16x128xi1>, vector<16x128xf32>
      %cst_19 = arith.constant 9.99999974E-6 : f32
      %48 = vector.broadcast %cst_19 : f32 to vector<1x128xf32>
      %49 = arith.addf %30, %48 : vector<1x128xf32>
      %50 = math.rsqrt %49 : vector<1x128xf32>
      %cst_20 = arith.constant 9.99999974E-6 : f32
      %51 = vector.broadcast %cst_20 : f32 to vector<1x128xf32>
      %52 = arith.addf %37, %51 : vector<1x128xf32>
      %53 = math.rsqrt %52 : vector<1x128xf32>
      %54 = vector.shape_cast %40 : vector<16x1xi1> to vector<16x1xi1>
      %55 = vector.broadcast %54 : vector<16x1xi1> to vector<16x128xi1>
      %56 = vector.shape_cast %50 : vector<1x128xf32> to vector<1x128xf32>
      %57 = vector.broadcast %56 : vector<1x128xf32> to vector<16x128xf32>
      %58 = vector.shape_cast %53 : vector<1x128xf32> to vector<1x128xf32>
      %59 = vector.broadcast %58 : vector<1x128xf32> to vector<16x128xf32>
      %60 = arith.select %55, %57, %59 : vector<16x128xi1>, vector<16x128xf32>
      %61 = arith.subf %13, %47 : vector<16x128xf32>
      %62 = arith.mulf %61, %60 : vector<16x128xf32>
      %c0_21 = arith.constant 0 : index
      %c0_22 = arith.constant 0 : index
      %63 = vector.load %arg3[%c0_21, %c0_22] : memref<1x128xf32, #tpu.memory_space<vmem>>, vector<1x128xf32>
      %64 = vector.broadcast %63 : vector<1x128xf32> to vector<16x128xf32>
      %65 = arith.mulf %62, %64 : vector<16x128xf32>
      %c0_23 = arith.constant 0 : index
      %c0_24 = arith.constant 0 : index
      %66 = vector.load %arg4[%c0_23, %c0_24] : memref<1x128xf32, #tpu.memory_space<vmem>>, vector<1x128xf32>
      %67 = vector.broadcast %66 : vector<1x128xf32> to vector<16x128xf32>
      %68 = arith.addf %65, %67 : vector<16x128xf32>
      %cst_25 = arith.constant 0.000000e+00 : f32
      %69 = vector.broadcast %cst_25 : f32 to vector<16x128xf32>
      %70 = arith.maximumf %68, %69 : vector<16x128xf32>
      %c0_26 = arith.constant 0 : index
      %c0_27 = arith.constant 0 : index
      %71 = vector.load %arg5[%c0_26, %c0_27] : memref<128x128xf32, #tpu.memory_space<vmem>>, vector<128x128xf32>
      %cst_28 = arith.constant dense<0.000000e+00> : vector<16x128xf32>
      %72 = tpu.matmul %70, %71, %cst_28 {dimension_numbers = #tpu.dot_dimension_numbers<[1], [0], [0], [1], [0, 0, 1, 1], [], []>} : vector<16x128xf32>, vector<128x128xf32>, vector<16x128xf32> -> vector<16x128xf32>
      %c0_29 = arith.constant 0 : index
      %c0_30 = arith.constant 0 : index
      %73 = vector.load %arg6[%c0_29, %c0_30] : memref<1x128xf32, #tpu.memory_space<vmem>>, vector<1x128xf32>
      %74 = vector.broadcast %73 : vector<1x128xf32> to vector<16x128xf32>
      %75 = arith.addf %72, %74 : vector<16x128xf32>
      %76 = arith.mulf %75, %75 : vector<16x128xf32>
      %cst_31 = arith.constant dense<0.000000e+00> : vector<16xf32>
      %77 = vector.multi_reduction <add>, %76, %cst_31 [1] : vector<16x128xf32> to vector<16xf32>
      %78 = vector.shape_cast %77 : vector<16xf32> to vector<16x1xf32>
      %cst_32 = arith.constant 1.000000e-24 : f32
      %79 = vector.broadcast %cst_32 : f32 to vector<16x1xf32>
      %80 = arith.maximumf %78, %79 : vector<16x1xf32>
      %81 = math.rsqrt %80 : vector<16x1xf32>
      %82 = vector.broadcast %81 : vector<16x1xf32> to vector<16x128xf32>
      %83 = arith.mulf %75, %82 : vector<16x128xf32>
      %c0_33 = arith.constant 0 : index
      %c0_34 = arith.constant 0 : index
      %84 = vector.load %arg7[%c0_33, %c0_34] : memref<256x128xf32, #tpu.memory_space<vmem>>, vector<256x128xf32>
      %cst_35 = arith.constant dense<0.000000e+00> : vector<16x256xf32>
      %85 = tpu.matmul %83, %84, %cst_35 {dimension_numbers = #tpu.dot_dimension_numbers<[1], [1], [0], [0], [0, 0, 1, 0], [], []>} : vector<16x128xf32>, vector<256x128xf32>, vector<16x256xf32> -> vector<16x256xf32>
      %cst_36 = arith.constant 1.000000e+01 : f32
      %cst_37 = arith.constant 1.000000e+02 : f32
      %86 = vector.broadcast %cst_36 : f32 to vector<16x1xf32>
      %87 = vector.broadcast %cst_37 : f32 to vector<16x1xf32>
      %88 = arith.select %40, %86, %87 : vector<16x1xi1>, vector<16x1xf32>
      %89 = vector.broadcast %88 : vector<16x1xf32> to vector<16x256xf32>
      %90 = arith.mulf %85, %89 : vector<16x256xf32>
      %91 = vector.extract_strided_slice %90 {offsets = [0, 0], sizes = [8, 256], strides = [1, 1]} : vector<16x256xf32> to vector<8x256xf32>
      %92 = vector.extract_strided_slice %90 {offsets = [8, 0], sizes = [8, 256], strides = [1, 1]} : vector<16x256xf32> to vector<8x256xf32>
      %cst_38 = arith.constant dense<0xFF800000> : vector<8xf32>
      %93 = vector.multi_reduction <maximumf>, %91, %cst_38 [1] : vector<8x256xf32> to vector<8xf32>
      %94 = vector.shape_cast %93 : vector<8xf32> to vector<8x1xf32>
      %95 = vector.broadcast %94 : vector<8x1xf32> to vector<8x256xf32>
      %96 = arith.subf %91, %95 : vector<8x256xf32>
      %97 = math.exp %96 : vector<8x256xf32>
      %cst_39 = arith.constant dense<0.000000e+00> : vector<8xf32>
      %98 = vector.multi_reduction <add>, %97, %cst_39 [1] : vector<8x256xf32> to vector<8xf32>
      %99 = vector.shape_cast %98 : vector<8xf32> to vector<8x1xf32>
      %100 = math.log %99 : vector<8x1xf32>
      %101 = arith.addf %94, %100 : vector<8x1xf32>
      %102 = vector.broadcast %101 : vector<8x1xf32> to vector<8x256xf32>
      %103 = arith.subf %91, %102 : vector<8x256xf32>
      %c0_40 = arith.constant 0 : index
      %c0_41 = arith.constant 0 : index
      %104 = vector.load %arg8[%c0_40, %c0_41] : memref<8x256xf32, #tpu.memory_space<vmem>>, vector<8x256xf32>
      tpu.vector_store %arg8[%c0_40, %c0_41], %103 {strides = array<i32>} : memref<8x256xf32, #tpu.memory_space<vmem>>, vector<8x256xf32>,
      %cst_42 = arith.constant dense<0xFF800000> : vector<8xf32>
      %105 = vector.multi_reduction <maximumf>, %92, %cst_42 [1] : vector<8x256xf32> to vector<8xf32>
      %106 = vector.shape_cast %105 : vector<8xf32> to vector<8x1xf32>
      %107 = vector.broadcast %106 : vector<8x1xf32> to vector<8x256xf32>
      %108 = arith.subf %92, %107 : vector<8x256xf32>
      %109 = math.exp %108 : vector<8x256xf32>
      %cst_43 = arith.constant dense<0.000000e+00> : vector<8xf32>
      %110 = vector.multi_reduction <add>, %109, %cst_43 [1] : vector<8x256xf32> to vector<8xf32>
      %111 = vector.shape_cast %110 : vector<8xf32> to vector<8x1xf32>
      %112 = vector.broadcast %111 : vector<8x1xf32> to vector<8x256xf32>
      %113 = arith.divf %109, %112 : vector<8x256xf32>
      %c0_44 = arith.constant 0 : index
      %c0_45 = arith.constant 0 : index
      %114 = vector.load %arg9[%c0_44, %c0_45] : memref<8x256xf32, #tpu.memory_space<vmem>>, vector<8x256xf32>
      tpu.vector_store %arg9[%c0_44, %c0_45], %113 {strides = array<i32>} : memref<8x256xf32, #tpu.memory_space<vmem>>, vector<8x256xf32>,
      %115 = vector.extract_strided_slice %83 {offsets = [8, 0], sizes = [8, 128], strides = [1, 1]} : vector<16x128xf32> to vector<8x128xf32>
      %c0_46 = arith.constant 0 : index
      %c0_47 = arith.constant 0 : index
      %116 = vector.load %arg10[%c0_46, %c0_47] : memref<8x128xf32, #tpu.memory_space<vmem>>, vector<8x128xf32>
      tpu.vector_store %arg10[%c0_46, %c0_47], %115 {strides = array<i32>} : memref<8x128xf32, #tpu.memory_space<vmem>>, vector<8x128xf32>,
    } else {
    }
    return
  }
  func.func @transform_0(%arg0: i32) -> (i32, i32) {
    %c0_i32 = arith.constant 0 : i32
    %c0_i32_0 = arith.constant 0 : i32
    return %c0_i32, %arg0 : i32, i32
  }
  func.func @transform_1(%arg0: i32) -> (i32, i32) {
    %c0_i32 = arith.constant 0 : i32
    %c0_i32_0 = arith.constant 0 : i32
    return %arg0, %c0_i32 : i32, i32
  }
  func.func @transform_2(%arg0: i32) -> (i32, i32) {
    %c0_i32 = arith.constant 0 : i32
    %c0_i32_0 = arith.constant 0 : i32
    %c0_i32_1 = arith.constant 0 : i32
    return %c0_i32, %c0_i32_0 : i32, i32
  }
  func.func @transform_3(%arg0: i32) -> (i32, i32) {
    %c0_i32 = arith.constant 0 : i32
    %c0_i32_0 = arith.constant 0 : i32
    %c0_i32_1 = arith.constant 0 : i32
    return %c0_i32, %c0_i32_0 : i32, i32
  }
  func.func @transform_4(%arg0: i32) -> (i32, i32) {
    %c0_i32 = arith.constant 0 : i32
    %c0_i32_0 = arith.constant 0 : i32
    %c0_i32_1 = arith.constant 0 : i32
    return %c0_i32, %c0_i32_0 : i32, i32
  }
  func.func @transform_5(%arg0: i32) -> (i32, i32) {
    %c0_i32 = arith.constant 0 : i32
    %c0_i32_0 = arith.constant 0 : i32
    %c0_i32_1 = arith.constant 0 : i32
    return %c0_i32, %c0_i32_0 : i32, i32
  }
  func.func @transform_6(%arg0: i32) -> (i32, i32) {
    %c0_i32 = arith.constant 0 : i32
    %c0_i32_0 = arith.constant 0 : i32
    %c0_i32_1 = arith.constant 0 : i32
    return %c0_i32, %c0_i32_0 : i32, i32
  }
  func.func @transform_7(%arg0: i32) -> (i32, i32) {
    %c0_i32 = arith.constant 0 : i32
    %c0_i32_0 = arith.constant 0 : i32
    %c0_i32_1 = arith.constant 0 : i32
    return %c0_i32, %c0_i32_0 : i32, i32
  }
  func.func @transform_8(%arg0: i32) -> (i32, i32) {
    %c0_i32 = arith.constant 0 : i32
    %c0_i32_0 = arith.constant 0 : i32
    %c0_i32_1 = arith.constant 0 : i32
    return %c0_i32, %c0_i32_0 : i32, i32
  }
  func.func @transform_9(%arg0: i32) -> (i32, i32) {
    %c0_i32 = arith.constant 0 : i32
    %c0_i32_0 = arith.constant 0 : i32
    %c0_i32_1 = arith.constant 0 : i32
    return %c0_i32, %c0_i32_0 : i32, i32
  }
}

module attributes {stable_mosaic.version = 11 : i64} {
  func.func @compress_kernel(%arg0: i32, %arg1: memref<16x1792xf32, #tpu.memory_space<vmem>>, %arg2: memref<1792x128xbf16, #tpu.memory_space<vmem>>, %arg3: memref<1x128xf32, #tpu.memory_space<vmem>>, %arg4: memref<1x128xf32, #tpu.memory_space<vmem>>, %arg5: memref<128x128xf32, #tpu.memory_space<vmem>>, %arg6: memref<1x128xf32, #tpu.memory_space<vmem>>, %arg7: memref<256x128xf32, #tpu.memory_space<vmem>>, %arg8: memref<8x256xf32, #tpu.memory_space<vmem>>, %arg9: memref<8x256xf32, #tpu.memory_space<vmem>>, %arg10: memref<8x128xf32, #tpu.memory_space<vmem>>, %arg11: memref<16x128xf32, #tpu.memory_space<vmem>>) attributes {dimension_semantics = [#tpu.dimension_semantics<arbitrary>], iteration_bounds = array<i64: 2>, scalar_prefetch = 0 : i64, scratch_operands = 1 : i64, tpu.core_type = #tpu.core_type<tc>, window_params = [{transform_indices = @transform_0, window_bounds = array<i64: 16, 1792>}, {transform_indices = @transform_1, window_bounds = array<i64: 1792, 128>}, {pipeline_mode = #tpu.pipeline_mode<synchronous>, transform_indices = @transform_2, window_bounds = array<i64: 1, 128>}, {pipeline_mode = #tpu.pipeline_mode<synchronous>, transform_indices = @transform_3, window_bounds = array<i64: 1, 128>}, {pipeline_mode = #tpu.pipeline_mode<synchronous>, transform_indices = @transform_4, window_bounds = array<i64: 128, 128>}, {pipeline_mode = #tpu.pipeline_mode<synchronous>, transform_indices = @transform_5, window_bounds = array<i64: 1, 128>}, {pipeline_mode = #tpu.pipeline_mode<synchronous>, transform_indices = @transform_6, window_bounds = array<i64: 256, 128>}, {pipeline_mode = #tpu.pipeline_mode<synchronous>, transform_indices = @transform_7, window_bounds = array<i64: 8, 256>}, {pipeline_mode = #tpu.pipeline_mode<synchronous>, transform_indices = @transform_8, window_bounds = array<i64: 8, 256>}, {pipeline_mode = #tpu.pipeline_mode<synchronous>, transform_indices = @transform_9, window_bounds = array<i64: 8, 128>}]} {
    %c0_i32 = arith.constant 0 : i32
    %0 = arith.cmpi eq, %arg0, %c0_i32 : i32
    %1 = arith.extui %0 : i1 to i32
    %c0_i32_0 = arith.constant 0 : i32
    %2 = arith.cmpi ne, %1, %c0_i32_0 : i32
    scf.if %2 {
      %cst_9 = arith.constant 0.000000e+00 : f32
      %13 = vector.broadcast %cst_9 : f32 to vector<16x128xf32>
      %c0_10 = arith.constant 0 : index
      %c0_11 = arith.constant 0 : index
      %14 = vector.load %arg11[%c0_10, %c0_11] : memref<16x128xf32, #tpu.memory_space<vmem>>, vector<16x128xf32>
      tpu.vector_store %arg11[%c0_10, %c0_11], %13 {strides = array<i32>} : memref<16x128xf32, #tpu.memory_space<vmem>>, vector<16x128xf32>,
    } else {
    }
    %c0 = arith.constant 0 : index
    %c0_1 = arith.constant 0 : index
    %3 = vector.load %arg11[%c0, %c0_1] : memref<16x128xf32, #tpu.memory_space<vmem>>, vector<16x128xf32>
    %c0_2 = arith.constant 0 : index
    %c0_3 = arith.constant 0 : index
    %4 = vector.load %arg1[%c0_2, %c0_3] : memref<16x1792xf32, #tpu.memory_space<vmem>>, vector<16x1792xf32>
    %c0_4 = arith.constant 0 : index
    %c0_5 = arith.constant 0 : index
    %5 = vector.load %arg2[%c0_4, %c0_5] : memref<1792x128xbf16, #tpu.memory_space<vmem>>, vector<1792x128xbf16>
    %6 = arith.extf %5 : vector<1792x128xbf16> to vector<1792x128xf32>
    %cst = arith.constant dense<0.000000e+00> : vector<16x128xf32>
    %7 = tpu.matmul %4, %6, %cst {dimension_numbers = #tpu.dot_dimension_numbers<[1], [0], [0], [1], [0, 0, 1, 1], [], []>} : vector<16x1792xf32>, vector<1792x128xf32>, vector<16x128xf32> -> vector<16x128xf32>
    %8 = arith.addf %3, %7 : vector<16x128xf32>
    %c0_6 = arith.constant 0 : index
    %c0_7 = arith.constant 0 : index
    %9 = vector.load %arg11[%c0_6, %c0_7] : memref<16x128xf32, #tpu.memory_space<vmem>>, vector<16x128xf32>
    tpu.vector_store %arg11[%c0_6, %c0_7], %8 {strides = array<i32>} : memref<16x128xf32, #tpu.memory_space<vmem>>, vector<16x128xf32>,
    %c1_i32 = arith.constant 1 : i32
    %10 = arith.cmpi eq, %arg0, %c1_i32 : i32
    %11 = arith.extui %10 : i1 to i32
    %c0_i32_8 = arith.constant 0 : i32
    %12 = arith.cmpi ne, %11, %c0_i32_8 : i32
    scf.if %12 {
      %c0_9 = arith.constant 0 : index
      %c0_10 = arith.constant 0 : index
      %13 = vector.load %arg11[%c0_9, %c0_10] : memref<16x128xf32, #tpu.memory_space<vmem>>, vector<16x128xf32>
      %14 = vector.extract_strided_slice %13 {offsets = [0, 0], sizes = [8, 128], strides = [1, 1]} : vector<16x128xf32> to vector<8x128xf32>
      %15 = vector.extract_strided_slice %13 {offsets = [8, 0], sizes = [8, 128], strides = [1, 1]} : vector<16x128xf32> to vector<8x128xf32>
      %cst_11 = arith.constant dense<0.000000e+00> : vector<128xf32>
      %16 = vector.multi_reduction <add>, %14, %cst_11 [0] : vector<8x128xf32> to vector<128xf32>
      %17 = vector.shape_cast %16 : vector<128xf32> to vector<1x128xf32>
      %cst_12 = arith.constant 8.000000e+00 : f32
      %18 = vector.broadcast %cst_12 : f32 to vector<1x128xf32>
      %19 = arith.divf %17, %18 : vector<1x128xf32>
      %cst_13 = arith.constant dense<0.000000e+00> : vector<128xf32>
      %20 = vector.multi_reduction <add>, %15, %cst_13 [0] : vector<8x128xf32> to vector<128xf32>
      %21 = vector.shape_cast %20 : vector<128xf32> to vector<1x128xf32>
      %cst_14 = arith.constant 8.000000e+00 : f32
      %22 = vector.broadcast %cst_14 : f32 to vector<1x128xf32>
      %23 = arith.divf %21, %22 : vector<1x128xf32>
      %24 = vector.broadcast %19 : vector<1x128xf32> to vector<8x128xf32>
      %25 = arith.subf %14, %24 : vector<8x128xf32>
      %26 = arith.mulf %25, %25 : vector<8x128xf32>
      %cst_15 = arith.constant dense<0.000000e+00> : vector<128xf32>
      %27 = vector.multi_reduction <add>, %26, %cst_15 [0] : vector<8x128xf32> to vector<128xf32>
      %28 = vector.shape_cast %27 : vector<128xf32> to vector<1x128xf32>
      %cst_16 = arith.constant 8.000000e+00 : f32
      %29 = vector.broadcast %cst_16 : f32 to vector<1x128xf32>
      %30 = arith.divf %28, %29 : vector<1x128xf32>
      %31 = vector.broadcast %23 : vector<1x128xf32> to vector<8x128xf32>
      %32 = arith.subf %15, %31 : vector<8x128xf32>
      %33 = arith.mulf %32, %32 : vector<8x128xf32>
      %cst_17 = arith.constant dense<0.000000e+00> : vector<128xf32>
      %34 = vector.multi_reduction <add>, %33, %cst_17 [0] : vector<8x128xf32> to vector<128xf32>
      %35 = vector.shape_cast %34 : vector<128xf32> to vector<1x128xf32>
      %cst_18 = arith.constant 8.000000e+00 : f32
      %36 = vector.broadcast %cst_18 : f32 to vector<1x128xf32>
      %37 = arith.divf %35, %36 : vector<1x128xf32>
      %38 = tpu.iota {dimensions = array<i32: 0>} : vector<16x1xi32>
      %c8_i32 = arith.constant 8 : i32
      %39 = vector.broadcast %c8_i32 : i32 to vector<16x1xi32>
      %40 = arith.cmpi slt, %38, %39 : vector<16x1xi32>
      %41 = vector.shape_cast %40 : vector<16x1xi1> to vector<16x1xi1>
      %42 = vector.broadcast %41 : vector<16x1xi1> to vector<16x128xi1>
      %43 = vector.shape_cast %19 : vector<1x128xf32> to vector<1x128xf32>
      %44 = vector.broadcast %43 : vector<1x128xf32> to vector<16x128xf32>
      %45 = vector.shape_cast %23 : vector<1x128xf32> to vector<1x128xf32>
      %46 = vector.broadcast %45 : vector<1x128xf32> to vector<16x128xf32>
      %47 = arith.select %42, %44, %46 : vector<16x128xi1>, vector<16x128xf32>
      %cst_19 = arith.constant 9.99999974E-6 : f32
      %48 = vector.broadcast %cst_19 : f32 to vector<1x128xf32>
      %49 = arith.addf %30, %48 : vector<1x128xf32>
      %50 = math.rsqrt %49 : vector<1x128xf32>
      %cst_20 = arith.constant 9.99999974E-6 : f32
      %51 = vector.broadcast %cst_20 : f32 to vector<1x128xf32>
      %52 = arith.addf %37, %51 : vector<1x128xf32>
      %53 = math.rsqrt %52 : vector<1x128xf32>
      %54 = vector.shape_cast %40 : vector<16x1xi1> to vector<16x1xi1>
      %55 = vector.broadcast %54 : vector<16x1xi1> to vector<16x128xi1>
      %56 = vector.shape_cast %50 : vector<1x128xf32> to vector<1x128xf32>
      %57 = vector.broadcast %56 : vector<1x128xf32> to vector<16x128xf32>
      %58 = vector.shape_cast %53 : vector<1x128xf32> to vector<1x128xf32>
      %59 = vector.broadcast %58 : vector<1x128xf32> to vector<16x128xf32>
      %60 = arith.select %55, %57, %59 : vector<16x128xi1>, vector<16x128xf32>
      %61 = arith.subf %13, %47 : vector<16x128xf32>
      %62 = arith.mulf %61, %60 : vector<16x128xf32>
      %c0_21 = arith.constant 0 : index
      %c0_22 = arith.constant 0 : index
      %63 = vector.load %arg3[%c0_21, %c0_22] : memref<1x128xf32, #tpu.memory_space<vmem>>, vector<1x128xf32>
      %64 = vector.broadcast %63 : vector<1x128xf32> to vector<16x128xf32>
      %65 = arith.mulf %62, %64 : vector<16x128xf32>
      %c0_23 = arith.constant 0 : index
      %c0_24 = arith.constant 0 : index
      %66 = vector.load %arg4[%c0_23, %c0_24] : memref<1x128xf32, #tpu.memory_space<vmem>>, vector<1x128xf32>
      %67 = vector.broadcast %66 : vector<1x128xf32> to vector<16x128xf32>
      %68 = arith.addf %65, %67 : vector<16x128xf32>
      %cst_25 = arith.constant 0.000000e+00 : f32
      %69 = vector.broadcast %cst_25 : f32 to vector<16x128xf32>
      %70 = arith.maximumf %68, %69 : vector<16x128xf32>
      %c0_26 = arith.constant 0 : index
      %c0_27 = arith.constant 0 : index
      %71 = vector.load %arg5[%c0_26, %c0_27] : memref<128x128xf32, #tpu.memory_space<vmem>>, vector<128x128xf32>
      %cst_28 = arith.constant dense<0.000000e+00> : vector<16x128xf32>
      %72 = tpu.matmul %70, %71, %cst_28 {dimension_numbers = #tpu.dot_dimension_numbers<[1], [0], [0], [1], [0, 0, 1, 1], [], []>} : vector<16x128xf32>, vector<128x128xf32>, vector<16x128xf32> -> vector<16x128xf32>
      %c0_29 = arith.constant 0 : index
      %c0_30 = arith.constant 0 : index
      %73 = vector.load %arg6[%c0_29, %c0_30] : memref<1x128xf32, #tpu.memory_space<vmem>>, vector<1x128xf32>
      %74 = vector.broadcast %73 : vector<1x128xf32> to vector<16x128xf32>
      %75 = arith.addf %72, %74 : vector<16x128xf32>
      %76 = arith.mulf %75, %75 : vector<16x128xf32>
      %cst_31 = arith.constant dense<0.000000e+00> : vector<16xf32>
      %77 = vector.multi_reduction <add>, %76, %cst_31 [1] : vector<16x128xf32> to vector<16xf32>
      %78 = vector.shape_cast %77 : vector<16xf32> to vector<16x1xf32>
      %cst_32 = arith.constant 1.000000e-24 : f32
      %79 = vector.broadcast %cst_32 : f32 to vector<16x1xf32>
      %80 = arith.maximumf %78, %79 : vector<16x1xf32>
      %81 = math.rsqrt %80 : vector<16x1xf32>
      %82 = vector.broadcast %81 : vector<16x1xf32> to vector<16x128xf32>
      %83 = arith.mulf %75, %82 : vector<16x128xf32>
      %c0_33 = arith.constant 0 : index
      %c0_34 = arith.constant 0 : index
      %84 = vector.load %arg7[%c0_33, %c0_34] : memref<256x128xf32, #tpu.memory_space<vmem>>, vector<256x128xf32>
      %cst_35 = arith.constant dense<0.000000e+00> : vector<16x256xf32>
      %85 = tpu.matmul %83, %84, %cst_35 {dimension_numbers = #tpu.dot_dimension_numbers<[1], [1], [0], [0], [0, 0, 1, 0], [], []>} : vector<16x128xf32>, vector<256x128xf32>, vector<16x256xf32> -> vector<16x256xf32>
      %cst_36 = arith.constant 1.000000e+01 : f32
      %cst_37 = arith.constant 1.000000e+02 : f32
      %86 = vector.broadcast %cst_36 : f32 to vector<16x1xf32>
      %87 = vector.broadcast %cst_37 : f32 to vector<16x1xf32>
      %88 = arith.select %40, %86, %87 : vector<16x1xi1>, vector<16x1xf32>
      %89 = vector.broadcast %88 : vector<16x1xf32> to vector<16x256xf32>
      %90 = arith.mulf %85, %89 : vector<16x256xf32>
      %91 = vector.extract_strided_slice %90 {offsets = [0, 0], sizes = [8, 256], strides = [1, 1]} : vector<16x256xf32> to vector<8x256xf32>
      %92 = vector.extract_strided_slice %90 {offsets = [8, 0], sizes = [8, 256], strides = [1, 1]} : vector<16x256xf32> to vector<8x256xf32>
      %cst_38 = arith.constant dense<0xFF800000> : vector<8xf32>
      %93 = vector.multi_reduction <maximumf>, %91, %cst_38 [1] : vector<8x256xf32> to vector<8xf32>
      %94 = vector.shape_cast %93 : vector<8xf32> to vector<8x1xf32>
      %95 = vector.broadcast %94 : vector<8x1xf32> to vector<8x256xf32>
      %96 = arith.subf %91, %95 : vector<8x256xf32>
      %97 = math.exp %96 : vector<8x256xf32>
      %cst_39 = arith.constant dense<0.000000e+00> : vector<8xf32>
      %98 = vector.multi_reduction <add>, %97, %cst_39 [1] : vector<8x256xf32> to vector<8xf32>
      %99 = vector.shape_cast %98 : vector<8xf32> to vector<8x1xf32>
      %100 = math.log %99 : vector<8x1xf32>
      %101 = arith.addf %94, %100 : vector<8x1xf32>
      %102 = vector.broadcast %101 : vector<8x1xf32> to vector<8x256xf32>
      %103 = arith.subf %91, %102 : vector<8x256xf32>
      %c0_40 = arith.constant 0 : index
      %c0_41 = arith.constant 0 : index
      %104 = vector.load %arg8[%c0_40, %c0_41] : memref<8x256xf32, #tpu.memory_space<vmem>>, vector<8x256xf32>
      tpu.vector_store %arg8[%c0_40, %c0_41], %103 {strides = array<i32>} : memref<8x256xf32, #tpu.memory_space<vmem>>, vector<8x256xf32>,
      %cst_42 = arith.constant dense<0xFF800000> : vector<8xf32>
      %105 = vector.multi_reduction <maximumf>, %92, %cst_42 [1] : vector<8x256xf32> to vector<8xf32>
      %106 = vector.shape_cast %105 : vector<8xf32> to vector<8x1xf32>
      %107 = vector.broadcast %106 : vector<8x1xf32> to vector<8x256xf32>
      %108 = arith.subf %92, %107 : vector<8x256xf32>
      %109 = math.exp %108 : vector<8x256xf32>
      %cst_43 = arith.constant dense<0.000000e+00> : vector<8xf32>
      %110 = vector.multi_reduction <add>, %109, %cst_43 [1] : vector<8x256xf32> to vector<8xf32>
      %111 = vector.shape_cast %110 : vector<8xf32> to vector<8x1xf32>
      %112 = vector.broadcast %111 : vector<8x1xf32> to vector<8x256xf32>
      %113 = arith.divf %109, %112 : vector<8x256xf32>
      %c0_44 = arith.constant 0 : index
      %c0_45 = arith.constant 0 : index
      %114 = vector.load %arg9[%c0_44, %c0_45] : memref<8x256xf32, #tpu.memory_space<vmem>>, vector<8x256xf32>
      tpu.vector_store %arg9[%c0_44, %c0_45], %113 {strides = array<i32>} : memref<8x256xf32, #tpu.memory_space<vmem>>, vector<8x256xf32>,
      %115 = vector.extract_strided_slice %83 {offsets = [8, 0], sizes = [8, 128], strides = [1, 1]} : vector<16x128xf32> to vector<8x128xf32>
      %c0_46 = arith.constant 0 : index
      %c0_47 = arith.constant 0 : index
      %116 = vector.load %arg10[%c0_46, %c0_47] : memref<8x128xf32, #tpu.memory_space<vmem>>, vector<8x128xf32>
      tpu.vector_store %arg10[%c0_46, %c0_47], %115 {strides = array<i32>} : memref<8x128xf32, #tpu.memory_space<vmem>>, vector<8x128xf32>,
    } else {
    }
    return
  }
  func.func @transform_0(%arg0: i32) -> (i32, i32) {
    %c0_i32 = arith.constant 0 : i32
    %c0_i32_0 = arith.constant 0 : i32
    return %c0_i32, %arg0 : i32, i32
  }
  func.func @transform_1(%arg0: i32) -> (i32, i32) {
    %c0_i32 = arith.constant 0 : i32
    %c0_i32_0 = arith.constant 0 : i32
    return %arg0, %c0_i32 : i32, i32
  }
  func.func @transform_2(%arg0: i32) -> (i32, i32) {
    %c0_i32 = arith.constant 0 : i32
    %c0_i32_0 = arith.constant 0 : i32
    %c0_i32_1 = arith.constant 0 : i32
    return %c0_i32, %c0_i32_0 : i32, i32
  }
  func.func @transform_3(%arg0: i32) -> (i32, i32) {
    %c0_i32 = arith.constant 0 : i32
    %c0_i32_0 = arith.constant 0 : i32
    %c0_i32_1 = arith.constant 0 : i32
    return %c0_i32, %c0_i32_0 : i32, i32
  }
  func.func @transform_4(%arg0: i32) -> (i32, i32) {
    %c0_i32 = arith.constant 0 : i32
    %c0_i32_0 = arith.constant 0 : i32
    %c0_i32_1 = arith.constant 0 : i32
    return %c0_i32, %c0_i32_0 : i32, i32
  }
  func.func @transform_5(%arg0: i32) -> (i32, i32) {
    %c0_i32 = arith.constant 0 : i32
    %c0_i32_0 = arith.constant 0 : i32
    %c0_i32_1 = arith.constant 0 : i32
    return %c0_i32, %c0_i32_0 : i32, i32
  }
  func.func @transform_6(%arg0: i32) -> (i32, i32) {
    %c0_i32 = arith.constant 0 : i32
    %c0_i32_0 = arith.constant 0 : i32
    %c0_i32_1 = arith.constant 0 : i32
    return %c0_i32, %c0_i32_0 : i32, i32
  }
  func.func @transform_7(%arg0: i32) -> (i32, i32) {
    %c0_i32 = arith.constant 0 : i32
    %c0_i32_0 = arith.constant 0 : i32
    %c0_i32_1 = arith.constant 0 : i32
    return %c0_i32, %c0_i32_0 : i32, i32
  }
  func.func @transform_8(%arg0: i32) -> (i32, i32) {
    %c0_i32 = arith.constant 0 : i32
    %c0_i32_0 = arith.constant 0 : i32
    %c0_i32_1 = arith.constant 0 : i32
    return %c0_i32, %c0_i32_0 : i32, i32
  }
  func.func @transform_9(%arg0: i32) -> (i32, i32) {
    %c0_i32 = arith.constant 0 : i32
    %c0_i32_0 = arith.constant 0 : i32
    %c0_i32_1 = arith.constant 0 : i32
    return %c0_i32, %c0_i32_0 : i32, i32
  }
}

</mosaic_0001>

<bundles_post_ra>
// kernel: compress_forward.1
= control target key start
LH: loop header
LB: loop body
LE: loop exit
PB: predicated region body
PF: predicated region fallthrough
CT: control target
= control target key end

     0   :  { %15 = vsyncpa [#allocation5], 0  ;;  %s3236_s30 = smov 0   ;;  %s3238_s10 = smov 0   ;;  %s3680_s0 = inlined_call_operand.vmem [shape: f32[16,3584], index: 0, kind: input, shape index: {}]   ;;  %s3681_s1 = inlined_call_operand.vmem [shape: bf16[3584,128], index: 1, kind: input, shape index: {}]   ;;  %s3682_s2 = inlined_call_operand.vmem [shape: f32[1,128], index: 2, kind: input, shape index: {}]   ;;  %s3683_s3 = inlined_call_operand.vmem [shape: f32[1,128], index: 3, kind: input, shape index: {}]   ;;  %s3684_s4 = inlined_call_operand.vmem [shape: f32[128,128], index: 4, kind: input, shape index: {}]   ;;  %s3685_s5 = inlined_call_operand.vmem [shape: f32[1,128], index: 5, kind: input, shape index: {}]   ;;  %s3686_s6 = inlined_call_operand.vmem [shape: f32[256,128], index: 6, kind: input, shape index: {}]   ;;  %s3687_s7 = inlined_call_operand.hbm [shape: f32[8,256], index: 7, kind: output, shape index: {0}]   ;;  %s3688_s8 = inlined_call_operand.vmem [shape: f32[8,256], index: 8, kind: output, shape index: {1}]   ;;  %s3689_s9 = inlined_call_operand.vmem [shape: f32[8,128], index: 9, kind: output, shape index: {2}]  }
   0x1   :  { %s3240_s11 = smov 0  }
   0x2 LB: > { %s3252_s12 = sadd.s32 4294967295, %s3182_s11   ;;  %s3255_s13 = sadd.s32 1, %s3182_s11   ;;  %s3182_s11 = sphi %s3240_s11, %s3692_s11   ;;  %s3178_s10 = sphi %s3238_s10, %s3691_s10   ;;  %s3174_s30 = sphi %s3236_s30, %s3690_s30  }
   0x3   : > { %s25_s14 = ssub.s32 %s3182_s11, %s3255_s13  ;;  %s28_s15 = sadd.s32 1, %s3178_s10 }
   0x4   : > { %p26_p0 = scmp.eq.s32.totalorder %s25_s14, 0  ;;  %p35_p1 = scmp.ne.s32.totalorder %s3178_s10, %s3174_s30 }
   0x5   : > { %p36_p2 = scmp.eq.s32.totalorder %s3182_s11, 0  ;;  %p1844_p4 = scmp.ge.s32.totalorder %s3182_s11, 2 }
   0x6   : > { %s3264_s16 = scalar_select %p26_p0, %s3178_s10, %s28_s15  }
   0x7   : > { %p37_p3 = por %p36_p2, %p35_p1  ;;  %270 = sbr.rel (%p1844_p4) target bundleno = 33 (0x21), region = 36 }
   0xe   : > { %273 = sbr.rel (!%p37_p3) target bundleno = 33 (0x21), region = 40  ;;  %s275_s17 = sand.u32 (%p37_p3), 1, %s3178_s10  }
   0xf   : > { %s1857_s18 = smul.u32 (%p37_p3), 112, %s3182_s11 }
  0x10   : > { %s3076_s19 = smul.u32 (%p37_p3), 224, %s275_s17 }
  0x11   : > { %s3272_s22 = scalar_lea.vmem (%p37_p3), %s3680_s0, %s1857_s18 }
  0x12   : > { %v293_v0 = vld [vmem:[%s3272_s22] sm:$0xff] (%p37_p3)  ;;  %v295_v1 = vld [vmem:[%s3272_s22 + $0x8] sm:$0xff] (%p37_p3)  ;;  %v297_v2 = vld [vmem:[%s3272_s22 + $0x10] sm:$0xff] (%p37_p3)  ;;  %s3277_s23 = scalar_lea.vmem (%p37_p3), [#allocation3], %s3076_s19 }
  0x13   : > { %294 = vst [vmem:[%s3277_s23] sm:$0xff] (%p37_p3), %v293_v0  ;;  %296 = vst [vmem:[%s3277_s23 + $0x8] sm:$0xff] (%p37_p3), %v295_v1  ;;  %v299_v3 = vld [vmem:[%s3272_s22 + $0x18] sm:$0xff] (%p37_p3)  ;;  %v301_v4 = vld [vmem:[%s3272_s22 + $0x20] sm:$0xff] (%p37_p3) }
  0x14   : > { %298 = vst [vmem:[%s3277_s23 + $0x10] sm:$0xff] (%p37_p3), %v297_v2  ;;  %v303_v5 = vld [vmem:[%s3272_s22 + $0x28] sm:$0xff] (%p37_p3)  ;;  %300 = vst [vmem:[%s3277_s23 + $0x18] sm:$0xff] (%p37_p3), %v299_v3  ;;  %v305_v6 = vld [vmem:[%s3272_s22 + $0x30] sm:$0xff] (%p37_p3) }
  0x15   : > { %302 = vst [vmem:[%s3277_s23 + $0x20] sm:$0xff] %v301_v4  ;;  %304 = vst [vmem:[%s3277_s23 + $0x28] sm:$0xff] %v303_v5  ;;  %v307_v7 = vld [vmem:[%s3272_s22 + $0x38] sm:$0xff]  ;;  %v309_v8 = vld [vmem:[%s3272_s22 + $0x40] sm:$0xff] }
  0x16   : > { %306 = vst [vmem:[%s3277_s23 + $0x30] sm:$0xff] %v305_v6  ;;  %308 = vst [vmem:[%s3277_s23 + $0x38] sm:$0xff] %v307_v7  ;;  %v311_v9 = vld [vmem:[%s3272_s22 + $0x48] sm:$0xff]  ;;  %v313_v10 = vld [vmem:[%s3272_s22 + $0x50] sm:$0xff] }
  0x17   : > { %310 = vst [vmem:[%s3277_s23 + $0x40] sm:$0xff] %v309_v8  ;;  %v315_v11 = vld [vmem:[%s3272_s22 + $0x58] sm:$0xff]  ;;  %312 = vst [vmem:[%s3277_s23 + $0x48] sm:$0xff] %v311_v9  ;;  %v317_v12 = vld [vmem:[%s3272_s22 + $0x60] sm:$0xff] }
  0x18   : > { %314 = vst [vmem:[%s3277_s23 + $0x50] sm:$0xff] %v313_v10  ;;  %316 = vst [vmem:[%s3277_s23 + $0x58] sm:$0xff] %v315_v11  ;;  %v319_v13 = vld [vmem:[%s3272_s22 + $0x68] sm:$0xff]  ;;  %v321_v14 = vld [vmem:[%s3272_s22 + $0xe0] sm:$0xff] }
  0x19   : > { %318 = vst [vmem:[%s3277_s23 + $0x60] sm:$0xff] %v317_v12  ;;  %320 = vst [vmem:[%s3277_s23 + $0x68] sm:$0xff] %v319_v13  ;;  %v323_v15 = vld [vmem:[%s3272_s22 + $0xe8] sm:$0xff]  ;;  %v325_v16 = vld [vmem:[%s3272_s22 + $0xf0] sm:$0xff] }
  0x1a   : > { %322 = vst [vmem:[%s3277_s23 + $0x70] sm:$0xff] %v321_v14  ;;  %v327_v17 = vld [vmem:[%s3272_s22 + $0xf8] sm:$0xff]  ;;  %324 = vst [vmem:[%s3277_s23 + $0x78] sm:$0xff] %v323_v15  ;;  %v329_v18 = vld [vmem:[%s3272_s22 + $0x100] sm:$0xff] }
  0x1b   : > { %326 = vst [vmem:[%s3277_s23 + $0x80] sm:$0xff] %v325_v16  ;;  %328 = vst [vmem:[%s3277_s23 + $0x88] sm:$0xff] %v327_v17  ;;  %v331_v19 = vld [vmem:[%s3272_s22 + $0x108] sm:$0xff]  ;;  %v333_v20 = vld [vmem:[%s3272_s22 + $0x110] sm:$0xff] }
  0x1c   : > { %330 = vst [vmem:[%s3277_s23 + $0x90] sm:$0xff] %v329_v18  ;;  %332 = vst [vmem:[%s3277_s23 + $0x98] sm:$0xff] %v331_v19  ;;  %v335_v21 = vld [vmem:[%s3272_s22 + $0x118] sm:$0xff]  ;;  %v337_v22 = vld [vmem:[%s3272_s22 + $0x120] sm:$0xff] }
  0x1d   : > { %334 = vst [vmem:[%s3277_s23 + $0xa0] sm:$0xff] %v333_v20  ;;  %v339_v23 = vld [vmem:[%s3272_s22 + $0x128] sm:$0xff]  ;;  %336 = vst [vmem:[%s3277_s23 + $0xa8] sm:$0xff] %v335_v21  ;;  %v341_v24 = vld [vmem:[%s3272_s22 + $0x130] sm:$0xff] }
  0x1e   : > { %338 = vst [vmem:[%s3277_s23 + $0xb0] sm:$0xff] %v337_v22  ;;  %340 = vst [vmem:[%s3277_s23 + $0xb8] sm:$0xff] %v339_v23  ;;  %v343_v25 = vld [vmem:[%s3272_s22 + $0x138] sm:$0xff]  ;;  %v345_v26 = vld [vmem:[%s3272_s22 + $0x140] sm:$0xff] }
  0x1f   : > { %342 = vst [vmem:[%s3277_s23 + $0xc0] sm:$0xff] %v341_v24  ;;  %344 = vst [vmem:[%s3277_s23 + $0xc8] sm:$0xff] %v343_v25  ;;  %v347_v27 = vld [vmem:[%s3272_s22 + $0x148] sm:$0xff] }
  0x20   : > { %346 = vst [vmem:[%s3277_s23 + $0xd0] sm:$0xff] %v345_v26  ;;  %348 = vst [vmem:[%s3277_s23 + $0xd8] sm:$0xff] %v347_v27 }
  0x21 PF: > { %p1846_p5 = scmp.ge.s32.totalorder %s3182_s11, 1  ;;  %p362_p6 = scmp.lt.s32.totalorder %s3182_s11, 3 }
  0x23   : > { %p363_p7 = pnand %p1846_p5, %p362_p6 }
  0x24   : > { %s369_s24 = sand.u32 (!%p363_p7), 1, %s3174_s30   ;;  %s405_s25 = smul.u32 (!%p363_p7), 224, %s3252_s12 }
  0x25   : > { %366 = sbr.rel (%p363_p7) target bundleno = 1400 (0x578), region = 67  ;;  %p1848_p9 = scmp.ne.s32.totalorder (!%p363_p7), %s3252_s12, 0 }
  0x26   : > { %s3077_s26 = smul.u32 (!%p363_p7), 224, %s369_s24  ;;  %p406_p8 = scmp.lt.s32.totalorder (!%p363_p7), %s405_s25, 447 }
  0x28   : > { %s3341_s15 = scalar_lea.vmem (!%p363_p7), [#allocation3], %s3077_s26 }
  0x2c   : > { %s3694_s25 = smov (!%p406_p8, %s405_s25), 447  ;;  %414 = sbr.rel (%p1848_p9) target bundleno = 51 (0x33), region = 75 }
  0x2d   : > { %s1847_s27 = sshll.u32 %s3694_s25, 2  ;;  %v3184_v28 = vmov (!%p1848_p9), 0.0  }
  0x2e   : > { %s3339_s14 = scalar_lea.vmem %s3681_s1, %s1847_s27  ;;  %415 = vst [vmem:[#allocation2] sm:$0xff] (!%p1848_p9), %v3184_v28  ;;  %416 = vst [vmem:[#allocation2 + $0x8] sm:$0xff] (!%p1848_p9), %v3184_v28 }
  0x33 PF: > { %v2313_v29 = vld [vmem:[%s3339_s14 + $0x40] sm:$0xff]   ;;  %v2314_v33 = vld [vmem:[%s3339_s14 + $0x48] sm:$0xff]   ;;  %v2315_v37 = vld [vmem:[%s3339_s14 + $0x50] sm:$0xff]   ;;  %p1849_p10 = scmp.ne.s32.totalorder %s3252_s12, 1 }
  0x34   : > { %v2329_v30 = vld [vmem:[%s3339_s14 + $0xc0] sm:$0xff]   ;;  %2773 = vmatprep.subr.bf16.mxu0 %v2313_v29  ;;  %v2330_v34 = vld [vmem:[%s3339_s14 + $0xc8] sm:$0xff]   ;;  %v2331_v38 = vld [vmem:[%s3339_s14 + $0xd0] sm:$0xff]  }
  0x35   : > { %v1859_v31 = vld [vmem:[%s3339_s14] sm:$0xff]   ;;  %2805 = vmatprep.subr.bf16.mxu1 %v2329_v30  ;;  %v2306_v35 = vld [vmem:[%s3339_s14 + $0x8] sm:$0xff]   ;;  %v2307_v39 = vld [vmem:[%s3339_s14 + $0x10] sm:$0xff]  }
  0x36   : > { %v2321_v32 = vld [vmem:[%s3339_s14 + $0x80] sm:$0xff]   ;;  %2775 = vmatpush3.bf16.msra.mxu0 %v1859_v31  ;;  %v2322_v36 = vld [vmem:[%s3339_s14 + $0x88] sm:$0xff]   ;;  %v2323_v40 = vld [vmem:[%s3339_s14 + $0x90] sm:$0xff]  }
  0x37   : > { %2807 = vmatpush3.bf16.msra.mxu1 %v2321_v32  ;;  %2777 = vmatprep.subr.bf16.mxu0 %v2314_v33  ;;  %v2316_v41 = vld [vmem:[%s3339_s14 + $0x58] sm:$0xff]   ;;  %v422_v46 = vld [vmem:[%s3341_s15 + $0x18] sm:$0xff]  ;;  %v2317_v47 = vld [vmem:[%s3339_s14 + $0x60] sm:$0xff]  }
  0x38   : > { %2809 = vmatprep.subr.bf16.mxu1 %v2330_v34  ;;  %v2332_v42 = vld [vmem:[%s3339_s14 + $0xd8] sm:$0xff]   ;;  %v2333_v48 = vld [vmem:[%s3339_s14 + $0xe0] sm:$0xff]   ;;  %1034 = vmatprep.mubr.f32.mxu1 %v422_v46  ;;  %v2318_v51 = vld [vmem:[%s3339_s14 + $0x68] sm:$0xff]  }
  0x39   : > { %v420_v43 = vld [vmem:[%s3341_s15 + $0x8] sm:$0xff]  ;;  %v2309_v49 = vld [vmem:[%s3339_s14 + $0x20] sm:$0xff]   ;;  %v2334_v52 = vld [vmem:[%s3339_s14 + $0xe8] sm:$0xff]  }
  0x3a   : > { %2779 = vmatpush3.bf16.msra.mxu0 %v2306_v35  ;;  %v2308_v44 = vld [vmem:[%s3339_s14 + $0x18] sm:$0xff]   ;;  %959 = vmatprep.mubr.f32.mxu0 %v420_v43  ;;  %v2325_v50 = vld [vmem:[%s3339_s14 + $0xa0] sm:$0xff]   ;;  %v2310_v53 = vld [vmem:[%s3339_s14 + $0x28] sm:$0xff]  }
  0x3b   : > { %2811 = vmatpush3.bf16.msra.mxu1 %v2322_v36  ;;  %2781 = vmatprep.subr.bf16.mxu0 %v2315_v37  ;;  %v2324_v45 = vld [vmem:[%s3339_s14 + $0x98] sm:$0xff]   ;;  %v2326_v54 = vld [vmem:[%s3339_s14 + $0xa8] sm:$0xff]   ;;  %v2319_v55 = vld [vmem:[%s3339_s14 + $0x70] sm:$0xff]  }
  0x3c   : > { %2813 = vmatprep.subr.bf16.mxu1 %v2331_v38  ;;  %v2335_v56 = vld [vmem:[%s3339_s14 + $0xf0] sm:$0xff]   ;;  %v2320_v59 = vld [vmem:[%s3339_s14 + $0x78] sm:$0xff]   ;;  %v2345_v63 = vld [vmem:[%s3339_s14 + $0x140] sm:$0xff]  }
  0x3d   : > { %v2311_v57 = vld [vmem:[%s3339_s14 + $0x30] sm:$0xff]   ;;  %v2336_v60 = vld [vmem:[%s3339_s14 + $0xf8] sm:$0xff]   ;;  %v2361_v0 = vld [vmem:[%s3339_s14 + $0x1c0] sm:$0xff]  }
  0x3e   : > { %2783 = vmatpush3.bf16.msra.mxu0 %v2307_v39  ;;  %v2327_v58 = vld [vmem:[%s3339_s14 + $0xb0] sm:$0xff]   ;;  %v2312_v61 = vld [vmem:[%s3339_s14 + $0x38] sm:$0xff]   ;;  %v421_v2 = vld [vmem:[%s3341_s15 + $0x10] sm:$0xff] }
  0x3f   : > { %2815 = vmatpush3.bf16.msra.mxu1 %v2323_v40  ;;  %2785 = vmatprep.subr.bf16.mxu0 %v2316_v41  ;;  %v2328_v62 = vld [vmem:[%s3339_s14 + $0xb8] sm:$0xff]   ;;  %v419_v1 = vld [vmem:[%s3341_s15] sm:$0xff]  ;;  %v2337_v3 = vld [vmem:[%s3339_s14 + $0x100] sm:$0xff]  }
  0x40   : > { %2817 = vmatprep.subr.bf16.mxu1 %v2332_v42  ;;  %v2353_v4 = vld [vmem:[%s3339_s14 + $0x180] sm:$0xff]   ;;  %v2346_v5 = vld [vmem:[%s3339_s14 + $0x148] sm:$0xff]   ;;  %v436_v8 = vld [vmem:[%s3341_s15 + $0x88] sm:$0xff] }
  0x41   : > { %v2362_v6 = vld [vmem:[%s3339_s14 + $0x1c8] sm:$0xff]   ;;  %v433_v9 = vld [vmem:[%s3341_s15 + $0x70] sm:$0xff]  ;;  %v435_v10 = vld [vmem:[%s3341_s15 + $0x80] sm:$0xff] }
  0x42   : > { %2787 = vmatpush3.bf16.msra.mxu0 %v2308_v44  ;;  %v434_v7 = vld [vmem:[%s3341_s15 + $0x78] sm:$0xff]  ;;  %v2347_v13 = vld [vmem:[%s3339_s14 + $0x150] sm:$0xff]   ;;  %v424_v15 = vld [vmem:[%s3341_s15 + $0x28] sm:$0xff] }
  0x43   : > { %2819 = vmatpush3.bf16.msra.mxu1 %v2324_v45  ;;  %2789 = vmatprep.subr.bf16.mxu0 %v2317_v47  ;;  %v2338_v11 = vld [vmem:[%s3339_s14 + $0x108] sm:$0xff]   ;;  %v2363_v14 = vld [vmem:[%s3339_s14 + $0x1d0] sm:$0xff]   ;;  %v2348_v19 = vld [vmem:[%s3339_s14 + $0x158] sm:$0xff]  }
  0x44   : > { %2821 = vmatprep.subr.bf16.mxu1 %v2333_v48  ;;  %v2354_v12 = vld [vmem:[%s3339_s14 + $0x188] sm:$0xff]   ;;  %v2339_v17 = vld [vmem:[%s3339_s14 + $0x110] sm:$0xff]   ;;  %v2364_v20 = vld [vmem:[%s3339_s14 + $0x1d8] sm:$0xff]  }
  0x45   : > { %v426_v16 = vld [vmem:[%s3341_s15 + $0x38] sm:$0xff]  ;;  %v2355_v18 = vld [vmem:[%s3339_s14 + $0x190] sm:$0xff]   ;;  %v2340_v21 = vld [vmem:[%s3339_s14 + $0x118] sm:$0xff]  }
  0x46   : > { %2791 = vmatpush3.bf16.msra.mxu0 %v2309_v49  ;;  %v2356_v22 = vld [vmem:[%s3339_s14 + $0x198] sm:$0xff]   ;;  %v2349_v23 = vld [vmem:[%s3339_s14 + $0x160] sm:$0xff]   ;;  %v2350_v27 = vld [vmem:[%s3339_s14 + $0x168] sm:$0xff]  }
  0x47   : > { %2823 = vmatpush3.bf16.msra.mxu1 %v2325_v50  ;;  %2793 = vmatprep.subr.bf16.mxu0 %v2318_v51  ;;  %v2365_v24 = vld [vmem:[%s3339_s14 + $0x1e0] sm:$0xff]   ;;  %v2366_v28 = vld [vmem:[%s3339_s14 + $0x1e8] sm:$0xff]   ;;  %v2351_v31 = vld [vmem:[%s3339_s14 + $0x170] sm:$0xff]  }
  0x48   : > { %2825 = vmatprep.subr.bf16.mxu1 %v2334_v52  ;;  %v2341_v25 = vld [vmem:[%s3339_s14 + $0x120] sm:$0xff]   ;;  %v2342_v29 = vld [vmem:[%s3339_s14 + $0x128] sm:$0xff]   ;;  %v2367_v32 = vld [vmem:[%s3339_s14 + $0x1f0] sm:$0xff]  }
  0x49   : > { %v2357_v26 = vld [vmem:[%s3339_s14 + $0x1a0] sm:$0xff]   ;;  %v2358_v30 = vld [vmem:[%s3339_s14 + $0x1a8] sm:$0xff]   ;;  %v2343_v33 = vld [vmem:[%s3339_s14 + $0x130] sm:$0xff]  }
  0x4a   : > { %2795 = vmatpush3.bf16.msra.mxu0 %v2310_v53  ;;  %v2359_v34 = vld [vmem:[%s3339_s14 + $0x1b0] sm:$0xff]   ;;  %v2352_v35 = vld [vmem:[%s3339_s14 + $0x178] sm:$0xff]   ;;  %v2377_v39 = vld [vmem:[%s3339_s14 + $0x240] sm:$0xff]  }
  0x4b   : > { %2827 = vmatpush3.bf16.msra.mxu1 %v2326_v54  ;;  %2797 = vmatprep.subr.bf16.mxu0 %v2319_v55  ;;  %v2368_v36 = vld [vmem:[%s3339_s14 + $0x1f8] sm:$0xff]   ;;  %v2393_v40 = vld [vmem:[%s3339_s14 + $0x2c0] sm:$0xff]   ;;  %v423_v41 = vld [vmem:[%s3341_s15 + $0x20] sm:$0xff] }
  0x4c   : > { %2829 = vmatprep.subr.bf16.mxu1 %v2335_v56  ;;  %v2344_v37 = vld [vmem:[%s3339_s14 + $0x138] sm:$0xff]   ;;  %v425_v42 = vld [vmem:[%s3341_s15 + $0x30] sm:$0xff]  ;;  %v438_v45 = vld [vmem:[%s3341_s15 + $0x98] sm:$0xff] }
  0x4d   : > { %v2360_v38 = vld [vmem:[%s3339_s14 + $0x1b8] sm:$0xff]   ;;  %v2369_v43 = vld [vmem:[%s3339_s14 + $0x200] sm:$0xff]   ;;  %v2378_v46 = vld [vmem:[%s3339_s14 + $0x248] sm:$0xff]  }
  0x4e   : > { %2799 = vmatpush3.bf16.msra.mxu0 %v2311_v57  ;;  %v2385_v44 = vld [vmem:[%s3339_s14 + $0x280] sm:$0xff]   ;;  %v2394_v47 = vld [vmem:[%s3339_s14 + $0x2c8] sm:$0xff]   ;;  %v440_v48 = vld [vmem:[%s3341_s15 + $0xa8] sm:$0xff] }
  0x4f   : > { %2831 = vmatpush3.bf16.msra.mxu1 %v2327_v58  ;;  %2801 = vmatprep.subr.bf16.mxu0 %v2320_v59  ;;  %v437_v49 = vld [vmem:[%s3341_s15 + $0x90] sm:$0xff]  ;;  %v439_v50 = vld [vmem:[%s3341_s15 + $0xa0] sm:$0xff]  ;;  %v2370_v51 = vld [vmem:[%s3339_s14 + $0x208] sm:$0xff]  }
  0x50   : > { %2833 = vmatprep.subr.bf16.mxu1 %v2336_v60  ;;  %v2386_v52 = vld [vmem:[%s3339_s14 + $0x288] sm:$0xff]   ;;  %v2379_v53 = vld [vmem:[%s3339_s14 + $0x250] sm:$0xff]   ;;  %v428_v55 = vld [vmem:[%s3341_s15 + $0x48] sm:$0xff] }
  0x51   : > { %v2395_v54 = vld [vmem:[%s3339_s14 + $0x2d0] sm:$0xff]   ;;  %v430_v56 = vld [vmem:[%s3341_s15 + $0x58] sm:$0xff]  ;;  %v2380_v59 = vld [vmem:[%s3339_s14 + $0x258] sm:$0xff]  }
  0x52   : > { %2803 = vmatpush3.bf16.msra.mxu0 %v2312_v61  ;;  %v2371_v57 = vld [vmem:[%s3339_s14 + $0x210] sm:$0xff]   ;;  %v2396_v60 = vld [vmem:[%s3339_s14 + $0x2d8] sm:$0xff]  }
  0x53   : > { %2835 = vmatpush3.bf16.msra.mxu1 %v2328_v62  ;;  %2837 = vmatprep.subr.bf16.mxu0 %v2345_v63  ;;  %v2387_v58 = vld [vmem:[%s3339_s14 + $0x290] sm:$0xff]   ;;  %v2372_v61 = vld [vmem:[%s3339_s14 + $0x218] sm:$0xff]   ;;  %v2381_v63 = vld [vmem:[%s3339_s14 + $0x260] sm:$0xff]  }
  0x54   : > { %2869 = vmatprep.subr.bf16.mxu1 %v2361_v0  ;;  %v2388_v62 = vld [vmem:[%s3339_s14 + $0x298] sm:$0xff]   ;;  %v2397_v0 = vld [vmem:[%s3339_s14 + $0x2e0] sm:$0xff]  }
  0x55   : > { %960 = vmatmul.mubr.f32.vlgmr.msra.gmra.mrb[0].mxu0 %v419_v1  ;;  %v2373_v1 = vld [vmem:[%s3339_s14 + $0x220] sm:$0xff]  }
  0x56   : > { %1035 = vmatmul.mubr.f32.vlgmr.msra.gmra.mrb[0].mxu1 %v421_v2  ;;  %2839 = vmatpush3.bf16.msra.mxu0 %v2337_v3  ;;  %v2389_v2 = vld [vmem:[%s3339_s14 + $0x2a0] sm:$0xff]   ;;  %v2382_v3 = vld [vmem:[%s3339_s14 + $0x268] sm:$0xff]  }
  0x57   : > { %2871 = vmatpush3.bf16.msra.mxu1 %v2353_v4  ;;  %2841 = vmatprep.subr.bf16.mxu0 %v2346_v5  ;;  %v2398_v4 = vld [vmem:[%s3339_s14 + $0x2e8] sm:$0xff]  }
  0x58   : > { %2873 = vmatprep.subr.bf16.mxu1 %v2362_v6  ;;  %964 = vmatprep.mubr.f32.mxu0 %v434_v7  ;;  %v2374_v5 = vld [vmem:[%s3339_s14 + $0x228] sm:$0xff]   ;;  %v2383_v7 = vld [vmem:[%s3339_s14 + $0x270] sm:$0xff]  }
  0x59   : > { %1039 = vmatprep.mubr.f32.mxu1 %v436_v8  ;;  %965 = vmatmul.mubr.f32.gmra.mrb[2].mxu0 %v433_v9  ;;  %v2390_v6 = vld [vmem:[%s3339_s14 + $0x2a8] sm:$0xff]   ;;  %v2399_v8 = vld [vmem:[%s3339_s14 + $0x2f0] sm:$0xff]  }
  0x5a   : > { %1040 = vmatmul.mubr.f32.gmra.mrb[2].mxu1 %v435_v10  ;;  %2843 = vmatpush3.bf16.msra.mxu0 %v2338_v11  ;;  %v2375_v9 = vld [vmem:[%s3339_s14 + $0x230] sm:$0xff]   ;;  %v2384_v11 = vld [vmem:[%s3339_s14 + $0x278] sm:$0xff]  }
  0x5b   : > { %2875 = vmatpush3.bf16.msra.mxu1 %v2354_v12  ;;  %2845 = vmatprep.subr.bf16.mxu0 %v2347_v13  ;;  %v2391_v10 = vld [vmem:[%s3339_s14 + $0x2b0] sm:$0xff]   ;;  %v2400_v12 = vld [vmem:[%s3339_s14 + $0x2f8] sm:$0xff]  }
  0x5c   : > { %2877 = vmatprep.subr.bf16.mxu1 %v2363_v14  ;;  %1109 = vmatprep.mubr.f32.mxu0 %v424_v15  ;;  %v2376_v13 = vld [vmem:[%s3339_s14 + $0x238] sm:$0xff]   ;;  %v2409_v15 = vld [vmem:[%s3339_s14 + $0x340] sm:$0xff]  }
  0x5d   : > { %1184 = vmatprep.mubr.f32.mxu1 %v426_v16  ;;  %v2392_v14 = vld [vmem:[%s3339_s14 + $0x2b8] sm:$0xff]   ;;  %v427_v16 = vld [vmem:[%s3341_s15 + $0x40] sm:$0xff] }
  0x5e   : > { %2847 = vmatpush3.bf16.msra.mxu0 %v2339_v17  ;;  %v429_v17 = vld [vmem:[%s3341_s15 + $0x50] sm:$0xff] }
  0x5f   : > { %2879 = vmatpush3.bf16.msra.mxu1 %v2355_v18  ;;  %2849 = vmatprep.subr.bf16.mxu0 %v2348_v19  ;;  %v2401_v18 = vld [vmem:[%s3339_s14 + $0x300] sm:$0xff]   ;;  %v442_v19 = vld [vmem:[%s3341_s15 + $0xb8] sm:$0xff] }
  0x60   : > { %2881 = vmatprep.subr.bf16.mxu1 %v2364_v20  ;;  %v2410_v20 = vld [vmem:[%s3339_s14 + $0x348] sm:$0xff]  }
  0x62   : > { %2851 = vmatpush3.bf16.msra.mxu0 %v2340_v21  ;;  %v444_v21 = vld [vmem:[%s3341_s15 + $0xc8] sm:$0xff] }
  0x63   : > { %2883 = vmatpush3.bf16.msra.mxu1 %v2356_v22  ;;  %2853 = vmatprep.subr.bf16.mxu0 %v2349_v23  ;;  %v441_v22 = vld [vmem:[%s3341_s15 + $0xb0] sm:$0xff]  ;;  %v443_v23 = vld [vmem:[%s3341_s15 + $0xc0] sm:$0xff] }
  0x64   : > { %2885 = vmatprep.subr.bf16.mxu1 %v2365_v24  ;;  %v2402_v24 = vld [vmem:[%s3339_s14 + $0x308] sm:$0xff]  }
  0x66   : > { %2855 = vmatpush3.bf16.msra.mxu0 %v2341_v25  ;;  %v2411_v25 = vld [vmem:[%s3339_s14 + $0x350] sm:$0xff]  }
  0x67   : > { %2887 = vmatpush3.bf16.msra.mxu1 %v2357_v26  ;;  %2857 = vmatprep.subr.bf16.mxu0 %v2350_v27  ;;  %v432_v26 = vld [vmem:[%s3341_s15 + $0x68] sm:$0xff]  ;;  %v446_v27 = vld [vmem:[%s3341_s15 + $0xd8] sm:$0xff] }
  0x68   : > { %2889 = vmatprep.subr.bf16.mxu1 %v2366_v28  ;;  %v2403_v28 = vld [vmem:[%s3339_s14 + $0x310] sm:$0xff]  }
  0x6a   : > { %2859 = vmatpush3.bf16.msra.mxu0 %v2342_v29  ;;  %v2412_v29 = vld [vmem:[%s3339_s14 + $0x358] sm:$0xff]  }
  0x6b   : > { %2891 = vmatpush3.bf16.msra.mxu1 %v2358_v30  ;;  %2861 = vmatprep.subr.bf16.mxu0 %v2351_v31  ;;  %v2404_v30 = vld [vmem:[%s3339_s14 + $0x318] sm:$0xff]   ;;  %v2413_v31 = vld [vmem:[%s3339_s14 + $0x360] sm:$0xff]  }
  0x6c   : > { %2893 = vmatprep.subr.bf16.mxu1 %v2367_v32  ;;  %v2405_v32 = vld [vmem:[%s3339_s14 + $0x320] sm:$0xff]  }
  0x6e   : > { %2863 = vmatpush3.bf16.msra.mxu0 %v2343_v33  ;;  %v2414_v33 = vld [vmem:[%s3339_s14 + $0x368] sm:$0xff]  }
  0x6f   : > { %2895 = vmatpush3.bf16.msra.mxu1 %v2359_v34  ;;  %2865 = vmatprep.subr.bf16.mxu0 %v2352_v35  ;;  %v2406_v34 = vld [vmem:[%s3339_s14 + $0x328] sm:$0xff]   ;;  %v2415_v35 = vld [vmem:[%s3339_s14 + $0x370] sm:$0xff]  }
  0x70   : > { %2897 = vmatprep.subr.bf16.mxu1 %v2368_v36  ;;  %v2407_v36 = vld [vmem:[%s3339_s14 + $0x330] sm:$0xff]  }
  0x72   : > { %2867 = vmatpush3.bf16.msra.mxu0 %v2344_v37  ;;  %v2416_v37 = vld [vmem:[%s3339_s14 + $0x378] sm:$0xff]  }
  0x73   : > { %2899 = vmatpush3.bf16.msra.mxu1 %v2360_v38  ;;  %2901 = vmatprep.subr.bf16.mxu0 %v2377_v39  ;;  %v2408_v38 = vld [vmem:[%s3339_s14 + $0x338] sm:$0xff]   ;;  %v431_v39 = vld [vmem:[%s3341_s15 + $0x60] sm:$0xff] }
  0x74   : > { %2933 = vmatprep.subr.bf16.mxu1 %v2393_v40  ;;  %v445_v40 = vld [vmem:[%s3341_s15 + $0xd0] sm:$0xff] }
  0x75   : > { %1110 = vmatmul.mubr.f32.vlgmr.msra.gmra.mrb[4].mxu0 %v423_v41 }
  0x76   : > { %1185 = vmatmul.mubr.f32.vlgmr.msra.gmra.mrb[4].mxu1 %v425_v42  ;;  %2903 = vmatpush3.bf16.msra.mxu0 %v2369_v43 }
  0x77   : > { %2935 = vmatpush3.bf16.msra.mxu1 %v2385_v44  ;;  %1114 = vmatprep.mubr.f32.mxu0 %v438_v45 }
  0x78   : > { %2905 = vmatprep.subr.bf16.mxu0 %v2378_v46  ;;  %2937 = vmatprep.subr.bf16.mxu1 %v2394_v47 }
  0x79   : > { %1189 = vmatprep.mubr.f32.mxu1 %v440_v48  ;;  %1115 = vmatmul.mubr.f32.gmra.mrb[6].mxu0 %v437_v49 }
  0x7a   : > { %1190 = vmatmul.mubr.f32.gmra.mrb[6].mxu1 %v439_v50  ;;  %2907 = vmatpush3.bf16.msra.mxu0 %v2370_v51 }
  0x7b   : > { %2939 = vmatpush3.bf16.msra.mxu1 %v2386_v52  ;;  %2909 = vmatprep.subr.bf16.mxu0 %v2379_v53 }
  0x7c   : > { %2941 = vmatprep.subr.bf16.mxu1 %v2395_v54  ;;  %1259 = vmatprep.mubr.f32.mxu0 %v428_v55 }
  0x7d   : > { %1334 = vmatprep.mubr.f32.mxu1 %v430_v56 }
  0x7e   : > { %2911 = vmatpush3.bf16.msra.mxu0 %v2371_v57 }
  0x7f   : > { %2943 = vmatpush3.bf16.msra.mxu1 %v2387_v58  ;;  %2913 = vmatprep.subr.bf16.mxu0 %v2380_v59 }
  0x80   : > { %2945 = vmatprep.subr.bf16.mxu1 %v2396_v60 }
  0x82   : > { %2915 = vmatpush3.bf16.msra.mxu0 %v2372_v61 }
  0x83   : > { %2947 = vmatpush3.bf16.msra.mxu1 %v2388_v62  ;;  %2917 = vmatprep.subr.bf16.mxu0 %v2381_v63 }
  0x84   : > { %2949 = vmatprep.subr.bf16.mxu1 %v2397_v0 }
  0x86   : > { %2919 = vmatpush3.bf16.msra.mxu0 %v2373_v1 }
  0x87   : > { %2951 = vmatpush3.bf16.msra.mxu1 %v2389_v2  ;;  %2921 = vmatprep.subr.bf16.mxu0 %v2382_v3 }
  0x88   : > { %2953 = vmatprep.subr.bf16.mxu1 %v2398_v4 }
  0x8a   : > { %2923 = vmatpush3.bf16.msra.mxu0 %v2374_v5 }
  0x8b   : > { %2955 = vmatpush3.bf16.msra.mxu1 %v2390_v6  ;;  %2925 = vmatprep.subr.bf16.mxu0 %v2383_v7 }
  0x8c   : > { %2957 = vmatprep.subr.bf16.mxu1 %v2399_v8 }
  0x8e   : > { %2927 = vmatpush3.bf16.msra.mxu0 %v2375_v9 }
  0x8f   : > { %2959 = vmatpush3.bf16.msra.mxu1 %v2391_v10  ;;  %2929 = vmatprep.subr.bf16.mxu0 %v2384_v11 }
  0x90   : > { %2961 = vmatprep.subr.bf16.mxu1 %v2400_v12 }
  0x92   : > { %2931 = vmatpush3.bf16.msra.mxu0 %v2376_v13 }
  0x93   : > { %2963 = vmatpush3.bf16.msra.mxu1 %v2392_v14  ;;  %2965 = vmatprep.subr.bf16.mxu0 %v2409_v15 }
  0x94   : > { %3060 = vmatprep.subr.bf16.mxu1 %v2409_v15 }
  0x95   : > { %1260 = vmatmul.mubr.f32.vlgmr.msra.gmra.mrb[8].mxu0 %v427_v16 }
  0x96   : > { %1335 = vmatmul.mubr.f32.vlgmr.msra.gmra.mrb[8].mxu1 %v429_v17  ;;  %2967 = vmatpush3.bf16.msra.mxu0 %v2401_v18 }
  0x97   : > { %3068 = vmatpush3.bf16.msra.mxu1 %v2401_v18  ;;  %1264 = vmatprep.mubr.f32.mxu0 %v442_v19 }
  0x98   : > { %2969 = vmatprep.subr.bf16.mxu0 %v2410_v20  ;;  %3061 = vmatprep.subr.bf16.mxu1 %v2410_v20 }
  0x99   : > { %1339 = vmatprep.mubr.f32.mxu1 %v444_v21  ;;  %1265 = vmatmul.mubr.f32.gmra.mrb[10].mxu0 %v441_v22 }
  0x9a   : > { %1340 = vmatmul.mubr.f32.gmra.mrb[10].mxu1 %v443_v23  ;;  %2971 = vmatpush3.bf16.msra.mxu0 %v2402_v24 }
  0x9b   : > { %3069 = vmatpush3.bf16.msra.mxu1 %v2402_v24  ;;  %2973 = vmatprep.subr.bf16.mxu0 %v2411_v25 }
  0x9c   : > { %3062 = vmatprep.subr.bf16.mxu1 %v2411_v25  ;;  %1409 = vmatprep.mubr.f32.mxu0 %v432_v26 }
  0x9d   : > { %1414 = vmatprep.mubr.f32.mxu1 %v446_v27 }
  0x9e   : > { %2975 = vmatpush3.bf16.msra.mxu0 %v2403_v28 }
  0x9f   : > { %3070 = vmatpush3.bf16.msra.mxu1 %v2403_v28  ;;  %2977 = vmatprep.subr.bf16.mxu0 %v2412_v29 }
  0xa0   : > { %3063 = vmatprep.subr.bf16.mxu1 %v2412_v29  ;;  %v417_v29 = vld [vmem:[#allocation2] sm:$0xff] }
  0xa2   : > { %2979 = vmatpush3.bf16.msra.mxu0 %v2404_v30 }
  0xa3   : > { %3071 = vmatpush3.bf16.msra.mxu1 %v2404_v30  ;;  %2981 = vmatprep.subr.bf16.mxu0 %v2413_v31  ;;  %v418_v30 = vld [vmem:[#allocation2 + $0x8] sm:$0xff] }
  0xa4   : > { %3064 = vmatprep.subr.bf16.mxu1 %v2413_v31 }
  0xa6   : > { %2983 = vmatpush3.bf16.msra.mxu0 %v2405_v32 }
  0xa7   : > { %3072 = vmatpush3.bf16.msra.mxu1 %v2405_v32  ;;  %2985 = vmatprep.subr.bf16.mxu0 %v2414_v33 }
  0xa8   : > { %3065 = vmatprep.subr.bf16.mxu1 %v2414_v33 }
  0xaa   : > { %2987 = vmatpush3.bf16.msra.mxu0 %v2406_v34 }
  0xab   : > { %3073 = vmatpush3.bf16.msra.mxu1 %v2406_v34  ;;  %2989 = vmatprep.subr.bf16.mxu0 %v2415_v35 }
  0xac   : > { %3066 = vmatprep.subr.bf16.mxu1 %v2415_v35  ;;  %v1504_v35 = vld [vmem:[%s3684_s4] sm:$0xff] (!%p1849_p10) }
  0xae   : > { %2991 = vmatpush3.bf16.msra.mxu0 %v2407_v36 }
  0xaf   : > { %3074 = vmatpush3.bf16.msra.mxu1 %v2407_v36  ;;  %2993 = vmatprep.subr.bf16.mxu0 %v2416_v37  ;;  %v1505_v36 = vld [vmem:[%s3684_s4 + $0x8] sm:$0xff] (!%p1849_p10) }
  0xb0   : > { %3067 = vmatprep.subr.bf16.mxu1 %v2416_v37  ;;  %v1506_v37 = vld [vmem:[%s3684_s4 + $0x10] sm:$0xff] (!%p1849_p10) }
  0xb2   : > { %2995 = vmatpush3.bf16.msra.mxu0 %v2408_v38 }
  0xb3   : > { %3075 = vmatpush3.bf16.msra.mxu1 %v2408_v38  ;;  %v2996_v38 = vpack.c.bf16 (!%p1849_p10), %v1505_v36, %v1504_v35  ;;  %v1851_v36 = vld [vmem:[%s3683_s3] ss:$0 sm:$0xff] (!%p1849_p10) }
  0xb5   : > { %1410 = vmatmul.mubr.f32.vlgmr.msra.gmra.mrb[12].mxu0 %v431_v39  ;;  %v1507_v39 = vld [vmem:[%s3684_s4 + $0x18] sm:$0xff] (!%p1849_p10)  ;;  %2997 = vmatprep.subr.bf16.mxu0 (!%p1849_p10), %v2996_v38 }
  0xb6   : > { %1415 = vmatmul.mubr.f32.vlgmr.msra.gmra.mrb[12].mxu1 %v445_v40  ;;  %v3000_v40 = vpack.c.bf16 (!%p1849_p10), %v1507_v39, %v1506_v37  ;;  %2999 = vmatpush3.bf16.msra.mxu0 (!%p1849_p10), %v2996_v38 }
  0xb8   : > { %3001 = vmatprep.subr.bf16.mxu0 (!%p1849_p10), %v3000_v40 }
  0xba   : > { %3003 = vmatpush3.bf16.msra.mxu0 (!%p1849_p10), %v3000_v40 }
 0x128   : > { %v2449_v41 = vpop.f32.mrb[0].mxu0 }
 0x129   : > { %v2487_v42 = vpop.f32.mrb[0].mxu1  ;;  %v2450_v43 = vpop.f32.mrb[1].mxu0 }
 0x12a   : > { %v2488_v44 = vpop.f32.mrb[1].mxu1  ;;  %v2451_v45 = vadd.f32 %v2450_v43, %v2449_v41  ;;  %v1508_v41 = vld [vmem:[%s3684_s4 + $0x20] sm:$0xff] (!%p1849_p10) }
 0x12b   : > { %v2489_v46 = vadd.f32 %v2488_v44, %v2487_v42  ;;  %v1509_v42 = vld [vmem:[%s3684_s4 + $0x28] sm:$0xff] (!%p1849_p10) }
 0x12c   : > { %v2452_v48 = vpop.f32.mrb[2].mxu0  ;;  %v3004_v43 = vpack.c.bf16 (!%p1849_p10), %v1509_v42, %v1508_v41 }
 0x12d   : > { %v1037_v47 = vadd.f32 %v2489_v46, %v2451_v45  ;;  %v2490_v49 = vpop.f32.mrb[2].mxu1  ;;  %v2453_v50 = vpop.f32.mrb[3].mxu0  ;;  %v1510_v46 = vld [vmem:[%s3684_s4 + $0x30] sm:$0xff] (!%p1849_p10) }
 0x12e   : > { %v2491_v51 = vpop.f32.mrb[3].mxu1  ;;  %v2454_v52 = vadd.f32 %v2453_v50, %v2452_v48  ;;  %3005 = vmatprep.subr.bf16.mxu0 (!%p1849_p10), %v3004_v43 }
 0x12f   : > { %v2492_v53 = vadd.f32 %v2491_v51, %v2490_v49  ;;  %3007 = vmatpush3.bf16.msra.mxu0 (!%p1849_p10), %v3004_v43  ;;  %v1630_v43 = vld [vmem:[%s3686_s6 + $0x80] sm:$0xff] (!%p1849_p10) }
 0x131   : > { %v1042_v54 = vadd.f32 %v2492_v53, %v2454_v52  ;;  %v1512_v53 = vld [vmem:[%s3684_s4 + $0x40] sm:$0xff] (!%p1849_p10) }
 0x148   : > { %v2525_v55 = vpop.f32.mrb[4].mxu0 }
 0x149   : > { %v2563_v56 = vpop.f32.mrb[4].mxu1  ;;  %v2526_v57 = vpop.f32.mrb[5].mxu0 }
 0x14a   : > { %v2564_v58 = vpop.f32.mrb[5].mxu1  ;;  %v2527_v59 = vadd.f32 %v2526_v57, %v2525_v55 }
 0x14b   : > { %v2565_v60 = vadd.f32 %v2564_v58, %v2563_v56 }
 0x14c   : > { %v1112_v61 = vadd.f32 %v2527_v59, %v1037_v47  ;;  %v2528_v62 = vpop.f32.mrb[6].mxu0  ;;  %v1511_v47 = vld [vmem:[%s3684_s4 + $0x38] sm:$0xff] (!%p1849_p10) }
 0x14d   : > { %v2566_v63 = vpop.f32.mrb[6].mxu1  ;;  %v2529_v0 = vpop.f32.mrb[7].mxu0  ;;  %v3008_v52 = vpack.c.bf16 (!%p1849_p10), %v1511_v47, %v1510_v46  ;;  %v1615_v47 = vld [vmem:[%s3686_s6 + $0x8] sm:$0xff] (!%p1849_p10) }
 0x14e   : > { %v2567_v1 = vpop.f32.mrb[7].mxu1  ;;  %v1187_v2 = vadd.f32 %v2565_v60, %v1112_v61  ;;  %v2530_v3 = vadd.f32 %v2529_v0, %v2528_v62  ;;  %v1514_v60 = vld [vmem:[%s3684_s4 + $0x50] sm:$0xff] (!%p1849_p10)  ;;  %v1515_v61 = vld [vmem:[%s3684_s4 + $0x58] sm:$0xff] (!%p1849_p10) }
 0x14f   : > { %v2568_v4 = vadd.f32 %v2567_v1, %v2566_v63  ;;  %3009 = vmatprep.subr.bf16.mxu0 (!%p1849_p10), %v3008_v52 }
 0x150   : > { %v1117_v5 = vadd.f32 %v2530_v3, %v1042_v54  ;;  %v1513_v54 = vld [vmem:[%s3684_s4 + $0x48] sm:$0xff] (!%p1849_p10)  ;;  %3011 = vmatpush3.bf16.msra.mxu0 (!%p1849_p10), %v3008_v52  ;;  %v1516_v3 = vld [vmem:[%s3684_s4 + $0x60] sm:$0xff] (!%p1849_p10)  ;;  %v1616_v52 = vld [vmem:[%s3686_s6 + $0x10] sm:$0xff] (!%p1849_p10) }
 0x151   : > { %v3012_v59 = vpack.c.bf16 (!%p1849_p10), %v1513_v54, %v1512_v53  ;;  %v1617_v53 = vld [vmem:[%s3686_s6 + $0x18] sm:$0xff] (!%p1849_p10)  ;;  %v1634_v54 = vld [vmem:[%s3686_s6 + $0xa0] sm:$0xff] (!%p1849_p10) }
 0x152   : > { %v1192_v6 = vadd.f32 %v2568_v4, %v1117_v5  ;;  %v1517_v4 = vld [vmem:[%s3684_s4 + $0x68] sm:$0xff] (!%p1849_p10) }
 0x153   : > { %3013 = vmatprep.subr.bf16.mxu0 (!%p1849_p10), %v3012_v59 }
 0x154   : > { %3015 = vmatpush3.bf16.msra.mxu0 (!%p1849_p10), %v3012_v59  ;;  %v1619_v59 = vld [vmem:[%s3686_s6 + $0x28] sm:$0xff] (!%p1849_p10) }
 0x168   : > { %v2601_v7 = vpop.f32.mrb[8].mxu0 }
 0x169   : > { %v2639_v8 = vpop.f32.mrb[8].mxu1  ;;  %v2602_v9 = vpop.f32.mrb[9].mxu0 }
 0x16a   : > { %v2640_v10 = vpop.f32.mrb[9].mxu1  ;;  %v2603_v11 = vadd.f32 %v2602_v9, %v2601_v7  ;;  %v3020_v9 = vpack.c.bf16 (!%p1849_p10), %v1517_v4, %v1516_v3  ;;  %v1639_v3 = vld [vmem:[%s3686_s6 + $0xc8] sm:$0xff] (!%p1849_p10) }
 0x16b   : > { %v2641_v12 = vadd.f32 %v2640_v10, %v2639_v8  ;;  %v1518_v10 = vld [vmem:[%s3684_s4 + $0x70] sm:$0xff] (!%p1849_p10) }
 0x16c   : > { %v1262_v13 = vadd.f32 %v2603_v11, %v1187_v2  ;;  %v2604_v14 = vpop.f32.mrb[10].mxu0  ;;  %v3016_v2 = vpack.c.bf16 (!%p1849_p10), %v1515_v61, %v1514_v60  ;;  %v1519_v11 = vld [vmem:[%s3684_s4 + $0x78] sm:$0xff] (!%p1849_p10)  ;;  %v1636_v60 = vld [vmem:[%s3686_s6 + $0xb0] sm:$0xff] (!%p1849_p10) }
 0x16d   : > { %v2642_v15 = vpop.f32.mrb[10].mxu1  ;;  %v2605_v16 = vpop.f32.mrb[11].mxu0  ;;  %v1637_v61 = vld [vmem:[%s3686_s6 + $0xb8] sm:$0xff] (!%p1849_p10) }
 0x16e   : > { %v2643_v17 = vpop.f32.mrb[11].mxu1  ;;  %v1337_v18 = vadd.f32 %v2641_v12, %v1262_v13  ;;  %v2606_v19 = vadd.f32 %v2605_v16, %v2604_v14  ;;  %3017 = vmatprep.subr.bf16.mxu0 (!%p1849_p10), %v3016_v2  ;;  %v3024_v16 = vpack.c.bf16 (!%p1849_p10), %v1519_v11, %v1518_v10 }
 0x16f   : > { %v2644_v20 = vadd.f32 %v2643_v17, %v2642_v15  ;;  %3019 = vmatpush3.bf16.msra.mxu0 (!%p1849_p10), %v3016_v2  ;;  %v1638_v2 = vld [vmem:[%s3686_s6 + $0xc0] sm:$0xff] (!%p1849_p10) }
 0x170   : > { %v1267_v21 = vadd.f32 %v2606_v19, %v1192_v6  ;;  %3021 = vmatprep.subr.bf16.mxu0 (!%p1849_p10), %v3020_v9 }
 0x172   : > { %v1342_v22 = vadd.f32 %v2644_v20, %v1267_v21 }
 0x173   : > { %3023 = vmatpush3.bf16.msra.mxu0 (!%p1849_p10), %v3020_v9  ;;  %v1641_v9 = vld [vmem:[%s3686_s6 + $0xd8] sm:$0xff] (!%p1849_p10) }
 0x174   : > { %3025 = vmatprep.subr.bf16.mxu0 (!%p1849_p10), %v3024_v16 }
 0x177   : > { %3027 = vmatpush3.bf16.msra.mxu0 (!%p1849_p10), %v3024_v16 }
 0x188   : > { %v2677_v23 = vpop.f32.mrb[12].mxu0 }
 0x189   : > { %v2680_v24 = vpop.f32.mrb[12].mxu1  ;;  %v2678_v25 = vpop.f32.mrb[13].mxu0 }
 0x18a   : > { %v2681_v26 = vpop.f32.mrb[13].mxu1  ;;  %v2679_v27 = vadd.f32 %v2678_v25, %v2677_v23 }
 0x18b   : > { %v2682_v28 = vadd.f32 %v2681_v26, %v2680_v24  ;;  %1427 = sbr.rel (%p1849_p10) target bundleno = 1375 (0x55f), region = 79 }
 0x18c   : > { %v1412_v31 = vadd.f32 %v2679_v27, %v1337_v18 }
 0x18d   : > { %v1417_v32 = vadd.f32 %v2682_v28, %v1342_v22 }
 0x18e   : > { %v1420_v33 = vadd.f32 %v1412_v31, %v417_v29 }
 0x18f   : > { %v1421_v34 = vadd.f32 %v1417_v32, %v418_v30  ;;  %v1850_v32 = vld [vmem:[%s3682_s2] ss:$0 sm:$0xff] (!%p1849_p10) }
 0x190   : > { %1422 = vst [vmem:[#allocation2] sm:$0xff] %v1420_v33 }
 0x191   : > { %1423 = vst [vmem:[#allocation2 + $0x8] sm:$0xff] %v1421_v34 }
 0x197   : > { %v1428_v44 = vld [vmem:[#allocation2] sm:$0xff] }
 0x198   : > { %v1429_v45 = vld [vmem:[#allocation2 + $0x8] sm:$0xff]  ;;  %v1430_v48 = vrot.slane %v1428_v44, 4 }
 0x199   : > { %v1438_v49 = vrot.slane %v1429_v45, 4 }
 0x19a   : > { %v1431_v50 = vadd.f32 %v1430_v48, %v1428_v44  ;;  %v1632_v48 = vld [vmem:[%s3686_s6 + $0x90] sm:$0xff] }
 0x19b   : > { %v1439_v51 = vadd.f32 %v1438_v49, %v1429_v45  ;;  %v1633_v49 = vld [vmem:[%s3686_s6 + $0x98] sm:$0xff] }
 0x19c   : > { %v1432_v55 = vrot.slane %v1431_v50, 2 }
 0x19d   : > { %v1440_v56 = vrot.slane %v1439_v51, 2 }
 0x19e   : > { %v1433_v57 = vadd.f32 %v1432_v55, %v1431_v50  ;;  %v1635_v55 = vld [vmem:[%s3686_s6 + $0xa8] sm:$0xff] }
 0x19f   : > { %v1441_v58 = vadd.f32 %v1440_v56, %v1439_v51  ;;  %v3032_v51 = vpack.c.bf16 %v1633_v49, %v1632_v48  ;;  %v3034_v56 = vpack.c.bf16 %v1617_v53, %v1616_v52 }
 0x1a0   : > { %v1434_v62 = vrot.slane %v1433_v57, 1 }
 0x1a1   : > { %v1442_v63 = vrot.slane %v1441_v58, 1 }
 0x1a2   : > { %v1435_v0 = vadd.f32 %v1434_v62, %v1433_v57  ;;  %v3036_v57 = vpack.c.bf16 %v1635_v55, %v1634_v54 }
 0x1a3   : > { %v1443_v1 = vadd.f32 %v1442_v63, %v1441_v58  ;;  %v1618_v58 = vld [vmem:[%s3686_s6 + $0x20] sm:$0xff]  ;;  %v3040_v63 = vpack.c.bf16 %v1637_v61, %v1636_v60 }
 0x1a4   : > { %v1437_v5 = vmul.f32 0.125, %v1435_v0  ;;  %v3038_v62 = vpack.c.bf16 %v1619_v59, %v1618_v58  ;;  %v1620_v0 = vld [vmem:[%s3686_s6 + $0x30] sm:$0xff] }
 0x1a5   : > { %v1444_v6 = vmul.f32 0.125, %v1443_v1  ;;  %v1621_v1 = vld [vmem:[%s3686_s6 + $0x38] sm:$0xff] }
 0x1a6   : > { %v1445_v7 = vsub.f32 %v1428_v44, %v1437_v5  ;;  %v1631_v44 = vld [vmem:[%s3686_s6 + $0x88] sm:$0xff]  ;;  %v3042_v4 = vpack.c.bf16 %v1621_v1, %v1620_v0  ;;  %v3044_v5 = vpack.c.bf16 %v1639_v3, %v1638_v2 }
 0x1a7   : > { %v1454_v8 = vsub.f32 %v1429_v45, %v1444_v6  ;;  %v1614_v45 = vld [vmem:[%s3686_s6] sm:$0xff]  ;;  %v3028_v46 = vpack.c.bf16 %v1631_v44, %v1630_v43 }
 0x1a8   : > { %v1446_v12 = vmul.f32 %v1445_v7, %v1445_v7  ;;  %v3030_v50 = vpack.c.bf16 %v1615_v47, %v1614_v45  ;;  %v1622_v6 = vld [vmem:[%s3686_s6 + $0x40] sm:$0xff] }
 0x1a9   : > { %v1455_v13 = vmul.f32 %v1454_v8, %v1454_v8  ;;  %3029 = vmatprep.subr.bf16.mxu1 %v3028_v46 }
 0x1aa   : > { %v1447_v14 = vrot.slane %v1446_v12, 4  ;;  %3031 = vmatpush3.bf16.xpose.msra.mxu1 %v3030_v50 }
 0x1ab   : > { %v1456_v15 = vrot.slane %v1455_v13, 4  ;;  %3033 = vmatprep.subr.bf16.mxu1 %v3032_v51 }
 0x1ac   : > { %v1448_v17 = vadd.f32 %v1447_v14, %v1446_v12  ;;  %v1624_v12 = vld [vmem:[%s3686_s6 + $0x50] sm:$0xff] }
 0x1ad   : > { %v1457_v18 = vadd.f32 %v1456_v15, %v1455_v13  ;;  %v1625_v13 = vld [vmem:[%s3686_s6 + $0x58] sm:$0xff]  ;;  %v1852_v15 = vld [vmem:[%s3685_s5] ss:$0 sm:$0xff] }
 0x1ae   : > { %v1449_v19 = vrot.slane %v1448_v17, 2  ;;  %v3050_v14 = vpack.c.bf16 %v1625_v13, %v1624_v12 }
 0x1af   : > { %v1458_v20 = vrot.slane %v1457_v18, 2 }
 0x1b0   : > { %v1450_v21 = vadd.f32 %v1449_v19, %v1448_v17 }
 0x1b1   : > { %v1459_v22 = vadd.f32 %v1458_v20, %v1457_v18 }
 0x1b2   : > { %v1451_v23 = vrot.slane %v1450_v21, 1  ;;  %3035 = vmatpush3.bf16.xpose.msra.mxu1 %v3034_v56 }
 0x1b3   : > { %v1460_v24 = vrot.slane %v1459_v22, 1  ;;  %3037 = vmatprep.subr.bf16.mxu1 %v3036_v57 }
 0x1b4   : > { %v1452_v25 = vadd.f32 %v1451_v23, %v1450_v21  ;;  %v1643_v23 = vld [vmem:[%s3686_s6 + $0xe8] sm:$0xff] }
 0x1b5   : > { %v1461_v26 = vadd.f32 %v1460_v24, %v1459_v22  ;;  %v1642_v22 = vld [vmem:[%s3686_s6 + $0xe0] sm:$0xff] }
 0x1b6   : > { %v1453_v27 = vmul.f32 0.125, %v1452_v25  ;;  %v3052_v24 = vpack.c.bf16 %v1643_v23, %v1642_v22  ;;  %v1626_v25 = vld [vmem:[%s3686_s6 + $0x60] sm:$0xff] }
 0x1b7   : > { %v1462_v28 = vmul.f32 0.125, %v1461_v26  ;;  %v1627_v26 = vld [vmem:[%s3686_s6 + $0x68] sm:$0xff] }
 0x1b8   : > { %v1474_v29 = vadd.f32 1e-05, %v1453_v27  ;;  %v3054_v27 = vpack.c.bf16 %v1627_v26, %v1626_v25 }
 0x1b9   : > { %v1476_v30 = vadd.f32 1e-05, %v1462_v28  ;;  %v1644_v28 = vld [vmem:[%s3686_s6 + $0xf0] sm:$0xff] }
 0x1ba   : > { %3110 = vrsqrt.f32 %v1474_v29  ;;  %3039 = vmatpush3.bf16.xpose.msra.mxu1 %v3038_v62  ;;  %v1645_v29 = vld [vmem:[%s3686_s6 + $0xf8] sm:$0xff] }
 0x1bb   : > { %3112 = vrsqrt.f32 %v1476_v30  ;;  %3041 = vmatprep.subr.bf16.mxu1 %v3040_v63  ;;  %v3056_v30 = vpack.c.bf16 %v1645_v29, %v1644_v28 }
 0x1c2   : > { %3043 = vmatpush3.bf16.xpose.msra.mxu1 %v3042_v4 }
 0x1c3   : > { %3045 = vmatprep.subr.bf16.mxu1 %v3044_v5 }
 0x1c4   : > { %v3111_v31 = vpop.eup %3110 }
 0x1c5   : > { %v3113_v33 = vpop.eup %3112  ;;  %v1482_v34 = vmul.f32 %v3111_v31, %v1445_v7  ;;  %v1623_v7 = vld [vmem:[%s3686_s6 + $0x48] sm:$0xff]  ;;  %v1628_v31 = vld [vmem:[%s3686_s6 + $0x70] sm:$0xff] }
 0x1c6   : > { %v1483_v35 = vmul.f32 %v3113_v33, %v1454_v8  ;;  %v1640_v8 = vld [vmem:[%s3686_s6 + $0xd0] sm:$0xff]  ;;  %v3046_v10 = vpack.c.bf16 %v1623_v7, %v1622_v6 }
 0x1c7   : > { %v1491_v37 = vmul.f32 %v1850_v32, %v1482_v34  ;;  %v3048_v11 = vpack.c.bf16 %v1641_v9, %v1640_v8 }
 0x1c8   : > { %v1492_v38 = vmul.f32 %v1850_v32, %v1483_v35  ;;  %v1629_v32 = vld [vmem:[%s3686_s6 + $0x78] sm:$0xff] }
 0x1c9   : > { %v1500_v39 = vadd.f32 %v1851_v36, %v1491_v37  ;;  %v3058_v33 = vpack.c.bf16 %v1629_v32, %v1628_v31 }
 0x1ca   : > { %v1501_v40 = vadd.f32 %v1851_v36, %v1492_v38  ;;  %3047 = vmatpush3.bf16.xpose.msra.mxu1 %v3046_v10 }
 0x1cb   : > { %v1502_v41 = vmax.f32 %v1500_v39, 0.0  ;;  %3049 = vmatprep.subr.bf16.mxu1 %v3048_v11 }
 0x1cc   : > { %v1503_v42 = vmax.f32 %v1501_v40, 0.0 }
 0x1cd   : > { %2769 = vmatprep.mubr.f32.mxu0 %v1502_v41 }
 0x1ce   : > { %2770 = vmatmul.mubr.f32.vlgmr.msra.gmra.mrb[0].mxu0 %v1503_v42 }
 0x1d2   : > { %3051 = vmatpush3.bf16.xpose.msra.mxu1 %v3050_v14 }
 0x1d3   : > { %3053 = vmatprep.subr.bf16.mxu1 %v3052_v24 }
 0x1da   : > { %3055 = vmatpush3.bf16.xpose.msra.mxu1 %v3054_v27 }
 0x1db   : > { %3057 = vmatprep.subr.bf16.mxu1 %v3056_v30 }
 0x1e2   : > { %3059 = vmatpush3.bf16.xpose.msra.mxu1 %v3058_v33 }
 0x2a1   : > { %v2771_v16 = vpop.f32.mrb[0].mxu0 }
 0x2a2   : > { %v1593_v17 = vpop.f32.mrb[1].mxu0  ;;  %v1599_v19 = vadd.f32 %v2771_v16, %v1852_v15 }
 0x2a3   : > { %v1594_v18 = vadd.f32 %v1852_v15, %v1593_v17 }
 0x2a4   : > { %v1603_v21 = vmul.f32 %v1599_v19, %v1599_v19 }
 0x2a5   : > { %v1602_v20 = vmul.f32 %v1594_v18, %v1594_v18 }
 0x2a7   : > { %1604 = vadd.xlane.f32.xlu0 %v1602_v20 }
 0x2ab   : > { %1606 = vadd.xlane.f32.xlu0 %v1603_v21 }
 0x334   : > { %v1605_v34 = vpop.xlane.xlu0 %1604 }
 0x335   : > { %v1608_v35 = vmax.f32 %v1605_v34, 1e-24 }
 0x337   : > { %3114 = vrsqrt.f32 %v1608_v35 }
 0x338   : > { %v1607_v36 = vpop.xlane.xlu0 %1606 }
 0x339   : > { %v1609_v37 = vmax.f32 %v1607_v36, 1e-24 }
 0x33b   : > { %3116 = vrsqrt.f32 %v1609_v37 }
 0x341   : > { %v3115_v38 = vpop.eup %3114 }
 0x342   : > { %v1612_v39 = vmul.f32 %v3115_v38, %v1594_v18 }
 0x344   : > { %2733 = vmatprep.mubr.f32.mxu1 %v1612_v39 }
 0x345   : > { %v3117_v40 = vpop.eup %3116  ;;  %2734 = vmatmul.mubr.f32.vlgmr.msra.gmra.mrb[0].mxu1 %v1612_v39 }
 0x346   : > { %v1613_v41 = vmul.f32 %v3117_v40, %v1599_v19 }
 0x348   : > { %2735 = vmatprep.mubr.f32.mxu1 %v1613_v41  ;;  %1765 = vst [vmem:[%s3689_s9] sm:$0xff] %v1613_v41 }
 0x349   : > { %2736 = vmatmul.mubr.f32.gmra.mrb[2].mxu1 %v1613_v41 }
 0x418   : > { %v1712_v42 = vpop.f32.mrb[0].mxu1 }
 0x419   : > { %v1725_v43 = vmul.f32 10.0, %v1712_v42  ;;  %v1714_v44 = vpop.f32.mrb[1].mxu1 }
 0x41a   : > { %v1726_v45 = vmul.f32 10.0, %v1714_v44 }
 0x41c   : > { %v1718_v46 = vpop.f32.mrb[2].mxu1  ;;  %v1729_v47 = vmax.f32 %v1725_v43, %v1726_v45 }
 0x41d   : > { %v1727_v48 = vmul.f32 100.0, %v1718_v46  ;;  %v1720_v49 = vpop.f32.mrb[3].mxu1 }
 0x41e   : > { %v1728_v50 = vmul.f32 100.0, %v1720_v49  ;;  %1730 = vmax.xlane.f32.xlu1 %v1729_v47 }
 0x420   : > { %v1748_v51 = vmax.f32 %v1727_v48, %v1728_v50 }
 0x422   : > { %1749 = vmax.xlane.f32.xlu1 %v1748_v51 }
 0x4ab   : > { %v1731_v52 = vpop.xlane.xlu1 %1730 }
 0x4ac   : > { %v1732_v53 = vsub.f32 %v1725_v43, %v1731_v52  ;;  %v1733_v54 = vsub.f32 %v1726_v45, %v1731_v52 }
 0x4ae   : > { %v1734_v55 = vmul.f32 1.442695, %v1732_v53  ;;  %v1736_v56 = vmul.f32 1.442695, %v1733_v54 }
 0x4af   : > { %v1750_v57 = vpop.xlane.xlu1 %1749 }
 0x4b0   : > { %3118 = vpow2.f32 %v1734_v55  ;;  %v1751_v58 = vsub.f32 %v1727_v48, %v1750_v57  ;;  %v1752_v59 = vsub.f32 %v1728_v50, %v1750_v57 }
 0x4b1   : > { %3120 = vpow2.f32 %v1736_v56 }
 0x4b2   : > { %v1753_v60 = vmul.f32 1.442695, %v1751_v58  ;;  %v1755_v61 = vmul.f32 1.442695, %v1752_v59 }
 0x4b4   : > { %3122 = vpow2.f32 %v1753_v60 }
 0x4b5   : > { %3124 = vpow2.f32 %v1755_v61 }
 0x4ba   : > { %v3119_v62 = vpop.eup %3118 }
 0x4bb   : > { %v3121_v63 = vpop.eup %3120 }
 0x4bc   : > { %v1738_v0 = vadd.f32 %v3121_v63, %v3119_v62 }
 0x4be   : > { %v3123_v1 = vpop.eup %3122  ;;  %1739 = vadd.xlane.f32.xlu0 %v1738_v0 }
 0x4bf   : > { %v3125_v2 = vpop.eup %3124 }
 0x4c0   : > { %v1757_v3 = vadd.f32 %v3125_v2, %v3123_v1 }
 0x4c2   : > { %1758 = vadd.xlane.f32.xlu1 %v1757_v3 }
 0x54b   : > { %v1740_v4 = vpop.xlane.xlu0 %1739 }
 0x54c   : > { %3126 = vlog2.f32 %v1740_v4 }
 0x54f   : > { %v1759_v5 = vpop.xlane.xlu1 %1758 }
 0x550   : > { %3128 = vrcp.f32 %v1759_v5 }
 0x556   : > { %v3127_v6 = vpop.eup %3126 }
 0x557   : > { %v1742_v7 = vmul.f32 0.6931472, %v3127_v6 }
 0x559   : > { %v1743_v8 = vadd.f32 %v1742_v7, %v1731_v52 }
 0x55a   : > { %v3129_v9 = vpop.eup %3128 }
 0x55b   : > { %v1744_v10 = vsub.f32 %v1725_v43, %v1743_v8  ;;  %v1745_v11 = vsub.f32 %v1726_v45, %v1743_v8  ;;  %v1761_v12 = vmul.f32 %v3129_v9, %v3123_v1  ;;  %v1762_v13 = vmul.f32 %v3129_v9, %v3125_v2 }
 0x55d   : > { %1746 = vst [vmem:[#allocation4] sm:$0xff] %v1744_v10  ;;  %1747 = vst [vmem:[#allocation4 + $0x8] sm:$0xff] %v1745_v11 }
 0x55e   : > { %1763 = vst [vmem:[%s3688_s8] sm:$0xff] %v1761_v12  ;;  %1764 = vst [vmem:[%s3688_s8 + $0x8] sm:$0xff] %v1762_v13 }
 0x55f PF: > { %p3082_p11 = scmp.eq.s32.totalorder %s3252_s12, 1  ;;  %s3185_s21 = smov [#allocation4]  }
 0x560   : > { %s1773_s22 = sshll.u32 %s3185_s21, 4  ;;  %s1774_s22 = int_to_ptr.vmem [resolvable:$true] %s1773_s22 }
 0x561   : > { %s3130_s23 = scalar_lea.vmem %s1774_s22, 256  ;;  %p3137_p1 = scmp.lt.s32.totalorder %s1774_s22, %s1774_s22 }
 0x562   : > { %p3131_p12 = scmp.ne.s32.totalorder %s1774_s22, %s3130_s23  ;;  %p3138_p2 = scmp.lt.s32.totalorder %s3130_s23, %s3130_s23 }
 0x564   : > { %p3132_p13 = pnand %p3131_p12, %p3082_p11  ;;  %p3139_p3 = por %p3138_p2, %p3137_p1 }
 0x566   : > { %p3133_p0 = pneg %p3132_p13 }
 0x568   : > { %p3140_p4 = pnand %p3139_p3, %p3133_p0 }
 0x56a   : > { %3143 = shalt.err (!%p3140_p4)
}
 0x56b   : > { %s3144_s26 = scalar_lea.hbm %s3687_s7, 256 }
 0x56c   : > { %p3145_p5 = scmp.ne.s32.totalorder %s3687_s7, %s3144_s26  ;;  %p3150_p8 = scmp.lt.u32.totalorder %s3144_s26, %s3687_s7 }
 0x56e   : > { %p3146_p6 = pnand %p3145_p5, %p3082_p11 }
 0x570   : > { %p3147_p7 = pneg %p3146_p6 }
 0x572   : > { %p3152_p9 = pnand %p3150_p8, %p3147_p7 }
 0x574   : > { %3155 = shalt.err (!%p3152_p9)
}
 0x575   : > { %3079 = dma.vmem_to_hbm [thread:$0]  (%p3082_p11), %s1774_s22, 256, %s3687_s7, [#allocation5]  }
 0x576   : > { %3169 = dma.done.wait (%p3082_p11), [#allocation5], 256  }
 0x577   : > { %3171 = vsyncadd (%p3082_p11), [#allocation5], 4294967040 }
 0x578 PF: > { %p18_p10 = scmp.ge.s32.totalorder %s3255_s13, 4   ;;  %s3690_s30 = smov %s3178_s10 }
 0x579   : > { %s3691_s10 = smov %s3264_s16  ;;  %s3692_s11 = smov %s3255_s13 }
 0x57a   :  { %20 = sbr.rel (!%p18_p10) target bundleno = 2 (0x2), region = 130 }
 0x581   :  { %1798 = vsyncpa [#allocation5], 1 }
 0x582   :  { %1800 = vsyncpa [#allocation5 + $0x1], 1 }

// kernel: compress_forward.1
= control target key start
LH: loop header
LB: loop body
LE: loop exit
PB: predicated region body
PF: predicated region fallthrough
CT: control target
= control target key end

     0   :  { %15 = vsyncpa [#allocation5], 0  ;;  %s3236_s30 = smov 0   ;;  %s3238_s10 = smov 0   ;;  %s3680_s0 = inlined_call_operand.vmem [shape: f32[16,3584], index: 0, kind: input, shape index: {}]   ;;  %s3681_s1 = inlined_call_operand.vmem [shape: bf16[3584,128], index: 1, kind: input, shape index: {}]   ;;  %s3682_s2 = inlined_call_operand.vmem [shape: f32[1,128], index: 2, kind: input, shape index: {}]   ;;  %s3683_s3 = inlined_call_operand.vmem [shape: f32[1,128], index: 3, kind: input, shape index: {}]   ;;  %s3684_s4 = inlined_call_operand.vmem [shape: f32[128,128], index: 4, kind: input, shape index: {}]   ;;  %s3685_s5 = inlined_call_operand.vmem [shape: f32[1,128], index: 5, kind: input, shape index: {}]   ;;  %s3686_s6 = inlined_call_operand.vmem [shape: f32[256,128], index: 6, kind: input, shape index: {}]   ;;  %s3687_s7 = inlined_call_operand.hbm [shape: f32[8,256], index: 7, kind: output, shape index: {0}]   ;;  %s3688_s8 = inlined_call_operand.vmem [shape: f32[8,256], index: 8, kind: output, shape index: {1}]   ;;  %s3689_s9 = inlined_call_operand.vmem [shape: f32[8,128], index: 9, kind: output, shape index: {2}]  }
   0x1   :  { %s3240_s11 = smov 0  }
   0x2 LB: > { %s3252_s12 = sadd.s32 4294967295, %s3182_s11   ;;  %s3255_s13 = sadd.s32 1, %s3182_s11   ;;  %s3182_s11 = sphi %s3240_s11, %s3692_s11   ;;  %s3178_s10 = sphi %s3238_s10, %s3691_s10   ;;  %s3174_s30 = sphi %s3236_s30, %s3690_s30  }
   0x3   : > { %s25_s14 = ssub.s32 %s3182_s11, %s3255_s13  ;;  %s28_s15 = sadd.s32 1, %s3178_s10 }
   0x4   : > { %p26_p0 = scmp.eq.s32.totalorder %s25_s14, 0  ;;  %p35_p1 = scmp.ne.s32.totalorder %s3178_s10, %s3174_s30 }
   0x5   : > { %p36_p2 = scmp.eq.s32.totalorder %s3182_s11, 0  ;;  %p1844_p4 = scmp.ge.s32.totalorder %s3182_s11, 2 }
   0x6   : > { %s3264_s16 = scalar_select %p26_p0, %s3178_s10, %s28_s15  }
   0x7   : > { %p37_p3 = por %p36_p2, %p35_p1  ;;  %270 = sbr.rel (%p1844_p4) target bundleno = 33 (0x21), region = 36 }
   0xe   : > { %273 = sbr.rel (!%p37_p3) target bundleno = 33 (0x21), region = 40  ;;  %s275_s17 = sand.u32 (%p37_p3), 1, %s3178_s10  }
   0xf   : > { %s1857_s18 = smul.u32 (%p37_p3), 112, %s3182_s11 }
  0x10   : > { %s3076_s19 = smul.u32 (%p37_p3), 224, %s275_s17 }
  0x11   : > { %s3272_s22 = scalar_lea.vmem (%p37_p3), %s3680_s0, %s1857_s18 }
  0x12   : > { %v293_v0 = vld [vmem:[%s3272_s22] sm:$0xff] (%p37_p3)  ;;  %v295_v1 = vld [vmem:[%s3272_s22 + $0x8] sm:$0xff] (%p37_p3)  ;;  %v297_v2 = vld [vmem:[%s3272_s22 + $0x10] sm:$0xff] (%p37_p3)  ;;  %s3277_s23 = scalar_lea.vmem (%p37_p3), [#allocation3], %s3076_s19 }
  0x13   : > { %294 = vst [vmem:[%s3277_s23] sm:$0xff] (%p37_p3), %v293_v0  ;;  %296 = vst [vmem:[%s3277_s23 + $0x8] sm:$0xff] (%p37_p3), %v295_v1  ;;  %v299_v3 = vld [vmem:[%s3272_s22 + $0x18] sm:$0xff] (%p37_p3)  ;;  %v301_v4 = vld [vmem:[%s3272_s22 + $0x20] sm:$0xff] (%p37_p3) }
  0x14   : > { %298 = vst [vmem:[%s3277_s23 + $0x10] sm:$0xff] (%p37_p3), %v297_v2  ;;  %v303_v5 = vld [vmem:[%s3272_s22 + $0x28] sm:$0xff] (%p37_p3)  ;;  %300 = vst [vmem:[%s3277_s23 + $0x18] sm:$0xff] (%p37_p3), %v299_v3  ;;  %v305_v6 = vld [vmem:[%s3272_s22 + $0x30] sm:$0xff] (%p37_p3) }
  0x15   : > { %302 = vst [vmem:[%s3277_s23 + $0x20] sm:$0xff] %v301_v4  ;;  %304 = vst [vmem:[%s3277_s23 + $0x28] sm:$0xff] %v303_v5  ;;  %v307_v7 = vld [vmem:[%s3272_s22 + $0x38] sm:$0xff]  ;;  %v309_v8 = vld [vmem:[%s3272_s22 + $0x40] sm:$0xff] }
  0x16   : > { %306 = vst [vmem:[%s3277_s23 + $0x30] sm:$0xff] %v305_v6  ;;  %308 = vst [vmem:[%s3277_s23 + $0x38] sm:$0xff] %v307_v7  ;;  %v311_v9 = vld [vmem:[%s3272_s22 + $0x48] sm:$0xff]  ;;  %v313_v10 = vld [vmem:[%s3272_s22 + $0x50] sm:$0xff] }
  0x17   : > { %310 = vst [vmem:[%s3277_s23 + $0x40] sm:$0xff] %v309_v8  ;;  %v315_v11 = vld [vmem:[%s3272_s22 + $0x58] sm:$0xff]  ;;  %312 = vst [vmem:[%s3277_s23 + $0x48] sm:$0xff] %v311_v9  ;;  %v317_v12 = vld [vmem:[%s3272_s22 + $0x60] sm:$0xff] }
  0x18   : > { %314 = vst [vmem:[%s3277_s23 + $0x50] sm:$0xff] %v313_v10  ;;  %316 = vst [vmem:[%s3277_s23 + $0x58] sm:$0xff] %v315_v11  ;;  %v319_v13 = vld [vmem:[%s3272_s22 + $0x68] sm:$0xff]  ;;  %v321_v14 = vld [vmem:[%s3272_s22 + $0xe0] sm:$0xff] }
  0x19   : > { %318 = vst [vmem:[%s3277_s23 + $0x60] sm:$0xff] %v317_v12  ;;  %320 = vst [vmem:[%s3277_s23 + $0x68] sm:$0xff] %v319_v13  ;;  %v323_v15 = vld [vmem:[%s3272_s22 + $0xe8] sm:$0xff]  ;;  %v325_v16 = vld [vmem:[%s3272_s22 + $0xf0] sm:$0xff] }
  0x1a   : > { %322 = vst [vmem:[%s3277_s23 + $0x70] sm:$0xff] %v321_v14  ;;  %v327_v17 = vld [vmem:[%s3272_s22 + $0xf8] sm:$0xff]  ;;  %324 = vst [vmem:[%s3277_s23 + $0x78] sm:$0xff] %v323_v15  ;;  %v329_v18 = vld [vmem:[%s3272_s22 + $0x100] sm:$0xff] }
  0x1b   : > { %326 = vst [vmem:[%s3277_s23 + $0x80] sm:$0xff] %v325_v16  ;;  %328 = vst [vmem:[%s3277_s23 + $0x88] sm:$0xff] %v327_v17  ;;  %v331_v19 = vld [vmem:[%s3272_s22 + $0x108] sm:$0xff]  ;;  %v333_v20 = vld [vmem:[%s3272_s22 + $0x110] sm:$0xff] }
  0x1c   : > { %330 = vst [vmem:[%s3277_s23 + $0x90] sm:$0xff] %v329_v18  ;;  %332 = vst [vmem:[%s3277_s23 + $0x98] sm:$0xff] %v331_v19  ;;  %v335_v21 = vld [vmem:[%s3272_s22 + $0x118] sm:$0xff]  ;;  %v337_v22 = vld [vmem:[%s3272_s22 + $0x120] sm:$0xff] }
  0x1d   : > { %334 = vst [vmem:[%s3277_s23 + $0xa0] sm:$0xff] %v333_v20  ;;  %v339_v23 = vld [vmem:[%s3272_s22 + $0x128] sm:$0xff]  ;;  %336 = vst [vmem:[%s3277_s23 + $0xa8] sm:$0xff] %v335_v21  ;;  %v341_v24 = vld [vmem:[%s3272_s22 + $0x130] sm:$0xff] }
  0x1e   : > { %338 = vst [vmem:[%s3277_s23 + $0xb0] sm:$0xff] %v337_v22  ;;  %340 = vst [vmem:[%s3277_s23 + $0xb8] sm:$0xff] %v339_v23  ;;  %v343_v25 = vld [vmem:[%s3272_s22 + $0x138] sm:$0xff]  ;;  %v345_v26 = vld [vmem:[%s3272_s22 + $0x140] sm:$0xff] }
  0x1f   : > { %342 = vst [vmem:[%s3277_s23 + $0xc0] sm:$0xff] %v341_v24  ;;  %344 = vst [vmem:[%s3277_s23 + $0xc8] sm:$0xff] %v343_v25  ;;  %v347_v27 = vld [vmem:[%s3272_s22 + $0x148] sm:$0xff] }
  0x20   : > { %346 = vst [vmem:[%s3277_s23 + $0xd0] sm:$0xff] %v345_v26  ;;  %348 = vst [vmem:[%s3277_s23 + $0xd8] sm:$0xff] %v347_v27 }
  0x21 PF: > { %p1846_p5 = scmp.ge.s32.totalorder %s3182_s11, 1  ;;  %p362_p6 = scmp.lt.s32.totalorder %s3182_s11, 3 }
  0x23   : > { %p363_p7 = pnand %p1846_p5, %p362_p6 }
  0x24   : > { %s369_s24 = sand.u32 (!%p363_p7), 1, %s3174_s30   ;;  %s405_s25 = smul.u32 (!%p363_p7), 224, %s3252_s12 }
  0x25   : > { %366 = sbr.rel (%p363_p7) target bundleno = 1400 (0x578), region = 67  ;;  %p1848_p9 = scmp.ne.s32.totalorder (!%p363_p7), %s3252_s12, 0 }
  0x26   : > { %s3077_s26 = smul.u32 (!%p363_p7), 224, %s369_s24  ;;  %p406_p8 = scmp.lt.s32.totalorder (!%p363_p7), %s405_s25, 447 }
  0x28   : > { %s3341_s15 = scalar_lea.vmem (!%p363_p7), [#allocation3], %s3077_s26 }
  0x2c   : > { %s3694_s25 = smov (!%p406_p8, %s405_s25), 447  ;;  %414 = sbr.rel (%p1848_p9) target bundleno = 51 (0x33), region = 75 }
  0x2d   : > { %s1847_s27 = sshll.u32 %s3694_s25, 2  ;;  %v3184_v28 = vmov (!%p1848_p9), 0.0  }
  0x2e   : > { %s3339_s14 = scalar_lea.vmem %s3681_s1, %s1847_s27  ;;  %415 = vst [vmem:[#allocation2] sm:$0xff] (!%p1848_p9), %v3184_v28  ;;  %416 = vst [vmem:[#allocation2 + $0x8] sm:$0xff] (!%p1848_p9), %v3184_v28 }
  0x33 PF: > { %v2313_v29 = vld [vmem:[%s3339_s14 + $0x40] sm:$0xff]   ;;  %v2314_v33 = vld [vmem:[%s3339_s14 + $0x48] sm:$0xff]   ;;  %v2315_v37 = vld [vmem:[%s3339_s14 + $0x50] sm:$0xff]   ;;  %p1849_p10 = scmp.ne.s32.totalorder %s3252_s12, 1 }
  0x34   : > { %v2329_v30 = vld [vmem:[%s3339_s14 + $0xc0] sm:$0xff]   ;;  %2773 = vmatprep.subr.bf16.mxu0 %v2313_v29  ;;  %v2330_v34 = vld [vmem:[%s3339_s14 + $0xc8] sm:$0xff]   ;;  %v2331_v38 = vld [vmem:[%s3339_s14 + $0xd0] sm:$0xff]  }
  0x35   : > { %v1859_v31 = vld [vmem:[%s3339_s14] sm:$0xff]   ;;  %2805 = vmatprep.subr.bf16.mxu1 %v2329_v30  ;;  %v2306_v35 = vld [vmem:[%s3339_s14 + $0x8] sm:$0xff]   ;;  %v2307_v39 = vld [vmem:[%s3339_s14 + $0x10] sm:$0xff]  }
  0x36   : > { %v2321_v32 = vld [vmem:[%s3339_s14 + $0x80] sm:$0xff]   ;;  %2775 = vmatpush3.bf16.msra.mxu0 %v1859_v31  ;;  %v2322_v36 = vld [vmem:[%s3339_s14 + $0x88] sm:$0xff]   ;;  %v2323_v40 = vld [vmem:[%s3339_s14 + $0x90] sm:$0xff]  }
  0x37   : > { %2807 = vmatpush3.bf16.msra.mxu1 %v2321_v32  ;;  %2777 = vmatprep.subr.bf16.mxu0 %v2314_v33  ;;  %v2316_v41 = vld [vmem:[%s3339_s14 + $0x58] sm:$0xff]   ;;  %v422_v46 = vld [vmem:[%s3341_s15 + $0x18] sm:$0xff]  ;;  %v2317_v47 = vld [vmem:[%s3339_s14 + $0x60] sm:$0xff]  }
  0x38   : > { %2809 = vmatprep.subr.bf16.mxu1 %v2330_v34  ;;  %v2332_v42 = vld [vmem:[%s3339_s14 + $0xd8] sm:$0xff]   ;;  %v2333_v48 = vld [vmem:[%s3339_s14 + $0xe0] sm:$0xff]   ;;  %1034 = vmatprep.mubr.f32.mxu1 %v422_v46  ;;  %v2318_v51 = vld [vmem:[%s3339_s14 + $0x68] sm:$0xff]  }
  0x39   : > { %v420_v43 = vld [vmem:[%s3341_s15 + $0x8] sm:$0xff]  ;;  %v2309_v49 = vld [vmem:[%s3339_s14 + $0x20] sm:$0xff]   ;;  %v2334_v52 = vld [vmem:[%s3339_s14 + $0xe8] sm:$0xff]  }
  0x3a   : > { %2779 = vmatpush3.bf16.msra.mxu0 %v2306_v35  ;;  %v2308_v44 = vld [vmem:[%s3339_s14 + $0x18] sm:$0xff]   ;;  %959 = vmatprep.mubr.f32.mxu0 %v420_v43  ;;  %v2325_v50 = vld [vmem:[%s3339_s14 + $0xa0] sm:$0xff]   ;;  %v2310_v53 = vld [vmem:[%s3339_s14 + $0x28] sm:$0xff]  }
  0x3b   : > { %2811 = vmatpush3.bf16.msra.mxu1 %v2322_v36  ;;  %2781 = vmatprep.subr.bf16.mxu0 %v2315_v37  ;;  %v2324_v45 = vld [vmem:[%s3339_s14 + $0x98] sm:$0xff]   ;;  %v2326_v54 = vld [vmem:[%s3339_s14 + $0xa8] sm:$0xff]   ;;  %v2319_v55 = vld [vmem:[%s3339_s14 + $0x70] sm:$0xff]  }
  0x3c   : > { %2813 = vmatprep.subr.bf16.mxu1 %v2331_v38  ;;  %v2335_v56 = vld [vmem:[%s3339_s14 + $0xf0] sm:$0xff]   ;;  %v2320_v59 = vld [vmem:[%s3339_s14 + $0x78] sm:$0xff]   ;;  %v2345_v63 = vld [vmem:[%s3339_s14 + $0x140] sm:$0xff]  }
  0x3d   : > { %v2311_v57 = vld [vmem:[%s3339_s14 + $0x30] sm:$0xff]   ;;  %v2336_v60 = vld [vmem:[%s3339_s14 + $0xf8] sm:$0xff]   ;;  %v2361_v0 = vld [vmem:[%s3339_s14 + $0x1c0] sm:$0xff]  }
  0x3e   : > { %2783 = vmatpush3.bf16.msra.mxu0 %v2307_v39  ;;  %v2327_v58 = vld [vmem:[%s3339_s14 + $0xb0] sm:$0xff]   ;;  %v2312_v61 = vld [vmem:[%s3339_s14 + $0x38] sm:$0xff]   ;;  %v421_v2 = vld [vmem:[%s3341_s15 + $0x10] sm:$0xff] }
  0x3f   : > { %2815 = vmatpush3.bf16.msra.mxu1 %v2323_v40  ;;  %2785 = vmatprep.subr.bf16.mxu0 %v2316_v41  ;;  %v2328_v62 = vld [vmem:[%s3339_s14 + $0xb8] sm:$0xff]   ;;  %v419_v1 = vld [vmem:[%s3341_s15] sm:$0xff]  ;;  %v2337_v3 = vld [vmem:[%s3339_s14 + $0x100] sm:$0xff]  }
  0x40   : > { %2817 = vmatprep.subr.bf16.mxu1 %v2332_v42  ;;  %v2353_v4 = vld [vmem:[%s3339_s14 + $0x180] sm:$0xff]   ;;  %v2346_v5 = vld [vmem:[%s3339_s14 + $0x148] sm:$0xff]   ;;  %v436_v8 = vld [vmem:[%s3341_s15 + $0x88] sm:$0xff] }
  0x41   : > { %v2362_v6 = vld [vmem:[%s3339_s14 + $0x1c8] sm:$0xff]   ;;  %v433_v9 = vld [vmem:[%s3341_s15 + $0x70] sm:$0xff]  ;;  %v435_v10 = vld [vmem:[%s3341_s15 + $0x80] sm:$0xff] }
  0x42   : > { %2787 = vmatpush3.bf16.msra.mxu0 %v2308_v44  ;;  %v434_v7 = vld [vmem:[%s3341_s15 + $0x78] sm:$0xff]  ;;  %v2347_v13 = vld [vmem:[%s3339_s14 + $0x150] sm:$0xff]   ;;  %v424_v15 = vld [vmem:[%s3341_s15 + $0x28] sm:$0xff] }
  0x43   : > { %2819 = vmatpush3.bf16.msra.mxu1 %v2324_v45  ;;  %2789 = vmatprep.subr.bf16.mxu0 %v2317_v47  ;;  %v2338_v11 = vld [vmem:[%s3339_s14 + $0x108] sm:$0xff]   ;;  %v2363_v14 = vld [vmem:[%s3339_s14 + $0x1d0] sm:$0xff]   ;;  %v2348_v19 = vld [vmem:[%s3339_s14 + $0x158] sm:$0xff]  }
  0x44   : > { %2821 = vmatprep.subr.bf16.mxu1 %v2333_v48  ;;  %v2354_v12 = vld [vmem:[%s3339_s14 + $0x188] sm:$0xff]   ;;  %v2339_v17 = vld [vmem:[%s3339_s14 + $0x110] sm:$0xff]   ;;  %v2364_v20 = vld [vmem:[%s3339_s14 + $0x1d8] sm:$0xff]  }
  0x45   : > { %v426_v16 = vld [vmem:[%s3341_s15 + $0x38] sm:$0xff]  ;;  %v2355_v18 = vld [vmem:[%s3339_s14 + $0x190] sm:$0xff]   ;;  %v2340_v21 = vld [vmem:[%s3339_s14 + $0x118] sm:$0xff]  }
  0x46   : > { %2791 = vmatpush3.bf16.msra.mxu0 %v2309_v49  ;;  %v2356_v22 = vld [vmem:[%s3339_s14 + $0x198] sm:$0xff]   ;;  %v2349_v23 = vld [vmem:[%s3339_s14 + $0x160] sm:$0xff]   ;;  %v2350_v27 = vld [vmem:[%s3339_s14 + $0x168] sm:$0xff]  }
  0x47   : > { %2823 = vmatpush3.bf16.msra.mxu1 %v2325_v50  ;;  %2793 = vmatprep.subr.bf16.mxu0 %v2318_v51  ;;  %v2365_v24 = vld [vmem:[%s3339_s14 + $0x1e0] sm:$0xff]   ;;  %v2366_v28 = vld [vmem:[%s3339_s14 + $0x1e8] sm:$0xff]   ;;  %v2351_v31 = vld [vmem:[%s3339_s14 + $0x170] sm:$0xff]  }
  0x48   : > { %2825 = vmatprep.subr.bf16.mxu1 %v2334_v52  ;;  %v2341_v25 = vld [vmem:[%s3339_s14 + $0x120] sm:$0xff]   ;;  %v2342_v29 = vld [vmem:[%s3339_s14 + $0x128] sm:$0xff]   ;;  %v2367_v32 = vld [vmem:[%s3339_s14 + $0x1f0] sm:$0xff]  }
  0x49   : > { %v2357_v26 = vld [vmem:[%s3339_s14 + $0x1a0] sm:$0xff]   ;;  %v2358_v30 = vld [vmem:[%s3339_s14 + $0x1a8] sm:$0xff]   ;;  %v2343_v33 = vld [vmem:[%s3339_s14 + $0x130] sm:$0xff]  }
  0x4a   : > { %2795 = vmatpush3.bf16.msra.mxu0 %v2310_v53  ;;  %v2359_v34 = vld [vmem:[%s3339_s14 + $0x1b0] sm:$0xff]   ;;  %v2352_v35 = vld [vmem:[%s3339_s14 + $0x178] sm:$0xff]   ;;  %v2377_v39 = vld [vmem:[%s3339_s14 + $0x240] sm:$0xff]  }
  0x4b   : > { %2827 = vmatpush3.bf16.msra.mxu1 %v2326_v54  ;;  %2797 = vmatprep.subr.bf16.mxu0 %v2319_v55  ;;  %v2368_v36 = vld [vmem:[%s3339_s14 + $0x1f8] sm:$0xff]   ;;  %v2393_v40 = vld [vmem:[%s3339_s14 + $0x2c0] sm:$0xff]   ;;  %v423_v41 = vld [vmem:[%s3341_s15 + $0x20] sm:$0xff] }
  0x4c   : > { %2829 = vmatprep.subr.bf16.mxu1 %v2335_v56  ;;  %v2344_v37 = vld [vmem:[%s3339_s14 + $0x138] sm:$0xff]   ;;  %v425_v42 = vld [vmem:[%s3341_s15 + $0x30] sm:$0xff]  ;;  %v438_v45 = vld [vmem:[%s3341_s15 + $0x98] sm:$0xff] }
  0x4d   : > { %v2360_v38 = vld [vmem:[%s3339_s14 + $0x1b8] sm:$0xff]   ;;  %v2369_v43 = vld [vmem:[%s3339_s14 + $0x200] sm:$0xff]   ;;  %v2378_v46 = vld [vmem:[%s3339_s14 + $0x248] sm:$0xff]  }
  0x4e   : > { %2799 = vmatpush3.bf16.msra.mxu0 %v2311_v57  ;;  %v2385_v44 = vld [vmem:[%s3339_s14 + $0x280] sm:$0xff]   ;;  %v2394_v47 = vld [vmem:[%s3339_s14 + $0x2c8] sm:$0xff]   ;;  %v440_v48 = vld [vmem:[%s3341_s15 + $0xa8] sm:$0xff] }
  0x4f   : > { %2831 = vmatpush3.bf16.msra.mxu1 %v2327_v58  ;;  %2801 = vmatprep.subr.bf16.mxu0 %v2320_v59  ;;  %v437_v49 = vld [vmem:[%s3341_s15 + $0x90] sm:$0xff]  ;;  %v439_v50 = vld [vmem:[%s3341_s15 + $0xa0] sm:$0xff]  ;;  %v2370_v51 = vld [vmem:[%s3339_s14 + $0x208] sm:$0xff]  }
  0x50   : > { %2833 = vmatprep.subr.bf16.mxu1 %v2336_v60  ;;  %v2386_v52 = vld [vmem:[%s3339_s14 + $0x288] sm:$0xff]   ;;  %v2379_v53 = vld [vmem:[%s3339_s14 + $0x250] sm:$0xff]   ;;  %v428_v55 = vld [vmem:[%s3341_s15 + $0x48] sm:$0xff] }
  0x51   : > { %v2395_v54 = vld [vmem:[%s3339_s14 + $0x2d0] sm:$0xff]   ;;  %v430_v56 = vld [vmem:[%s3341_s15 + $0x58] sm:$0xff]  ;;  %v2380_v59 = vld [vmem:[%s3339_s14 + $0x258] sm:$0xff]  }
  0x52   : > { %2803 = vmatpush3.bf16.msra.mxu0 %v2312_v61  ;;  %v2371_v57 = vld [vmem:[%s3339_s14 + $0x210] sm:$0xff]   ;;  %v2396_v60 = vld [vmem:[%s3339_s14 + $0x2d8] sm:$0xff]  }
  0x53   : > { %2835 = vmatpush3.bf16.msra.mxu1 %v2328_v62  ;;  %2837 = vmatprep.subr.bf16.mxu0 %v2345_v63  ;;  %v2387_v58 = vld [vmem:[%s3339_s14 + $0x290] sm:$0xff]   ;;  %v2372_v61 = vld [vmem:[%s3339_s14 + $0x218] sm:$0xff]   ;;  %v2381_v63 = vld [vmem:[%s3339_s14 + $0x260] sm:$0xff]  }
  0x54   : > { %2869 = vmatprep.subr.bf16.mxu1 %v2361_v0  ;;  %v2388_v62 = vld [vmem:[%s3339_s14 + $0x298] sm:$0xff]   ;;  %v2397_v0 = vld [vmem:[%s3339_s14 + $0x2e0] sm:$0xff]  }
  0x55   : > { %960 = vmatmul.mubr.f32.vlgmr.msra.gmra.mrb[0].mxu0 %v419_v1  ;;  %v2373_v1 = vld [vmem:[%s3339_s14 + $0x220] sm:$0xff]  }
  0x56   : > { %1035 = vmatmul.mubr.f32.vlgmr.msra.gmra.mrb[0].mxu1 %v421_v2  ;;  %2839 = vmatpush3.bf16.msra.mxu0 %v2337_v3  ;;  %v2389_v2 = vld [vmem:[%s3339_s14 + $0x2a0] sm:$0xff]   ;;  %v2382_v3 = vld [vmem:[%s3339_s14 + $0x268] sm:$0xff]  }
  0x57   : > { %2871 = vmatpush3.bf16.msra.mxu1 %v2353_v4  ;;  %2841 = vmatprep.subr.bf16.mxu0 %v2346_v5  ;;  %v2398_v4 = vld [vmem:[%s3339_s14 + $0x2e8] sm:$0xff]  }
  0x58   : > { %2873 = vmatprep.subr.bf16.mxu1 %v2362_v6  ;;  %964 = vmatprep.mubr.f32.mxu0 %v434_v7  ;;  %v2374_v5 = vld [vmem:[%s3339_s14 + $0x228] sm:$0xff]   ;;  %v2383_v7 = vld [vmem:[%s3339_s14 + $0x270] sm:$0xff]  }
  0x59   : > { %1039 = vmatprep.mubr.f32.mxu1 %v436_v8  ;;  %965 = vmatmul.mubr.f32.gmra.mrb[2].mxu0 %v433_v9  ;;  %v2390_v6 = vld [vmem:[%s3339_s14 + $0x2a8] sm:$0xff]   ;;  %v2399_v8 = vld [vmem:[%s3339_s14 + $0x2f0] sm:$0xff]  }
  0x5a   : > { %1040 = vmatmul.mubr.f32.gmra.mrb[2].mxu1 %v435_v10  ;;  %2843 = vmatpush3.bf16.msra.mxu0 %v2338_v11  ;;  %v2375_v9 = vld [vmem:[%s3339_s14 + $0x230] sm:$0xff]   ;;  %v2384_v11 = vld [vmem:[%s3339_s14 + $0x278] sm:$0xff]  }
  0x5b   : > { %2875 = vmatpush3.bf16.msra.mxu1 %v2354_v12  ;;  %2845 = vmatprep.subr.bf16.mxu0 %v2347_v13  ;;  %v2391_v10 = vld [vmem:[%s3339_s14 + $0x2b0] sm:$0xff]   ;;  %v2400_v12 = vld [vmem:[%s3339_s14 + $0x2f8] sm:$0xff]  }
  0x5c   : > { %2877 = vmatprep.subr.bf16.mxu1 %v2363_v14  ;;  %1109 = vmatprep.mubr.f32.mxu0 %v424_v15  ;;  %v2376_v13 = vld [vmem:[%s3339_s14 + $0x238] sm:$0xff]   ;;  %v2409_v15 = vld [vmem:[%s3339_s14 + $0x340] sm:$0xff]  }
  0x5d   : > { %1184 = vmatprep.mubr.f32.mxu1 %v426_v16  ;;  %v2392_v14 = vld [vmem:[%s3339_s14 + $0x2b8] sm:$0xff]   ;;  %v427_v16 = vld [vmem:[%s3341_s15 + $0x40] sm:$0xff] }
  0x5e   : > { %2847 = vmatpush3.bf16.msra.mxu0 %v2339_v17  ;;  %v429_v17 = vld [vmem:[%s3341_s15 + $0x50] sm:$0xff] }
  0x5f   : > { %2879 = vmatpush3.bf16.msra.mxu1 %v2355_v18  ;;  %2849 = vmatprep.subr.bf16.mxu0 %v2348_v19  ;;  %v2401_v18 = vld [vmem:[%s3339_s14 + $0x300] sm:$0xff]   ;;  %v442_v19 = vld [vmem:[%s3341_s15 + $0xb8] sm:$0xff] }
  0x60   : > { %2881 = vmatprep.subr.bf16.mxu1 %v2364_v20  ;;  %v2410_v20 = vld [vmem:[%s3339_s14 + $0x348] sm:$0xff]  }
  0x62   : > { %2851 = vmatpush3.bf16.msra.mxu0 %v2340_v21  ;;  %v444_v21 = vld [vmem:[%s3341_s15 + $0xc8] sm:$0xff] }
  0x63   : > { %2883 = vmatpush3.bf16.msra.mxu1 %v2356_v22  ;;  %2853 = vmatprep.subr.bf16.mxu0 %v2349_v23  ;;  %v441_v22 = vld [vmem:[%s3341_s15 + $0xb0] sm:$0xff]  ;;  %v443_v23 = vld [vmem:[%s3341_s15 + $0xc0] sm:$0xff] }
  0x64   : > { %2885 = vmatprep.subr.bf16.mxu1 %v2365_v24  ;;  %v2402_v24 = vld [vmem:[%s3339_s14 + $0x308] sm:$0xff]  }
  0x66   : > { %2855 = vmatpush3.bf16.msra.mxu0 %v2341_v25  ;;  %v2411_v25 = vld [vmem:[%s3339_s14 + $0x350] sm:$0xff]  }
  0x67   : > { %2887 = vmatpush3.bf16.msra.mxu1 %v2357_v26  ;;  %2857 = vmatprep.subr.bf16.mxu0 %v2350_v27  ;;  %v432_v26 = vld [vmem:[%s3341_s15 + $0x68] sm:$0xff]  ;;  %v446_v27 = vld [vmem:[%s3341_s15 + $0xd8] sm:$0xff] }
  0x68   : > { %2889 = vmatprep.subr.bf16.mxu1 %v2366_v28  ;;  %v2403_v28 = vld [vmem:[%s3339_s14 + $0x310] sm:$0xff]  }
  0x6a   : > { %2859 = vmatpush3.bf16.msra.mxu0 %v2342_v29  ;;  %v2412_v29 = vld [vmem:[%s3339_s14 + $0x358] sm:$0xff]  }
  0x6b   : > { %2891 = vmatpush3.bf16.msra.mxu1 %v2358_v30  ;;  %2861 = vmatprep.subr.bf16.mxu0 %v2351_v31  ;;  %v2404_v30 = vld [vmem:[%s3339_s14 + $0x318] sm:$0xff]   ;;  %v2413_v31 = vld [vmem:[%s3339_s14 + $0x360] sm:$0xff]  }
  0x6c   : > { %2893 = vmatprep.subr.bf16.mxu1 %v2367_v32  ;;  %v2405_v32 = vld [vmem:[%s3339_s14 + $0x320] sm:$0xff]  }
  0x6e   : > { %2863 = vmatpush3.bf16.msra.mxu0 %v2343_v33  ;;  %v2414_v33 = vld [vmem:[%s3339_s14 + $0x368] sm:$0xff]  }
  0x6f   : > { %2895 = vmatpush3.bf16.msra.mxu1 %v2359_v34  ;;  %2865 = vmatprep.subr.bf16.mxu0 %v2352_v35  ;;  %v2406_v34 = vld [vmem:[%s3339_s14 + $0x328] sm:$0xff]   ;;  %v2415_v35 = vld [vmem:[%s3339_s14 + $0x370] sm:$0xff]  }
  0x70   : > { %2897 = vmatprep.subr.bf16.mxu1 %v2368_v36  ;;  %v2407_v36 = vld [vmem:[%s3339_s14 + $0x330] sm:$0xff]  }
  0x72   : > { %2867 = vmatpush3.bf16.msra.mxu0 %v2344_v37  ;;  %v2416_v37 = vld [vmem:[%s3339_s14 + $0x378] sm:$0xff]  }
  0x73   : > { %2899 = vmatpush3.bf16.msra.mxu1 %v2360_v38  ;;  %2901 = vmatprep.subr.bf16.mxu0 %v2377_v39  ;;  %v2408_v38 = vld [vmem:[%s3339_s14 + $0x338] sm:$0xff]   ;;  %v431_v39 = vld [vmem:[%s3341_s15 + $0x60] sm:$0xff] }
  0x74   : > { %2933 = vmatprep.subr.bf16.mxu1 %v2393_v40  ;;  %v445_v40 = vld [vmem:[%s3341_s15 + $0xd0] sm:$0xff] }
  0x75   : > { %1110 = vmatmul.mubr.f32.vlgmr.msra.gmra.mrb[4].mxu0 %v423_v41 }
  0x76   : > { %1185 = vmatmul.mubr.f32.vlgmr.msra.gmra.mrb[4].mxu1 %v425_v42  ;;  %2903 = vmatpush3.bf16.msra.mxu0 %v2369_v43 }
  0x77   : > { %2935 = vmatpush3.bf16.msra.mxu1 %v2385_v44  ;;  %1114 = vmatprep.mubr.f32.mxu0 %v438_v45 }
  0x78   : > { %2905 = vmatprep.subr.bf16.mxu0 %v2378_v46  ;;  %2937 = vmatprep.subr.bf16.mxu1 %v2394_v47 }
  0x79   : > { %1189 = vmatprep.mubr.f32.mxu1 %v440_v48  ;;  %1115 = vmatmul.mubr.f32.gmra.mrb[6].mxu0 %v437_v49 }
  0x7a   : > { %1190 = vmatmul.mubr.f32.gmra.mrb[6].mxu1 %v439_v50  ;;  %2907 = vmatpush3.bf16.msra.mxu0 %v2370_v51 }
  0x7b   : > { %2939 = vmatpush3.bf16.msra.mxu1 %v2386_v52  ;;  %2909 = vmatprep.subr.bf16.mxu0 %v2379_v53 }
  0x7c   : > { %2941 = vmatprep.subr.bf16.mxu1 %v2395_v54  ;;  %1259 = vmatprep.mubr.f32.mxu0 %v428_v55 }
  0x7d   : > { %1334 = vmatprep.mubr.f32.mxu1 %v430_v56 }
  0x7e   : > { %2911 = vmatpush3.bf16.msra.mxu0 %v2371_v57 }
  0x7f   : > { %2943 = vmatpush3.bf16.msra.mxu1 %v2387_v58  ;;  %2913 = vmatprep.subr.bf16.mxu0 %v2380_v59 }
  0x80   : > { %2945 = vmatprep.subr.bf16.mxu1 %v2396_v60 }
  0x82   : > { %2915 = vmatpush3.bf16.msra.mxu0 %v2372_v61 }
  0x83   : > { %2947 = vmatpush3.bf16.msra.mxu1 %v2388_v62  ;;  %2917 = vmatprep.subr.bf16.mxu0 %v2381_v63 }
  0x84   : > { %2949 = vmatprep.subr.bf16.mxu1 %v2397_v0 }
  0x86   : > { %2919 = vmatpush3.bf16.msra.mxu0 %v2373_v1 }
  0x87   : > { %2951 = vmatpush3.bf16.msra.mxu1 %v2389_v2  ;;  %2921 = vmatprep.subr.bf16.mxu0 %v2382_v3 }
  0x88   : > { %2953 = vmatprep.subr.bf16.mxu1 %v2398_v4 }
  0x8a   : > { %2923 = vmatpush3.bf16.msra.mxu0 %v2374_v5 }
  0x8b   : > { %2955 = vmatpush3.bf16.msra.mxu1 %v2390_v6  ;;  %2925 = vmatprep.subr.bf16.mxu0 %v2383_v7 }
  0x8c   : > { %2957 = vmatprep.subr.bf16.mxu1 %v2399_v8 }
  0x8e   : > { %2927 = vmatpush3.bf16.msra.mxu0 %v2375_v9 }
  0x8f   : > { %2959 = vmatpush3.bf16.msra.mxu1 %v2391_v10  ;;  %2929 = vmatprep.subr.bf16.mxu0 %v2384_v11 }
  0x90   : > { %2961 = vmatprep.subr.bf16.mxu1 %v2400_v12 }
  0x92   : > { %2931 = vmatpush3.bf16.msra.mxu0 %v2376_v13 }
  0x93   : > { %2963 = vmatpush3.bf16.msra.mxu1 %v2392_v14  ;;  %2965 = vmatprep.subr.bf16.mxu0 %v2409_v15 }
  0x94   : > { %3060 = vmatprep.subr.bf16.mxu1 %v2409_v15 }
  0x95   : > { %1260 = vmatmul.mubr.f32.vlgmr.msra.gmra.mrb[8].mxu0 %v427_v16 }
  0x96   : > { %1335 = vmatmul.mubr.f32.vlgmr.msra.gmra.mrb[8].mxu1 %v429_v17  ;;  %2967 = vmatpush3.bf16.msra.mxu0 %v2401_v18 }
  0x97   : > { %3068 = vmatpush3.bf16.msra.mxu1 %v2401_v18  ;;  %1264 = vmatprep.mubr.f32.mxu0 %v442_v19 }
  0x98   : > { %2969 = vmatprep.subr.bf16.mxu0 %v2410_v20  ;;  %3061 = vmatprep.subr.bf16.mxu1 %v2410_v20 }
  0x99   : > { %1339 = vmatprep.mubr.f32.mxu1 %v444_v21  ;;  %1265 = vmatmul.mubr.f32.gmra.mrb[10].mxu0 %v441_v22 }
  0x9a   : > { %1340 = vmatmul.mubr.f32.gmra.mrb[10].mxu1 %v443_v23  ;;  %2971 = vmatpush3.bf16.msra.mxu0 %v2402_v24 }
  0x9b   : > { %3069 = vmatpush3.bf16.msra.mxu1 %v2402_v24  ;;  %2973 = vmatprep.subr.bf16.mxu0 %v2411_v25 }
  0x9c   : > { %3062 = vmatprep.subr.bf16.mxu1 %v2411_v25  ;;  %1409 = vmatprep.mubr.f32.mxu0 %v432_v26 }
  0x9d   : > { %1414 = vmatprep.mubr.f32.mxu1 %v446_v27 }
  0x9e   : > { %2975 = vmatpush3.bf16.msra.mxu0 %v2403_v28 }
  0x9f   : > { %3070 = vmatpush3.bf16.msra.mxu1 %v2403_v28  ;;  %2977 = vmatprep.subr.bf16.mxu0 %v2412_v29 }
  0xa0   : > { %3063 = vmatprep.subr.bf16.mxu1 %v2412_v29  ;;  %v417_v29 = vld [vmem:[#allocation2] sm:$0xff] }
  0xa2   : > { %2979 = vmatpush3.bf16.msra.mxu0 %v2404_v30 }
  0xa3   : > { %3071 = vmatpush3.bf16.msra.mxu1 %v2404_v30  ;;  %2981 = vmatprep.subr.bf16.mxu0 %v2413_v31  ;;  %v418_v30 = vld [vmem:[#allocation2 + $0x8] sm:$0xff] }
  0xa4   : > { %3064 = vmatprep.subr.bf16.mxu1 %v2413_v31 }
  0xa6   : > { %2983 = vmatpush3.bf16.msra.mxu0 %v2405_v32 }
  0xa7   : > { %3072 = vmatpush3.bf16.msra.mxu1 %v2405_v32  ;;  %2985 = vmatprep.subr.bf16.mxu0 %v2414_v33 }
  0xa8   : > { %3065 = vmatprep.subr.bf16.mxu1 %v2414_v33 }
  0xaa   : > { %2987 = vmatpush3.bf16.msra.mxu0 %v2406_v34 }
  0xab   : > { %3073 = vmatpush3.bf16.msra.mxu1 %v2406_v34  ;;  %2989 = vmatprep.subr.bf16.mxu0 %v2415_v35 }
  0xac   : > { %3066 = vmatprep.subr.bf16.mxu1 %v2415_v35  ;;  %v1504_v35 = vld [vmem:[%s3684_s4] sm:$0xff] (!%p1849_p10) }
  0xae   : > { %2991 = vmatpush3.bf16.msra.mxu0 %v2407_v36 }
  0xaf   : > { %3074 = vmatpush3.bf16.msra.mxu1 %v2407_v36  ;;  %2993 = vmatprep.subr.bf16.mxu0 %v2416_v37  ;;  %v1505_v36 = vld [vmem:[%s3684_s4 + $0x8] sm:$0xff] (!%p1849_p10) }
  0xb0   : > { %3067 = vmatprep.subr.bf16.mxu1 %v2416_v37  ;;  %v1506_v37 = vld [vmem:[%s3684_s4 + $0x10] sm:$0xff] (!%p1849_p10) }
  0xb2   : > { %2995 = vmatpush3.bf16.msra.mxu0 %v2408_v38 }
  0xb3   : > { %3075 = vmatpush3.bf16.msra.mxu1 %v2408_v38  ;;  %v2996_v38 = vpack.c.bf16 (!%p1849_p10), %v1505_v36, %v1504_v35  ;;  %v1851_v36 = vld [vmem:[%s3683_s3] ss:$0 sm:$0xff] (!%p1849_p10) }
  0xb5   : > { %1410 = vmatmul.mubr.f32.vlgmr.msra.gmra.mrb[12].mxu0 %v431_v39  ;;  %v1507_v39 = vld [vmem:[%s3684_s4 + $0x18] sm:$0xff] (!%p1849_p10)  ;;  %2997 = vmatprep.subr.bf16.mxu0 (!%p1849_p10), %v2996_v38 }
  0xb6   : > { %1415 = vmatmul.mubr.f32.vlgmr.msra.gmra.mrb[12].mxu1 %v445_v40  ;;  %v3000_v40 = vpack.c.bf16 (!%p1849_p10), %v1507_v39, %v1506_v37  ;;  %2999 = vmatpush3.bf16.msra.mxu0 (!%p1849_p10), %v2996_v38 }
  0xb8   : > { %3001 = vmatprep.subr.bf16.mxu0 (!%p1849_p10), %v3000_v40 }
  0xba   : > { %3003 = vmatpush3.bf16.msra.mxu0 (!%p1849_p10), %v3000_v40 }
 0x128   : > { %v2449_v41 = vpop.f32.mrb[0].mxu0 }
 0x129   : > { %v2487_v42 = vpop.f32.mrb[0].mxu1  ;;  %v2450_v43 = vpop.f32.mrb[1].mxu0 }
 0x12a   : > { %v2488_v44 = vpop.f32.mrb[1].mxu1  ;;  %v2451_v45 = vadd.f32 %v2450_v43, %v2449_v41  ;;  %v1508_v41 = vld [vmem:[%s3684_s4 + $0x20] sm:$0xff] (!%p1849_p10) }
 0x12b   : > { %v2489_v46 = vadd.f32 %v2488_v44, %v2487_v42  ;;  %v1509_v42 = vld [vmem:[%s3684_s4 + $0x28] sm:$0xff] (!%p1849_p10) }
 0x12c   : > { %v2452_v48 = vpop.f32.mrb[2].mxu0  ;;  %v3004_v43 = vpack.c.bf16 (!%p1849_p10), %v1509_v42, %v1508_v41 }
 0x12d   : > { %v1037_v47 = vadd.f32 %v2489_v46, %v2451_v45  ;;  %v2490_v49 = vpop.f32.mrb[2].mxu1  ;;  %v2453_v50 = vpop.f32.mrb[3].mxu0  ;;  %v1510_v46 = vld [vmem:[%s3684_s4 + $0x30] sm:$0xff] (!%p1849_p10) }
 0x12e   : > { %v2491_v51 = vpop.f32.mrb[3].mxu1  ;;  %v2454_v52 = vadd.f32 %v2453_v50, %v2452_v48  ;;  %3005 = vmatprep.subr.bf16.mxu0 (!%p1849_p10), %v3004_v43 }
 0x12f   : > { %v2492_v53 = vadd.f32 %v2491_v51, %v2490_v49  ;;  %3007 = vmatpush3.bf16.msra.mxu0 (!%p1849_p10), %v3004_v43  ;;  %v1630_v43 = vld [vmem:[%s3686_s6 + $0x80] sm:$0xff] (!%p1849_p10) }
 0x131   : > { %v1042_v54 = vadd.f32 %v2492_v53, %v2454_v52  ;;  %v1512_v53 = vld [vmem:[%s3684_s4 + $0x40] sm:$0xff] (!%p1849_p10) }
 0x148   : > { %v2525_v55 = vpop.f32.mrb[4].mxu0 }
 0x149   : > { %v2563_v56 = vpop.f32.mrb[4].mxu1  ;;  %v2526_v57 = vpop.f32.mrb[5].mxu0 }
 0x14a   : > { %v2564_v58 = vpop.f32.mrb[5].mxu1  ;;  %v2527_v59 = vadd.f32 %v2526_v57, %v2525_v55 }
 0x14b   : > { %v2565_v60 = vadd.f32 %v2564_v58, %v2563_v56 }
 0x14c   : > { %v1112_v61 = vadd.f32 %v2527_v59, %v1037_v47  ;;  %v2528_v62 = vpop.f32.mrb[6].mxu0  ;;  %v1511_v47 = vld [vmem:[%s3684_s4 + $0x38] sm:$0xff] (!%p1849_p10) }
 0x14d   : > { %v2566_v63 = vpop.f32.mrb[6].mxu1  ;;  %v2529_v0 = vpop.f32.mrb[7].mxu0  ;;  %v3008_v52 = vpack.c.bf16 (!%p1849_p10), %v1511_v47, %v1510_v46  ;;  %v1615_v47 = vld [vmem:[%s3686_s6 + $0x8] sm:$0xff] (!%p1849_p10) }
 0x14e   : > { %v2567_v1 = vpop.f32.mrb[7].mxu1  ;;  %v1187_v2 = vadd.f32 %v2565_v60, %v1112_v61  ;;  %v2530_v3 = vadd.f32 %v2529_v0, %v2528_v62  ;;  %v1514_v60 = vld [vmem:[%s3684_s4 + $0x50] sm:$0xff] (!%p1849_p10)  ;;  %v1515_v61 = vld [vmem:[%s3684_s4 + $0x58] sm:$0xff] (!%p1849_p10) }
 0x14f   : > { %v2568_v4 = vadd.f32 %v2567_v1, %v2566_v63  ;;  %3009 = vmatprep.subr.bf16.mxu0 (!%p1849_p10), %v3008_v52 }
 0x150   : > { %v1117_v5 = vadd.f32 %v2530_v3, %v1042_v54  ;;  %v1513_v54 = vld [vmem:[%s3684_s4 + $0x48] sm:$0xff] (!%p1849_p10)  ;;  %3011 = vmatpush3.bf16.msra.mxu0 (!%p1849_p10), %v3008_v52  ;;  %v1516_v3 = vld [vmem:[%s3684_s4 + $0x60] sm:$0xff] (!%p1849_p10)  ;;  %v1616_v52 = vld [vmem:[%s3686_s6 + $0x10] sm:$0xff] (!%p1849_p10) }
 0x151   : > { %v3012_v59 = vpack.c.bf16 (!%p1849_p10), %v1513_v54, %v1512_v53  ;;  %v1617_v53 = vld [vmem:[%s3686_s6 + $0x18] sm:$0xff] (!%p1849_p10)  ;;  %v1634_v54 = vld [vmem:[%s3686_s6 + $0xa0] sm:$0xff] (!%p1849_p10) }
 0x152   : > { %v1192_v6 = vadd.f32 %v2568_v4, %v1117_v5  ;;  %v1517_v4 = vld [vmem:[%s3684_s4 + $0x68] sm:$0xff] (!%p1849_p10) }
 0x153   : > { %3013 = vmatprep.subr.bf16.mxu0 (!%p1849_p10), %v3012_v59 }
 0x154   : > { %3015 = vmatpush3.bf16.msra.mxu0 (!%p1849_p10), %v3012_v59  ;;  %v1619_v59 = vld [vmem:[%s3686_s6 + $0x28] sm:$0xff] (!%p1849_p10) }
 0x168   : > { %v2601_v7 = vpop.f32.mrb[8].mxu0 }
 0x169   : > { %v2639_v8 = vpop.f32.mrb[8].mxu1  ;;  %v2602_v9 = vpop.f32.mrb[9].mxu0 }
 0x16a   : > { %v2640_v10 = vpop.f32.mrb[9].mxu1  ;;  %v2603_v11 = vadd.f32 %v2602_v9, %v2601_v7  ;;  %v3020_v9 = vpack.c.bf16 (!%p1849_p10), %v1517_v4, %v1516_v3  ;;  %v1639_v3 = vld [vmem:[%s3686_s6 + $0xc8] sm:$0xff] (!%p1849_p10) }
 0x16b   : > { %v2641_v12 = vadd.f32 %v2640_v10, %v2639_v8  ;;  %v1518_v10 = vld [vmem:[%s3684_s4 + $0x70] sm:$0xff] (!%p1849_p10) }
 0x16c   : > { %v1262_v13 = vadd.f32 %v2603_v11, %v1187_v2  ;;  %v2604_v14 = vpop.f32.mrb[10].mxu0  ;;  %v3016_v2 = vpack.c.bf16 (!%p1849_p10), %v1515_v61, %v1514_v60  ;;  %v1519_v11 = vld [vmem:[%s3684_s4 + $0x78] sm:$0xff] (!%p1849_p10)  ;;  %v1636_v60 = vld [vmem:[%s3686_s6 + $0xb0] sm:$0xff] (!%p1849_p10) }
 0x16d   : > { %v2642_v15 = vpop.f32.mrb[10].mxu1  ;;  %v2605_v16 = vpop.f32.mrb[11].mxu0  ;;  %v1637_v61 = vld [vmem:[%s3686_s6 + $0xb8] sm:$0xff] (!%p1849_p10) }
 0x16e   : > { %v2643_v17 = vpop.f32.mrb[11].mxu1  ;;  %v1337_v18 = vadd.f32 %v2641_v12, %v1262_v13  ;;  %v2606_v19 = vadd.f32 %v2605_v16, %v2604_v14  ;;  %3017 = vmatprep.subr.bf16.mxu0 (!%p1849_p10), %v3016_v2  ;;  %v3024_v16 = vpack.c.bf16 (!%p1849_p10), %v1519_v11, %v1518_v10 }
 0x16f   : > { %v2644_v20 = vadd.f32 %v2643_v17, %v2642_v15  ;;  %3019 = vmatpush3.bf16.msra.mxu0 (!%p1849_p10), %v3016_v2  ;;  %v1638_v2 = vld [vmem:[%s3686_s6 + $0xc0] sm:$0xff] (!%p1849_p10) }
 0x170   : > { %v1267_v21 = vadd.f32 %v2606_v19, %v1192_v6  ;;  %3021 = vmatprep.subr.bf16.mxu0 (!%p1849_p10), %v3020_v9 }
 0x172   : > { %v1342_v22 = vadd.f32 %v2644_v20, %v1267_v21 }
 0x173   : > { %3023 = vmatpush3.bf16.msra.mxu0 (!%p1849_p10), %v3020_v9  ;;  %v1641_v9 = vld [vmem:[%s3686_s6 + $0xd8] sm:$0xff] (!%p1849_p10) }
 0x174   : > { %3025 = vmatprep.subr.bf16.mxu0 (!%p1849_p10), %v3024_v16 }
 0x177   : > { %3027 = vmatpush3.bf16.msra.mxu0 (!%p1849_p10), %v3024_v16 }
 0x188   : > { %v2677_v23 = vpop.f32.mrb[12].mxu0 }
 0x189   : > { %v2680_v24 = vpop.f32.mrb[12].mxu1  ;;  %v2678_v25 = vpop.f32.mrb[13].mxu0 }
 0x18a   : > { %v2681_v26 = vpop.f32.mrb[13].mxu1  ;;  %v2679_v27 = vadd.f32 %v2678_v25, %v2677_v23 }
 0x18b   : > { %v2682_v28 = vadd.f32 %v2681_v26, %v2680_v24  ;;  %1427 = sbr.rel (%p1849_p10) target bundleno = 1375 (0x55f), region = 79 }
 0x18c   : > { %v1412_v31 = vadd.f32 %v2679_v27, %v1337_v18 }
 0x18d   : > { %v1417_v32 = vadd.f32 %v2682_v28, %v1342_v22 }
 0x18e   : > { %v1420_v33 = vadd.f32 %v1412_v31, %v417_v29 }
 0x18f   : > { %v1421_v34 = vadd.f32 %v1417_v32, %v418_v30  ;;  %v1850_v32 = vld [vmem:[%s3682_s2] ss:$0 sm:$0xff] (!%p1849_p10) }
 0x190   : > { %1422 = vst [vmem:[#allocation2] sm:$0xff] %v1420_v33 }
 0x191   : > { %1423 = vst [vmem:[#allocation2 + $0x8] sm:$0xff] %v1421_v34 }
 0x197   : > { %v1428_v44 = vld [vmem:[#allocation2] sm:$0xff] }
 0x198   : > { %v1429_v45 = vld [vmem:[#allocation2 + $0x8] sm:$0xff]  ;;  %v1430_v48 = vrot.slane %v1428_v44, 4 }
 0x199   : > { %v1438_v49 = vrot.slane %v1429_v45, 4 }
 0x19a   : > { %v1431_v50 = vadd.f32 %v1430_v48, %v1428_v44  ;;  %v1632_v48 = vld [vmem:[%s3686_s6 + $0x90] sm:$0xff] }
 0x19b   : > { %v1439_v51 = vadd.f32 %v1438_v49, %v1429_v45  ;;  %v1633_v49 = vld [vmem:[%s3686_s6 + $0x98] sm:$0xff] }
 0x19c   : > { %v1432_v55 = vrot.slane %v1431_v50, 2 }
 0x19d   : > { %v1440_v56 = vrot.slane %v1439_v51, 2 }
 0x19e   : > { %v1433_v57 = vadd.f32 %v1432_v55, %v1431_v50  ;;  %v1635_v55 = vld [vmem:[%s3686_s6 + $0xa8] sm:$0xff] }
 0x19f   : > { %v1441_v58 = vadd.f32 %v1440_v56, %v1439_v51  ;;  %v3032_v51 = vpack.c.bf16 %v1633_v49, %v1632_v48  ;;  %v3034_v56 = vpack.c.bf16 %v1617_v53, %v1616_v52 }
 0x1a0   : > { %v1434_v62 = vrot.slane %v1433_v57, 1 }
 0x1a1   : > { %v1442_v63 = vrot.slane %v1441_v58, 1 }
 0x1a2   : > { %v1435_v0 = vadd.f32 %v1434_v62, %v1433_v57  ;;  %v3036_v57 = vpack.c.bf16 %v1635_v55, %v1634_v54 }
 0x1a3   : > { %v1443_v1 = vadd.f32 %v1442_v63, %v1441_v58  ;;  %v1618_v58 = vld [vmem:[%s3686_s6 + $0x20] sm:$0xff]  ;;  %v3040_v63 = vpack.c.bf16 %v1637_v61, %v1636_v60 }
 0x1a4   : > { %v1437_v5 = vmul.f32 0.125, %v1435_v0  ;;  %v3038_v62 = vpack.c.bf16 %v1619_v59, %v1618_v58  ;;  %v1620_v0 = vld [vmem:[%s3686_s6 + $0x30] sm:$0xff] }
 0x1a5   : > { %v1444_v6 = vmul.f32 0.125, %v1443_v1  ;;  %v1621_v1 = vld [vmem:[%s3686_s6 + $0x38] sm:$0xff] }
 0x1a6   : > { %v1445_v7 = vsub.f32 %v1428_v44, %v1437_v5  ;;  %v1631_v44 = vld [vmem:[%s3686_s6 + $0x88] sm:$0xff]  ;;  %v3042_v4 = vpack.c.bf16 %v1621_v1, %v1620_v0  ;;  %v3044_v5 = vpack.c.bf16 %v1639_v3, %v1638_v2 }
 0x1a7   : > { %v1454_v8 = vsub.f32 %v1429_v45, %v1444_v6  ;;  %v1614_v45 = vld [vmem:[%s3686_s6] sm:$0xff]  ;;  %v3028_v46 = vpack.c.bf16 %v1631_v44, %v1630_v43 }
 0x1a8   : > { %v1446_v12 = vmul.f32 %v1445_v7, %v1445_v7  ;;  %v3030_v50 = vpack.c.bf16 %v1615_v47, %v1614_v45  ;;  %v1622_v6 = vld [vmem:[%s3686_s6 + $0x40] sm:$0xff] }
 0x1a9   : > { %v1455_v13 = vmul.f32 %v1454_v8, %v1454_v8  ;;  %3029 = vmatprep.subr.bf16.mxu1 %v3028_v46 }
 0x1aa   : > { %v1447_v14 = vrot.slane %v1446_v12, 4  ;;  %3031 = vmatpush3.bf16.xpose.msra.mxu1 %v3030_v50 }
 0x1ab   : > { %v1456_v15 = vrot.slane %v1455_v13, 4  ;;  %3033 = vmatprep.subr.bf16.mxu1 %v3032_v51 }
 0x1ac   : > { %v1448_v17 = vadd.f32 %v1447_v14, %v1446_v12  ;;  %v1624_v12 = vld [vmem:[%s3686_s6 + $0x50] sm:$0xff] }
 0x1ad   : > { %v1457_v18 = vadd.f32 %v1456_v15, %v1455_v13  ;;  %v1625_v13 = vld [vmem:[%s3686_s6 + $0x58] sm:$0xff]  ;;  %v1852_v15 = vld [vmem:[%s3685_s5] ss:$0 sm:$0xff] }
 0x1ae   : > { %v1449_v19 = vrot.slane %v1448_v17, 2  ;;  %v3050_v14 = vpack.c.bf16 %v1625_v13, %v1624_v12 }
 0x1af   : > { %v1458_v20 = vrot.slane %v1457_v18, 2 }
 0x1b0   : > { %v1450_v21 = vadd.f32 %v1449_v19, %v1448_v17 }
 0x1b1   : > { %v1459_v22 = vadd.f32 %v1458_v20, %v1457_v18 }
 0x1b2   : > { %v1451_v23 = vrot.slane %v1450_v21, 1  ;;  %3035 = vmatpush3.bf16.xpose.msra.mxu1 %v3034_v56 }
 0x1b3   : > { %v1460_v24 = vrot.slane %v1459_v22, 1  ;;  %3037 = vmatprep.subr.bf16.mxu1 %v3036_v57 }
 0x1b4   : > { %v1452_v25 = vadd.f32 %v1451_v23, %v1450_v21  ;;  %v1643_v23 = vld [vmem:[%s3686_s6 + $0xe8] sm:$0xff] }
 0x1b5   : > { %v1461_v26 = vadd.f32 %v1460_v24, %v1459_v22  ;;  %v1642_v22 = vld [vmem:[%s3686_s6 + $0xe0] sm:$0xff] }
 0x1b6   : > { %v1453_v27 = vmul.f32 0.125, %v1452_v25  ;;  %v3052_v24 = vpack.c.bf16 %v1643_v23, %v1642_v22  ;;  %v1626_v25 = vld [vmem:[%s3686_s6 + $0x60] sm:$0xff] }
 0x1b7   : > { %v1462_v28 = vmul.f32 0.125, %v1461_v26  ;;  %v1627_v26 = vld [vmem:[%s3686_s6 + $0x68] sm:$0xff] }
 0x1b8   : > { %v1474_v29 = vadd.f32 1e-05, %v1453_v27  ;;  %v3054_v27 = vpack.c.bf16 %v1627_v26, %v1626_v25 }
 0x1b9   : > { %v1476_v30 = vadd.f32 1e-05, %v1462_v28  ;;  %v1644_v28 = vld [vmem:[%s3686_s6 + $0xf0] sm:$0xff] }
 0x1ba   : > { %3110 = vrsqrt.f32 %v1474_v29  ;;  %3039 = vmatpush3.bf16.xpose.msra.mxu1 %v3038_v62  ;;  %v1645_v29 = vld [vmem:[%s3686_s6 + $0xf8] sm:$0xff] }
 0x1bb   : > { %3112 = vrsqrt.f32 %v1476_v30  ;;  %3041 = vmatprep.subr.bf16.mxu1 %v3040_v63  ;;  %v3056_v30 = vpack.c.bf16 %v1645_v29, %v1644_v28 }
 0x1c2   : > { %3043 = vmatpush3.bf16.xpose.msra.mxu1 %v3042_v4 }
 0x1c3   : > { %3045 = vmatprep.subr.bf16.mxu1 %v3044_v5 }
 0x1c4   : > { %v3111_v31 = vpop.eup %3110 }
 0x1c5   : > { %v3113_v33 = vpop.eup %3112  ;;  %v1482_v34 = vmul.f32 %v3111_v31, %v1445_v7  ;;  %v1623_v7 = vld [vmem:[%s3686_s6 + $0x48] sm:$0xff]  ;;  %v1628_v31 = vld [vmem:[%s3686_s6 + $0x70] sm:$0xff] }
 0x1c6   : > { %v1483_v35 = vmul.f32 %v3113_v33, %v1454_v8  ;;  %v1640_v8 = vld [vmem:[%s3686_s6 + $0xd0] sm:$0xff]  ;;  %v3046_v10 = vpack.c.bf16 %v1623_v7, %v1622_v6 }
 0x1c7   : > { %v1491_v37 = vmul.f32 %v1850_v32, %v1482_v34  ;;  %v3048_v11 = vpack.c.bf16 %v1641_v9, %v1640_v8 }
 0x1c8   : > { %v1492_v38 = vmul.f32 %v1850_v32, %v1483_v35  ;;  %v1629_v32 = vld [vmem:[%s3686_s6 + $0x78] sm:$0xff] }
 0x1c9   : > { %v1500_v39 = vadd.f32 %v1851_v36, %v1491_v37  ;;  %v3058_v33 = vpack.c.bf16 %v1629_v32, %v1628_v31 }
 0x1ca   : > { %v1501_v40 = vadd.f32 %v1851_v36, %v1492_v38  ;;  %3047 = vmatpush3.bf16.xpose.msra.mxu1 %v3046_v10 }
 0x1cb   : > { %v1502_v41 = vmax.f32 %v1500_v39, 0.0  ;;  %3049 = vmatprep.subr.bf16.mxu1 %v3048_v11 }
 0x1cc   : > { %v1503_v42 = vmax.f32 %v1501_v40, 0.0 }
 0x1cd   : > { %2769 = vmatprep.mubr.f32.mxu0 %v1502_v41 }
 0x1ce   : > { %2770 = vmatmul.mubr.f32.vlgmr.msra.gmra.mrb[0].mxu0 %v1503_v42 }
 0x1d2   : > { %3051 = vmatpush3.bf16.xpose.msra.mxu1 %v3050_v14 }
 0x1d3   : > { %3053 = vmatprep.subr.bf16.mxu1 %v3052_v24 }
 0x1da   : > { %3055 = vmatpush3.bf16.xpose.msra.mxu1 %v3054_v27 }
 0x1db   : > { %3057 = vmatprep.subr.bf16.mxu1 %v3056_v30 }
 0x1e2   : > { %3059 = vmatpush3.bf16.xpose.msra.mxu1 %v3058_v33 }
 0x2a1   : > { %v2771_v16 = vpop.f32.mrb[0].mxu0 }
 0x2a2   : > { %v1593_v17 = vpop.f32.mrb[1].mxu0  ;;  %v1599_v19 = vadd.f32 %v2771_v16, %v1852_v15 }
 0x2a3   : > { %v1594_v18 = vadd.f32 %v1852_v15, %v1593_v17 }
 0x2a4   : > { %v1603_v21 = vmul.f32 %v1599_v19, %v1599_v19 }
 0x2a5   : > { %v1602_v20 = vmul.f32 %v1594_v18, %v1594_v18 }
 0x2a7   : > { %1604 = vadd.xlane.f32.xlu0 %v1602_v20 }
 0x2ab   : > { %1606 = vadd.xlane.f32.xlu0 %v1603_v21 }
 0x334   : > { %v1605_v34 = vpop.xlane.xlu0 %1604 }
 0x335   : > { %v1608_v35 = vmax.f32 %v1605_v34, 1e-24 }
 0x337   : > { %3114 = vrsqrt.f32 %v1608_v35 }
 0x338   : > { %v1607_v36 = vpop.xlane.xlu0 %1606 }
 0x339   : > { %v1609_v37 = vmax.f32 %v1607_v36, 1e-24 }
 0x33b   : > { %3116 = vrsqrt.f32 %v1609_v37 }
 0x341   : > { %v3115_v38 = vpop.eup %3114 }
 0x342   : > { %v1612_v39 = vmul.f32 %v3115_v38, %v1594_v18 }
 0x344   : > { %2733 = vmatprep.mubr.f32.mxu1 %v1612_v39 }
 0x345   : > { %v3117_v40 = vpop.eup %3116  ;;  %2734 = vmatmul.mubr.f32.vlgmr.msra.gmra.mrb[0].mxu1 %v1612_v39 }
 0x346   : > { %v1613_v41 = vmul.f32 %v3117_v40, %v1599_v19 }
 0x348   : > { %2735 = vmatprep.mubr.f32.mxu1 %v1613_v41  ;;  %1765 = vst [vmem:[%s3689_s9] sm:$0xff] %v1613_v41 }
 0x349   : > { %2736 = vmatmul.mubr.f32.gmra.mrb[2].mxu1 %v1613_v41 }
 0x418   : > { %v1712_v42 = vpop.f32.mrb[0].mxu1 }
 0x419   : > { %v1725_v43 = vmul.f32 10.0, %v1712_v42  ;;  %v1714_v44 = vpop.f32.mrb[1].mxu1 }
 0x41a   : > { %v1726_v45 = vmul.f32 10.0, %v1714_v44 }
 0x41c   : > { %v1718_v46 = vpop.f32.mrb[2].mxu1  ;;  %v1729_v47 = vmax.f32 %v1725_v43, %v1726_v45 }
 0x41d   : > { %v1727_v48 = vmul.f32 100.0, %v1718_v46  ;;  %v1720_v49 = vpop.f32.mrb[3].mxu1 }
 0x41e   : > { %v1728_v50 = vmul.f32 100.0, %v1720_v49  ;;  %1730 = vmax.xlane.f32.xlu1 %v1729_v47 }
 0x420   : > { %v1748_v51 = vmax.f32 %v1727_v48, %v1728_v50 }
 0x422   : > { %1749 = vmax.xlane.f32.xlu1 %v1748_v51 }
 0x4ab   : > { %v1731_v52 = vpop.xlane.xlu1 %1730 }
 0x4ac   : > { %v1732_v53 = vsub.f32 %v1725_v43, %v1731_v52  ;;  %v1733_v54 = vsub.f32 %v1726_v45, %v1731_v52 }
 0x4ae   : > { %v1734_v55 = vmul.f32 1.442695, %v1732_v53  ;;  %v1736_v56 = vmul.f32 1.442695, %v1733_v54 }
 0x4af   : > { %v1750_v57 = vpop.xlane.xlu1 %1749 }
 0x4b0   : > { %3118 = vpow2.f32 %v1734_v55  ;;  %v1751_v58 = vsub.f32 %v1727_v48, %v1750_v57  ;;  %v1752_v59 = vsub.f32 %v1728_v50, %v1750_v57 }
 0x4b1   : > { %3120 = vpow2.f32 %v1736_v56 }
 0x4b2   : > { %v1753_v60 = vmul.f32 1.442695, %v1751_v58  ;;  %v1755_v61 = vmul.f32 1.442695, %v1752_v59 }
 0x4b4   : > { %3122 = vpow2.f32 %v1753_v60 }
 0x4b5   : > { %3124 = vpow2.f32 %v1755_v61 }
 0x4ba   : > { %v3119_v62 = vpop.eup %3118 }
 0x4bb   : > { %v3121_v63 = vpop.eup %3120 }
 0x4bc   : > { %v1738_v0 = vadd.f32 %v3121_v63, %v3119_v62 }
 0x4be   : > { %v3123_v1 = vpop.eup %3122  ;;  %1739 = vadd.xlane.f32.xlu0 %v1738_v0 }
 0x4bf   : > { %v3125_v2 = vpop.eup %3124 }
 0x4c0   : > { %v1757_v3 = vadd.f32 %v3125_v2, %v3123_v1 }
 0x4c2   : > { %1758 = vadd.xlane.f32.xlu1 %v1757_v3 }
 0x54b   : > { %v1740_v4 = vpop.xlane.xlu0 %1739 }
 0x54c   : > { %3126 = vlog2.f32 %v1740_v4 }
 0x54f   : > { %v1759_v5 = vpop.xlane.xlu1 %1758 }
 0x550   : > { %3128 = vrcp.f32 %v1759_v5 }
 0x556   : > { %v3127_v6 = vpop.eup %3126 }
 0x557   : > { %v1742_v7 = vmul.f32 0.6931472, %v3127_v6 }
 0x559   : > { %v1743_v8 = vadd.f32 %v1742_v7, %v1731_v52 }
 0x55a   : > { %v3129_v9 = vpop.eup %3128 }
 0x55b   : > { %v1744_v10 = vsub.f32 %v1725_v43, %v1743_v8  ;;  %v1745_v11 = vsub.f32 %v1726_v45, %v1743_v8  ;;  %v1761_v12 = vmul.f32 %v3129_v9, %v3123_v1  ;;  %v1762_v13 = vmul.f32 %v3129_v9, %v3125_v2 }
 0x55d   : > { %1746 = vst [vmem:[#allocation4] sm:$0xff] %v1744_v10  ;;  %1747 = vst [vmem:[#allocation4 + $0x8] sm:$0xff] %v1745_v11 }
 0x55e   : > { %1763 = vst [vmem:[%s3688_s8] sm:$0xff] %v1761_v12  ;;  %1764 = vst [vmem:[%s3688_s8 + $0x8] sm:$0xff] %v1762_v13 }
 0x55f PF: > { %p3082_p11 = scmp.eq.s32.totalorder %s3252_s12, 1  ;;  %s3185_s21 = smov [#allocation4]  }
 0x560   : > { %s1773_s22 = sshll.u32 %s3185_s21, 4  ;;  %s1774_s22 = int_to_ptr.vmem [resolvable:$true] %s1773_s22 }
 0x561   : > { %s3130_s23 = scalar_lea.vmem %s1774_s22, 256  ;;  %p3137_p1 = scmp.lt.s32.totalorder %s1774_s22, %s1774_s22 }
 0x562   : > { %p3131_p12 = scmp.ne.s32.totalorder %s1774_s22, %s3130_s23  ;;  %p3138_p2 = scmp.lt.s32.totalorder %s3130_s23, %s3130_s23 }
 0x564   : > { %p3132_p13 = pnand %p3131_p12, %p3082_p11  ;;  %p3139_p3 = por %p3138_p2, %p3137_p1 }
 0x566   : > { %p3133_p0 = pneg %p3132_p13 }
 0x568   : > { %p3140_p4 = pnand %p3139_p3, %p3133_p0 }
 0x56a   : > { %3143 = shalt.err (!%p3140_p4)
}
 0x56b   : > { %s3144_s26 = scalar_lea.hbm %s3687_s7, 256 }
 0x56c   : > { %p3145_p5 = scmp.ne.s32.totalorder %s3687_s7, %s3144_s26  ;;  %p3150_p8 = scmp.lt.u32.totalorder %s3144_s26, %s3687_s7 }
 0x56e   : > { %p3146_p6 = pnand %p3145_p5, %p3082_p11 }
 0x570   : > { %p3147_p7 = pneg %p3146_p6 }
 0x572   : > { %p3152_p9 = pnand %p3150_p8, %p3147_p7 }
 0x574   : > { %3155 = shalt.err (!%p3152_p9)
}
 0x575   : > { %3079 = dma.vmem_to_hbm [thread:$0]  (%p3082_p11), %s1774_s22, 256, %s3687_s7, [#allocation5]  }
 0x576   : > { %3169 = dma.done.wait (%p3082_p11), [#allocation5], 256  }
 0x577   : > { %3171 = vsyncadd (%p3082_p11), [#allocation5], 4294967040 }
 0x578 PF: > { %p18_p10 = scmp.ge.s32.totalorder %s3255_s13, 4   ;;  %s3690_s30 = smov %s3178_s10 }
 0x579   : > { %s3691_s10 = smov %s3264_s16  ;;  %s3692_s11 = smov %s3255_s13 }
 0x57a   :  { %20 = sbr.rel (!%p18_p10) target bundleno = 2 (0x2), region = 130 }
 0x581   :  { %1798 = vsyncpa [#allocation5], 1 }
 0x582   :  { %1800 = vsyncpa [#allocation5 + $0x1], 1 }

</bundles_post_ra>
